<compile_context>
chip_gen: v6e
topology: v6e:2x2x1
jax: 0.10.0
libtpu: 0.0.40
codegen_flags: <defaults>
</compile_context>

<pallas_src>
import functools

import jax
import jax.numpy as jnp
from jax import lax
from jax.experimental import pallas as pl
from jax.experimental.pallas import tpu as pltpu


def _round_up(a, b):
    return (a + b - 1) // b * b


def mgate_kernel(x1_ref, x2_ref, x3_ref, w_ref, b_ref, out_ref, *,
                 C, Wr, PAD, HWrp, Tc, alpha):
    """One batch element per grid step.

    x*_ref : (1, C, S)   bf16  zero-padded, row-flattened inputs.  Image pixel
                         (h, w) lives at flat index PAD + h*Wr + (w + 1); all
                         other positions are zero, so every 3x3 tap is a plain
                         shifted slice (no boundary masks needed).
    w_ref  : (3, 9, 3C, C) bf16 per-cell, per-tap conv weights (tap = kh*3+kw),
                         out-channel rows ordered [i; f; r].
    b_ref  : (3, 3C, 1)  f32   conv biases.
    out_ref: (1, C, HWrp) f32  row-flattened output incl. pad columns
                         (stripped in the wrapper).
    """
    # Flat shifts of the 9 taps of a 3x3 'same' conv on the Wr-strided image.
    shifts = [(kh - 1) * Wr + (kw - 1) for kh in range(3) for kw in range(3)]

    # Tiny; hoist out of the spatial-chunk loop (JAX does not CSE these).
    w = [[w_ref[cell, t] for t in range(9)] for cell in range(3)]   # (3C, C) bf16
    b = [b_ref[cell] for cell in range(3)]                          # (3C, 1) f32

    x_refs = (x1_ref, x2_ref, x3_ref)
    n_chunks = HWrp // Tc
    for j in range(n_chunks):             # static unroll; chunk count is small
        base = PAD + j * Tc               # static, 128-aligned

        def window(i, s):
            # Lane-dense static slice straight from the ref (no slab load).
            return x_refs[i][0, :, base + s: base + s + Tc]         # (C, Tc) bf16

        # Unconvolved centre taps used by the gating math (f32 on all gens).
        xc = [window(i, 0).astype(jnp.float32) for i in range(3)]

        def conv3x3(cell, i):
            # 3x3 'same' conv as 9 accumulating MXU matmuls over shifted
            # slices: bf16 operands, f32 accumulation, bias added once.
            acc = jnp.dot(w[cell][0], window(i, shifts[0]),
                          preferred_element_type=jnp.float32)
            for t in range(1, 9):
                acc = acc + jnp.dot(w[cell][t], window(i, shifts[t]),
                                    preferred_element_type=jnp.float32)
            return acc + b[cell]                                     # (3C, Tc) f32

        def gate_cell(cell, ia, ib, ic):
            y = conv3x3(cell, ia)
            i_ = y[0 * C:1 * C, :]        # sublane-aligned slices (C % 8 == 0)
            f_ = y[1 * C:2 * C, :]
            r_ = y[2 * C:3 * C, :]
            # sigmoid via EUP exp + approx EUP reciprocal (frees the VPU slot).
            f = pl.reciprocal(1.0 + jnp.exp(-(f_ + 1.0)), approx=True)
            r = pl.reciprocal(1.0 + jnp.exp(-(r_ + 1.0)), approx=True)
            c = alpha * f * xc[ib] + (1.0 - alpha) * f * xc[ic] + (1.0 - f) * i_
            return r * jnp.tanh(c) + (1.0 - r) * xc[ia]

        o = (gate_cell(0, 0, 1, 2)
             + gate_cell(1, 1, 2, 0)
             + gate_cell(2, 2, 0, 1))
        out_ref[0, :, j * Tc:(j + 1) * Tc] = o.astype(out_ref.dtype)  # lane-dense


def _repack_weight(w):
    """PyTorch conv weight (3C, C, 3, 3) OIHW -> (9, 3C, C), tap-major."""
    co, ci = w.shape[0], w.shape[1]
    return jnp.transpose(w, (2, 3, 0, 1)).reshape(9, co, ci)


def _pick_chunk(HWrp):
    # Largest 128-multiple divisor <= 512: big enough to amortize overheads,
    # small enough that per-chunk intermediates stay vreg-sized.
    for cand in (512, 384, 256, 128):
        if HWrp % cand == 0:
            return cand
    return HWrp


def mgate_forward(x1, x2, x3, params, alpha=0.5):
    """x*: (N, C, H, W) float32.  params: 3x (w: (3C, C, 3, 3), b: (3C,))."""
    N, C, H, W = x1.shape
    Wr = W + 2                        # one zero column each side -> no edge masks
    HWr = H * Wr
    HWrp = _round_up(HWr, 128)        # lane-dense output width
    PAD = _round_up(Wr + 1, 128)      # flat halo >= one row + 1, 128-aligned
    S = PAD + HWrp + PAD
    Tc = _pick_chunk(HWrp)

    def prep(x):
        xw = jnp.pad(x, ((0, 0), (0, 0), (0, 0), (1, 1)))            # (N,C,H,Wr)
        xf = xw.reshape(N, C, HWr).astype(jnp.bfloat16)              # bf16 in HBM
        return jnp.pad(xf, ((0, 0), (0, 0), (PAD, S - PAD - HWr)))   # (N,C,S)

    x1p, x2p, x3p = prep(x1), prep(x2), prep(x3)
    w_stack = jnp.stack([_repack_weight(w) for w, _ in params]
                        ).astype(jnp.bfloat16)                        # (3,9,3C,C)
    b_stack = jnp.stack([b.reshape(-1, 1) for _, b in params]
                        ).astype(jnp.float32)                         # (3,3C,1)

    kernel = functools.partial(mgate_kernel, C=C, Wr=Wr, PAD=PAD, HWrp=HWrp,
                               Tc=Tc, alpha=float(alpha))

    x_spec = pl.BlockSpec((1, C, S), lambda n: (n, 0, 0))
    # Full-array (un-blocked) VMEM residency for the small constants ->
    # single-buffered, no per-step pipeline bookkeeping.
    const_spec = pl.BlockSpec(memory_space=pltpu.MemorySpace.VMEM)
    out_spec = pl.BlockSpec((1, C, HWrp), lambda n: (n, 0, 0))

    # VMEM budget: double-buffered bf16 x slabs + double-buffered f32 out block
    # + resident weights + per-chunk intermediates; 2x margin, capped at 48 MiB
    # so the same config also fits v7x (64 MiB VMEM).
    needed = (3 * 2 * C * S * 2                     # x slabs (bf16, 2 buffers)
              + 2 * C * HWrp * 4                    # output block (2 buffers)
              + int(w_stack.size) * 2 + int(b_stack.size) * 4
              + 3 * 9 * C * Tc * 2                  # tap windows
              + 3 * 3 * C * Tc * 4                  # conv accumulators
              + 16 * C * Tc * 4)                    # gating temps slack
    vmem_limit = int(min(max(2 * needed + (4 << 20), 32 << 20), 48 << 20))

    out = pl.pallas_call(
        kernel,
        out_shape=jax.ShapeDtypeStruct((N, C, HWrp), x1.dtype),
        grid=(N,),
        in_specs=[x_spec, x_spec, x_spec, const_spec, const_spec],
        out_specs=out_spec,
        compiler_params=pltpu.CompilerParams(
            dimension_semantics=("parallel",),      # megacore over batch
            vmem_limit_bytes=vmem_limit),
    )(x1p, x2p, x3p, w_stack, b_stack)

    # Strip the pad columns / rounding tail and restore NCHW.
    return out[:, :, :HWr].reshape(N, C, H, Wr)[:, :, :, 1:W + 1]


# ---------------- pure-JAX reference (for correctness check) ----------------

def _ref_gate_cell(x1, x2, x3, w, b, alpha):
    y = lax.conv_general_dilated(
        x1, w, window_strides=(1, 1), padding="SAME",
        dimension_numbers=("NCHW", "OIHW", "NCHW")) + b[None, :, None, None]
    C = x1.shape[1]
    i_, f_, r_ = y[:, :C], y[:, C:2 * C], y[:, 2 * C:]
    f = jax.nn.sigmoid(f_ + 1.0)
    r = jax.nn.sigmoid(r_ + 1.0)
    c = alpha * f * x2 + (1.0 - alpha) * f * x3 + (1.0 - f) * i_
    return r * jnp.tanh(c) + (1.0 - r) * x1


def _ref_mgate(x1, x2, x3, params, alpha):
    (w1, b1), (w2, b2), (w3, b3) = params
    o1 = _ref_gate_cell(x1, x2, x3, w1, b1, alpha)
    o2 = _ref_gate_cell(x2, x3, x1, w2, b2, alpha)
    o3 = _ref_gate_cell(x3, x1, x2, w3, b3, alpha)
    return o1 + o2 + o3


if __name__ == "__main__":
    N, C, H, W = 2, 8, 16, 16       # NCHW, matching the PyTorch module layout
    alpha = 0.5

    key = jax.random.PRNGKey(0)
    ks = jax.random.split(key, 9)

    # Deterministic synthetic conv parameters (C -> 3C, 3x3, PyTorch OIHW layout).
    params = []
    for cell in range(3):
        w = 0.1 * jax.random.normal(ks[2 * cell], (3 * C, C, 3, 3), jnp.float32)
        b = 0.1 * jax.random.normal(ks[2 * cell + 1], (3 * C,), jnp.float32)
        params.append((w, b))

    x1 = jax.random.normal(ks[6], (N, C, H, W), jnp.float32)
    x2 = jax.random.normal(ks[7], (N, C, H, W), jnp.float32)
    x3 = jax.random.normal(ks[8], (N, C, H, W), jnp.float32)

    fwd = jax.jit(functools.partial(mgate_forward, alpha=alpha))
    out = jax.block_until_ready(fwd(x1, x2, x3, params))
    ref = jax.block_until_ready(_ref_mgate(x1, x2, x3, params, alpha))

    # Tolerance loosened for bf16 MXU operands / bf16-stored inputs (reference
    # conv is pure f32); structural bugs (wrong tap/gate packing) give O(1) errors.
    if not jnp.allclose(out, ref, atol=1e-1, rtol=1e-1):
        err = float(jnp.max(jnp.abs(out - ref)))
        raise AssertionError(f"Pallas MGATE mismatch vs reference, max abs err={err}")

    print("KERNEL_OK")
</pallas_src>

<mosaic_0001>
module attributes {stable_mosaic.version = 11 : i64} {
  func.func @mgate_kernel(%arg0: i32, %arg1: memref<1x8x640xbf16, #tpu.memory_space<vmem>>, %arg2: memref<1x8x640xbf16, #tpu.memory_space<vmem>>, %arg3: memref<1x8x640xbf16, #tpu.memory_space<vmem>>, %arg4: memref<3x9x24x8xbf16, #tpu.memory_space<vmem>>, %arg5: memref<3x24x1xf32, #tpu.memory_space<vmem>>, %arg6: memref<1x8x384xf32, #tpu.memory_space<vmem>>) attributes {dimension_semantics = [#tpu.dimension_semantics<parallel>], iteration_bounds = array<i64: 2>, scalar_prefetch = 0 : i64, scratch_operands = 0 : i64, tpu.core_type = #tpu.core_type<tc>, window_params = [{transform_indices = @transform_0, window_bounds = array<i64: 1, 8, 640>}, {transform_indices = @transform_1, window_bounds = array<i64: 1, 8, 640>}, {transform_indices = @transform_2, window_bounds = array<i64: 1, 8, 640>}, {pipeline_mode = #tpu.pipeline_mode<synchronous>, transform_indices = @transform_3, window_bounds = array<i64: 3, 9, 24, 8>}, {pipeline_mode = #tpu.pipeline_mode<synchronous>, transform_indices = @transform_4, window_bounds = array<i64: 3, 24, 1>}, {transform_indices = @transform_5, window_bounds = array<i64: 1, 8, 384>}]} {
    %c0 = arith.constant 0 : index
    %c0_0 = arith.constant 0 : index
    %c0_1 = arith.constant 0 : index
    %c0_2 = arith.constant 0 : index
    %0 = vector.load %arg4[%c0, %c0_0, %c0_1, %c0_2] : memref<3x9x24x8xbf16, #tpu.memory_space<vmem>>, vector<1x1x24x8xbf16>
    %1 = vector.shape_cast %0 : vector<1x1x24x8xbf16> to vector<24x8xbf16>
    %c0_3 = arith.constant 0 : index
    %c1 = arith.constant 1 : index
    %c0_4 = arith.constant 0 : index
    %c0_5 = arith.constant 0 : index
    %2 = vector.load %arg4[%c0_3, %c1, %c0_4, %c0_5] : memref<3x9x24x8xbf16, #tpu.memory_space<vmem>>, vector<1x1x24x8xbf16>
    %3 = vector.shape_cast %2 : vector<1x1x24x8xbf16> to vector<24x8xbf16>
    %c0_6 = arith.constant 0 : index
    %c2 = arith.constant 2 : index
    %c0_7 = arith.constant 0 : index
    %c0_8 = arith.constant 0 : index
    %4 = vector.load %arg4[%c0_6, %c2, %c0_7, %c0_8] : memref<3x9x24x8xbf16, #tpu.memory_space<vmem>>, vector<1x1x24x8xbf16>
    %5 = vector.shape_cast %4 : vector<1x1x24x8xbf16> to vector<24x8xbf16>
    %c0_9 = arith.constant 0 : index
    %c3 = arith.constant 3 : index
    %c0_10 = arith.constant 0 : index
    %c0_11 = arith.constant 0 : index
    %6 = vector.load %arg4[%c0_9, %c3, %c0_10, %c0_11] : memref<3x9x24x8xbf16, #tpu.memory_space<vmem>>, vector<1x1x24x8xbf16>
    %7 = vector.shape_cast %6 : vector<1x1x24x8xbf16> to vector<24x8xbf16>
    %c0_12 = arith.constant 0 : index
    %c4 = arith.constant 4 : index
    %c0_13 = arith.constant 0 : index
    %c0_14 = arith.constant 0 : index
    %8 = vector.load %arg4[%c0_12, %c4, %c0_13, %c0_14] : memref<3x9x24x8xbf16, #tpu.memory_space<vmem>>, vector<1x1x24x8xbf16>
    %9 = vector.shape_cast %8 : vector<1x1x24x8xbf16> to vector<24x8xbf16>
    %c0_15 = arith.constant 0 : index
    %c5 = arith.constant 5 : index
    %c0_16 = arith.constant 0 : index
    %c0_17 = arith.constant 0 : index
    %10 = vector.load %arg4[%c0_15, %c5, %c0_16, %c0_17] : memref<3x9x24x8xbf16, #tpu.memory_space<vmem>>, vector<1x1x24x8xbf16>
    %11 = vector.shape_cast %10 : vector<1x1x24x8xbf16> to vector<24x8xbf16>
    %c0_18 = arith.constant 0 : index
    %c6 = arith.constant 6 : index
    %c0_19 = arith.constant 0 : index
    %c0_20 = arith.constant 0 : index
    %12 = vector.load %arg4[%c0_18, %c6, %c0_19, %c0_20] : memref<3x9x24x8xbf16, #tpu.memory_space<vmem>>, vector<1x1x24x8xbf16>
    %13 = vector.shape_cast %12 : vector<1x1x24x8xbf16> to vector<24x8xbf16>
    %c0_21 = arith.constant 0 : index
    %c7 = arith.constant 7 : index
    %c0_22 = arith.constant 0 : index
    %c0_23 = arith.constant 0 : index
    %14 = vector.load %arg4[%c0_21, %c7, %c0_22, %c0_23] : memref<3x9x24x8xbf16, #tpu.memory_space<vmem>>, vector<1x1x24x8xbf16>
    %15 = vector.shape_cast %14 : vector<1x1x24x8xbf16> to vector<24x8xbf16>
    %c0_24 = arith.constant 0 : index
    %c8 = arith.constant 8 : index
    %c0_25 = arith.constant 0 : index
    %c0_26 = arith.constant 0 : index
    %16 = vector.load %arg4[%c0_24, %c8, %c0_25, %c0_26] : memref<3x9x24x8xbf16, #tpu.memory_space<vmem>>, vector<1x1x24x8xbf16>
    %17 = vector.shape_cast %16 : vector<1x1x24x8xbf16> to vector<24x8xbf16>
    %c1_27 = arith.constant 1 : index
    %c0_28 = arith.constant 0 : index
    %c0_29 = arith.constant 0 : index
    %c0_30 = arith.constant 0 : index
    %18 = vector.load %arg4[%c1_27, %c0_28, %c0_29, %c0_30] : memref<3x9x24x8xbf16, #tpu.memory_space<vmem>>, vector<1x1x24x8xbf16>
    %19 = vector.shape_cast %18 : vector<1x1x24x8xbf16> to vector<24x8xbf16>
    %c1_31 = arith.constant 1 : index
    %c1_32 = arith.constant 1 : index
    %c0_33 = arith.constant 0 : index
    %c0_34 = arith.constant 0 : index
    %20 = vector.load %arg4[%c1_31, %c1_32, %c0_33, %c0_34] : memref<3x9x24x8xbf16, #tpu.memory_space<vmem>>, vector<1x1x24x8xbf16>
    %21 = vector.shape_cast %20 : vector<1x1x24x8xbf16> to vector<24x8xbf16>
    %c1_35 = arith.constant 1 : index
    %c2_36 = arith.constant 2 : index
    %c0_37 = arith.constant 0 : index
    %c0_38 = arith.constant 0 : index
    %22 = vector.load %arg4[%c1_35, %c2_36, %c0_37, %c0_38] : memref<3x9x24x8xbf16, #tpu.memory_space<vmem>>, vector<1x1x24x8xbf16>
    %23 = vector.shape_cast %22 : vector<1x1x24x8xbf16> to vector<24x8xbf16>
    %c1_39 = arith.constant 1 : index
    %c3_40 = arith.constant 3 : index
    %c0_41 = arith.constant 0 : index
    %c0_42 = arith.constant 0 : index
    %24 = vector.load %arg4[%c1_39, %c3_40, %c0_41, %c0_42] : memref<3x9x24x8xbf16, #tpu.memory_space<vmem>>, vector<1x1x24x8xbf16>
    %25 = vector.shape_cast %24 : vector<1x1x24x8xbf16> to vector<24x8xbf16>
    %c1_43 = arith.constant 1 : index
    %c4_44 = arith.constant 4 : index
    %c0_45 = arith.constant 0 : index
    %c0_46 = arith.constant 0 : index
    %26 = vector.load %arg4[%c1_43, %c4_44, %c0_45, %c0_46] : memref<3x9x24x8xbf16, #tpu.memory_space<vmem>>, vector<1x1x24x8xbf16>
    %27 = vector.shape_cast %26 : vector<1x1x24x8xbf16> to vector<24x8xbf16>
    %c1_47 = arith.constant 1 : index
    %c5_48 = arith.constant 5 : index
    %c0_49 = arith.constant 0 : index
    %c0_50 = arith.constant 0 : index
    %28 = vector.load %arg4[%c1_47, %c5_48, %c0_49, %c0_50] : memref<3x9x24x8xbf16, #tpu.memory_space<vmem>>, vector<1x1x24x8xbf16>
    %29 = vector.shape_cast %28 : vector<1x1x24x8xbf16> to vector<24x8xbf16>
    %c1_51 = arith.constant 1 : index
    %c6_52 = arith.constant 6 : index
    %c0_53 = arith.constant 0 : index
    %c0_54 = arith.constant 0 : index
    %30 = vector.load %arg4[%c1_51, %c6_52, %c0_53, %c0_54] : memref<3x9x24x8xbf16, #tpu.memory_space<vmem>>, vector<1x1x24x8xbf16>
    %31 = vector.shape_cast %30 : vector<1x1x24x8xbf16> to vector<24x8xbf16>
    %c1_55 = arith.constant 1 : index
    %c7_56 = arith.constant 7 : index
    %c0_57 = arith.constant 0 : index
    %c0_58 = arith.constant 0 : index
    %32 = vector.load %arg4[%c1_55, %c7_56, %c0_57, %c0_58] : memref<3x9x24x8xbf16, #tpu.memory_space<vmem>>, vector<1x1x24x8xbf16>
    %33 = vector.shape_cast %32 : vector<1x1x24x8xbf16> to vector<24x8xbf16>
    %c1_59 = arith.constant 1 : index
    %c8_60 = arith.constant 8 : index
    %c0_61 = arith.constant 0 : index
    %c0_62 = arith.constant 0 : index
    %34 = vector.load %arg4[%c1_59, %c8_60, %c0_61, %c0_62] : memref<3x9x24x8xbf16, #tpu.memory_space<vmem>>, vector<1x1x24x8xbf16>
    %35 = vector.shape_cast %34 : vector<1x1x24x8xbf16> to vector<24x8xbf16>
    %c2_63 = arith.constant 2 : index
    %c0_64 = arith.constant 0 : index
    %c0_65 = arith.constant 0 : index
    %c0_66 = arith.constant 0 : index
    %36 = vector.load %arg4[%c2_63, %c0_64, %c0_65, %c0_66] : memref<3x9x24x8xbf16, #tpu.memory_space<vmem>>, vector<1x1x24x8xbf16>
    %37 = vector.shape_cast %36 : vector<1x1x24x8xbf16> to vector<24x8xbf16>
    %c2_67 = arith.constant 2 : index
    %c1_68 = arith.constant 1 : index
    %c0_69 = arith.constant 0 : index
    %c0_70 = arith.constant 0 : index
    %38 = vector.load %arg4[%c2_67, %c1_68, %c0_69, %c0_70] : memref<3x9x24x8xbf16, #tpu.memory_space<vmem>>, vector<1x1x24x8xbf16>
    %39 = vector.shape_cast %38 : vector<1x1x24x8xbf16> to vector<24x8xbf16>
    %c2_71 = arith.constant 2 : index
    %c2_72 = arith.constant 2 : index
    %c0_73 = arith.constant 0 : index
    %c0_74 = arith.constant 0 : index
    %40 = vector.load %arg4[%c2_71, %c2_72, %c0_73, %c0_74] : memref<3x9x24x8xbf16, #tpu.memory_space<vmem>>, vector<1x1x24x8xbf16>
    %41 = vector.shape_cast %40 : vector<1x1x24x8xbf16> to vector<24x8xbf16>
    %c2_75 = arith.constant 2 : index
    %c3_76 = arith.constant 3 : index
    %c0_77 = arith.constant 0 : index
    %c0_78 = arith.constant 0 : index
    %42 = vector.load %arg4[%c2_75, %c3_76, %c0_77, %c0_78] : memref<3x9x24x8xbf16, #tpu.memory_space<vmem>>, vector<1x1x24x8xbf16>
    %43 = vector.shape_cast %42 : vector<1x1x24x8xbf16> to vector<24x8xbf16>
    %c2_79 = arith.constant 2 : index
    %c4_80 = arith.constant 4 : index
    %c0_81 = arith.constant 0 : index
    %c0_82 = arith.constant 0 : index
    %44 = vector.load %arg4[%c2_79, %c4_80, %c0_81, %c0_82] : memref<3x9x24x8xbf16, #tpu.memory_space<vmem>>, vector<1x1x24x8xbf16>
    %45 = vector.shape_cast %44 : vector<1x1x24x8xbf16> to vector<24x8xbf16>
    %c2_83 = arith.constant 2 : index
    %c5_84 = arith.constant 5 : index
    %c0_85 = arith.constant 0 : index
    %c0_86 = arith.constant 0 : index
    %46 = vector.load %arg4[%c2_83, %c5_84, %c0_85, %c0_86] : memref<3x9x24x8xbf16, #tpu.memory_space<vmem>>, vector<1x1x24x8xbf16>
    %47 = vector.shape_cast %46 : vector<1x1x24x8xbf16> to vector<24x8xbf16>
    %c2_87 = arith.constant 2 : index
    %c6_88 = arith.constant 6 : index
    %c0_89 = arith.constant 0 : index
    %c0_90 = arith.constant 0 : index
    %48 = vector.load %arg4[%c2_87, %c6_88, %c0_89, %c0_90] : memref<3x9x24x8xbf16, #tpu.memory_space<vmem>>, vector<1x1x24x8xbf16>
    %49 = vector.shape_cast %48 : vector<1x1x24x8xbf16> to vector<24x8xbf16>
    %c2_91 = arith.constant 2 : index
    %c7_92 = arith.constant 7 : index
    %c0_93 = arith.constant 0 : index
    %c0_94 = arith.constant 0 : index
    %50 = vector.load %arg4[%c2_91, %c7_92, %c0_93, %c0_94] : memref<3x9x24x8xbf16, #tpu.memory_space<vmem>>, vector<1x1x24x8xbf16>
    %51 = vector.shape_cast %50 : vector<1x1x24x8xbf16> to vector<24x8xbf16>
    %c2_95 = arith.constant 2 : index
    %c8_96 = arith.constant 8 : index
    %c0_97 = arith.constant 0 : index
    %c0_98 = arith.constant 0 : index
    %52 = vector.load %arg4[%c2_95, %c8_96, %c0_97, %c0_98] : memref<3x9x24x8xbf16, #tpu.memory_space<vmem>>, vector<1x1x24x8xbf16>
    %53 = vector.shape_cast %52 : vector<1x1x24x8xbf16> to vector<24x8xbf16>
    %c0_99 = arith.constant 0 : index
    %c0_100 = arith.constant 0 : index
    %c0_101 = arith.constant 0 : index
    %54 = vector.load %arg5[%c0_99, %c0_100, %c0_101] : memref<3x24x1xf32, #tpu.memory_space<vmem>>, vector<1x24x1xf32>
    %55 = vector.shape_cast %54 : vector<1x24x1xf32> to vector<24x1xf32>
    %c1_102 = arith.constant 1 : index
    %c0_103 = arith.constant 0 : index
    %c0_104 = arith.constant 0 : index
    %56 = vector.load %arg5[%c1_102, %c0_103, %c0_104] : memref<3x24x1xf32, #tpu.memory_space<vmem>>, vector<1x24x1xf32>
    %57 = vector.shape_cast %56 : vector<1x24x1xf32> to vector<24x1xf32>
    %c2_105 = arith.constant 2 : index
    %c0_106 = arith.constant 0 : index
    %c0_107 = arith.constant 0 : index
    %58 = vector.load %arg5[%c2_105, %c0_106, %c0_107] : memref<3x24x1xf32, #tpu.memory_space<vmem>>, vector<1x24x1xf32>
    %59 = vector.shape_cast %58 : vector<1x24x1xf32> to vector<24x1xf32>
    %c0_108 = arith.constant 0 : index
    %c0_109 = arith.constant 0 : index
    %c128 = arith.constant 128 : index
    %60 = vector.load %arg1[%c0_108, %c0_109, %c128] : memref<1x8x640xbf16, #tpu.memory_space<vmem>>, vector<1x8x384xbf16>
    %61 = vector.shape_cast %60 : vector<1x8x384xbf16> to vector<8x384xbf16>
    %62 = arith.extf %61 : vector<8x384xbf16> to vector<8x384xf32>
    %c0_110 = arith.constant 0 : index
    %c0_111 = arith.constant 0 : index
    %c128_112 = arith.constant 128 : index
    %63 = vector.load %arg2[%c0_110, %c0_111, %c128_112] : memref<1x8x640xbf16, #tpu.memory_space<vmem>>, vector<1x8x384xbf16>
    %64 = vector.shape_cast %63 : vector<1x8x384xbf16> to vector<8x384xbf16>
    %65 = arith.extf %64 : vector<8x384xbf16> to vector<8x384xf32>
    %c0_113 = arith.constant 0 : index
    %c0_114 = arith.constant 0 : index
    %c128_115 = arith.constant 128 : index
    %66 = vector.load %arg3[%c0_113, %c0_114, %c128_115] : memref<1x8x640xbf16, #tpu.memory_space<vmem>>, vector<1x8x384xbf16>
    %67 = vector.shape_cast %66 : vector<1x8x384xbf16> to vector<8x384xbf16>
    %68 = arith.extf %67 : vector<8x384xbf16> to vector<8x384xf32>
    %c0_116 = arith.constant 0 : index
    %c0_117 = arith.constant 0 : index
    %c109 = arith.constant 109 : index
    %69 = vector.load %arg1[%c0_116, %c0_117, %c109] : memref<1x8x640xbf16, #tpu.memory_space<vmem>>, vector<1x8x384xbf16>
    %70 = vector.shape_cast %69 : vector<1x8x384xbf16> to vector<8x384xbf16>
    %cst = arith.constant dense<0.000000e+00> : vector<24x384xf32>
    %71 = tpu.matmul %1, %70, %cst {dimension_numbers = #tpu.dot_dimension_numbers<[1], [0], [0], [1], [0, 0, 1, 1], [], []>} : vector<24x8xbf16>, vector<8x384xbf16>, vector<24x384xf32> -> vector<24x384xf32>
    %c0_118 = arith.constant 0 : index
    %c0_119 = arith.constant 0 : index
    %c110 = arith.constant 110 : index
    %72 = vector.load %arg1[%c0_118, %c0_119, %c110] : memref<1x8x640xbf16, #tpu.memory_space<vmem>>, vector<1x8x384xbf16>
    %73 = vector.shape_cast %72 : vector<1x8x384xbf16> to vector<8x384xbf16>
    %cst_120 = arith.constant dense<0.000000e+00> : vector<24x384xf32>
    %74 = tpu.matmul %3, %73, %cst_120 {dimension_numbers = #tpu.dot_dimension_numbers<[1], [0], [0], [1], [0, 0, 1, 1], [], []>} : vector<24x8xbf16>, vector<8x384xbf16>, vector<24x384xf32> -> vector<24x384xf32>
    %75 = arith.addf %71, %74 : vector<24x384xf32>
    %c0_121 = arith.constant 0 : index
    %c0_122 = arith.constant 0 : index
    %c111 = arith.constant 111 : index
    %76 = vector.load %arg1[%c0_121, %c0_122, %c111] : memref<1x8x640xbf16, #tpu.memory_space<vmem>>, vector<1x8x384xbf16>
    %77 = vector.shape_cast %76 : vector<1x8x384xbf16> to vector<8x384xbf16>
    %cst_123 = arith.constant dense<0.000000e+00> : vector<24x384xf32>
    %78 = tpu.matmul %5, %77, %cst_123 {dimension_numbers = #tpu.dot_dimension_numbers<[1], [0], [0], [1], [0, 0, 1, 1], [], []>} : vector<24x8xbf16>, vector<8x384xbf16>, vector<24x384xf32> -> vector<24x384xf32>
    %79 = arith.addf %75, %78 : vector<24x384xf32>
    %c0_124 = arith.constant 0 : index
    %c0_125 = arith.constant 0 : index
    %c127 = arith.constant 127 : index
    %80 = vector.load %arg1[%c0_124, %c0_125, %c127] : memref<1x8x640xbf16, #tpu.memory_space<vmem>>, vector<1x8x384xbf16>
    %81 = vector.shape_cast %80 : vector<1x8x384xbf16> to vector<8x384xbf16>
    %cst_126 = arith.constant dense<0.000000e+00> : vector<24x384xf32>
    %82 = tpu.matmul %7, %81, %cst_126 {dimension_numbers = #tpu.dot_dimension_numbers<[1], [0], [0], [1], [0, 0, 1, 1], [], []>} : vector<24x8xbf16>, vector<8x384xbf16>, vector<24x384xf32> -> vector<24x384xf32>
    %83 = arith.addf %79, %82 : vector<24x384xf32>
    %c0_127 = arith.constant 0 : index
    %c0_128 = arith.constant 0 : index
    %c128_129 = arith.constant 128 : index
    %84 = vector.load %arg1[%c0_127, %c0_128, %c128_129] : memref<1x8x640xbf16, #tpu.memory_space<vmem>>, vector<1x8x384xbf16>
    %85 = vector.shape_cast %84 : vector<1x8x384xbf16> to vector<8x384xbf16>
    %cst_130 = arith.constant dense<0.000000e+00> : vector<24x384xf32>
    %86 = tpu.matmul %9, %85, %cst_130 {dimension_numbers = #tpu.dot_dimension_numbers<[1], [0], [0], [1], [0, 0, 1, 1], [], []>} : vector<24x8xbf16>, vector<8x384xbf16>, vector<24x384xf32> -> vector<24x384xf32>
    %87 = arith.addf %83, %86 : vector<24x384xf32>
    %c0_131 = arith.constant 0 : index
    %c0_132 = arith.constant 0 : index
    %c129 = arith.constant 129 : index
    %88 = vector.load %arg1[%c0_131, %c0_132, %c129] : memref<1x8x640xbf16, #tpu.memory_space<vmem>>, vector<1x8x384xbf16>
    %89 = vector.shape_cast %88 : vector<1x8x384xbf16> to vector<8x384xbf16>
    %cst_133 = arith.constant dense<0.000000e+00> : vector<24x384xf32>
    %90 = tpu.matmul %11, %89, %cst_133 {dimension_numbers = #tpu.dot_dimension_numbers<[1], [0], [0], [1], [0, 0, 1, 1], [], []>} : vector<24x8xbf16>, vector<8x384xbf16>, vector<24x384xf32> -> vector<24x384xf32>
    %91 = arith.addf %87, %90 : vector<24x384xf32>
    %c0_134 = arith.constant 0 : index
    %c0_135 = arith.constant 0 : index
    %c145 = arith.constant 145 : index
    %92 = vector.load %arg1[%c0_134, %c0_135, %c145] : memref<1x8x640xbf16, #tpu.memory_space<vmem>>, vector<1x8x384xbf16>
    %93 = vector.shape_cast %92 : vector<1x8x384xbf16> to vector<8x384xbf16>
    %cst_136 = arith.constant dense<0.000000e+00> : vector<24x384xf32>
    %94 = tpu.matmul %13, %93, %cst_136 {dimension_numbers = #tpu.dot_dimension_numbers<[1], [0], [0], [1], [0, 0, 1, 1], [], []>} : vector<24x8xbf16>, vector<8x384xbf16>, vector<24x384xf32> -> vector<24x384xf32>
    %95 = arith.addf %91, %94 : vector<24x384xf32>
    %c0_137 = arith.constant 0 : index
    %c0_138 = arith.constant 0 : index
    %c146 = arith.constant 146 : index
    %96 = vector.load %arg1[%c0_137, %c0_138, %c146] : memref<1x8x640xbf16, #tpu.memory_space<vmem>>, vector<1x8x384xbf16>
    %97 = vector.shape_cast %96 : vector<1x8x384xbf16> to vector<8x384xbf16>
    %cst_139 = arith.constant dense<0.000000e+00> : vector<24x384xf32>
    %98 = tpu.matmul %15, %97, %cst_139 {dimension_numbers = #tpu.dot_dimension_numbers<[1], [0], [0], [1], [0, 0, 1, 1], [], []>} : vector<24x8xbf16>, vector<8x384xbf16>, vector<24x384xf32> -> vector<24x384xf32>
    %99 = arith.addf %95, %98 : vector<24x384xf32>
    %c0_140 = arith.constant 0 : index
    %c0_141 = arith.constant 0 : index
    %c147 = arith.constant 147 : index
    %100 = vector.load %arg1[%c0_140, %c0_141, %c147] : memref<1x8x640xbf16, #tpu.memory_space<vmem>>, vector<1x8x384xbf16>
    %101 = vector.shape_cast %100 : vector<1x8x384xbf16> to vector<8x384xbf16>
    %cst_142 = arith.constant dense<0.000000e+00> : vector<24x384xf32>
    %102 = tpu.matmul %17, %101, %cst_142 {dimension_numbers = #tpu.dot_dimension_numbers<[1], [0], [0], [1], [0, 0, 1, 1], [], []>} : vector<24x8xbf16>, vector<8x384xbf16>, vector<24x384xf32> -> vector<24x384xf32>
    %103 = arith.addf %99, %102 : vector<24x384xf32>
    %104 = vector.broadcast %55 : vector<24x1xf32> to vector<24x384xf32>
    %105 = arith.addf %103, %104 : vector<24x384xf32>
    %106 = vector.extract_strided_slice %105 {offsets = [0, 0], sizes = [8, 384], strides = [1, 1]} : vector<24x384xf32> to vector<8x384xf32>
    %107 = vector.extract_strided_slice %105 {offsets = [8, 0], sizes = [8, 384], strides = [1, 1]} : vector<24x384xf32> to vector<8x384xf32>
    %108 = vector.extract_strided_slice %105 {offsets = [16, 0], sizes = [8, 384], strides = [1, 1]} : vector<24x384xf32> to vector<8x384xf32>
    %cst_143 = arith.constant 1.000000e+00 : f32
    %109 = vector.broadcast %cst_143 : f32 to vector<8x384xf32>
    %110 = arith.addf %107, %109 : vector<8x384xf32>
    %cst_144 = arith.constant 0.000000e+00 : f32
    %111 = vector.broadcast %cst_144 : f32 to vector<8x384xf32>
    %112 = arith.subf %111, %110 : vector<8x384xf32>
    %113 = math.exp %112 : vector<8x384xf32>
    %cst_145 = arith.constant 1.000000e+00 : f32
    %114 = vector.broadcast %cst_145 : f32 to vector<8x384xf32>
    %115 = arith.addf %114, %113 : vector<8x384xf32>
    %116 = tpu.reciprocal %115 {approx = true} : vector<8x384xf32> -> vector<8x384xf32>
    %cst_146 = arith.constant 1.000000e+00 : f32
    %117 = vector.broadcast %cst_146 : f32 to vector<8x384xf32>
    %118 = arith.addf %108, %117 : vector<8x384xf32>
    %cst_147 = arith.constant 0.000000e+00 : f32
    %119 = vector.broadcast %cst_147 : f32 to vector<8x384xf32>
    %120 = arith.subf %119, %118 : vector<8x384xf32>
    %121 = math.exp %120 : vector<8x384xf32>
    %cst_148 = arith.constant 1.000000e+00 : f32
    %122 = vector.broadcast %cst_148 : f32 to vector<8x384xf32>
    %123 = arith.addf %122, %121 : vector<8x384xf32>
    %124 = tpu.reciprocal %123 {approx = true} : vector<8x384xf32> -> vector<8x384xf32>
    %cst_149 = arith.constant 5.000000e-01 : f32
    %125 = vector.broadcast %cst_149 : f32 to vector<8x384xf32>
    %126 = arith.mulf %125, %116 : vector<8x384xf32>
    %127 = arith.mulf %126, %65 : vector<8x384xf32>
    %cst_150 = arith.constant 5.000000e-01 : f32
    %128 = vector.broadcast %cst_150 : f32 to vector<8x384xf32>
    %129 = arith.mulf %128, %116 : vector<8x384xf32>
    %130 = arith.mulf %129, %68 : vector<8x384xf32>
    %131 = arith.addf %127, %130 : vector<8x384xf32>
    %cst_151 = arith.constant 1.000000e+00 : f32
    %132 = vector.broadcast %cst_151 : f32 to vector<8x384xf32>
    %133 = arith.subf %132, %116 : vector<8x384xf32>
    %134 = arith.mulf %133, %106 : vector<8x384xf32>
    %135 = arith.addf %131, %134 : vector<8x384xf32>
    %136 = math.tanh %135 : vector<8x384xf32>
    %137 = arith.mulf %124, %136 : vector<8x384xf32>
    %cst_152 = arith.constant 1.000000e+00 : f32
    %138 = vector.broadcast %cst_152 : f32 to vector<8x384xf32>
    %139 = arith.subf %138, %124 : vector<8x384xf32>
    %140 = arith.mulf %139, %62 : vector<8x384xf32>
    %141 = arith.addf %137, %140 : vector<8x384xf32>
    %c0_153 = arith.constant 0 : index
    %c0_154 = arith.constant 0 : index
    %c109_155 = arith.constant 109 : index
    %142 = vector.load %arg2[%c0_153, %c0_154, %c109_155] : memref<1x8x640xbf16, #tpu.memory_space<vmem>>, vector<1x8x384xbf16>
    %143 = vector.shape_cast %142 : vector<1x8x384xbf16> to vector<8x384xbf16>
    %cst_156 = arith.constant dense<0.000000e+00> : vector<24x384xf32>
    %144 = tpu.matmul %19, %143, %cst_156 {dimension_numbers = #tpu.dot_dimension_numbers<[1], [0], [0], [1], [0, 0, 1, 1], [], []>} : vector<24x8xbf16>, vector<8x384xbf16>, vector<24x384xf32> -> vector<24x384xf32>
    %c0_157 = arith.constant 0 : index
    %c0_158 = arith.constant 0 : index
    %c110_159 = arith.constant 110 : index
    %145 = vector.load %arg2[%c0_157, %c0_158, %c110_159] : memref<1x8x640xbf16, #tpu.memory_space<vmem>>, vector<1x8x384xbf16>
    %146 = vector.shape_cast %145 : vector<1x8x384xbf16> to vector<8x384xbf16>
    %cst_160 = arith.constant dense<0.000000e+00> : vector<24x384xf32>
    %147 = tpu.matmul %21, %146, %cst_160 {dimension_numbers = #tpu.dot_dimension_numbers<[1], [0], [0], [1], [0, 0, 1, 1], [], []>} : vector<24x8xbf16>, vector<8x384xbf16>, vector<24x384xf32> -> vector<24x384xf32>
    %148 = arith.addf %144, %147 : vector<24x384xf32>
    %c0_161 = arith.constant 0 : index
    %c0_162 = arith.constant 0 : index
    %c111_163 = arith.constant 111 : index
    %149 = vector.load %arg2[%c0_161, %c0_162, %c111_163] : memref<1x8x640xbf16, #tpu.memory_space<vmem>>, vector<1x8x384xbf16>
    %150 = vector.shape_cast %149 : vector<1x8x384xbf16> to vector<8x384xbf16>
    %cst_164 = arith.constant dense<0.000000e+00> : vector<24x384xf32>
    %151 = tpu.matmul %23, %150, %cst_164 {dimension_numbers = #tpu.dot_dimension_numbers<[1], [0], [0], [1], [0, 0, 1, 1], [], []>} : vector<24x8xbf16>, vector<8x384xbf16>, vector<24x384xf32> -> vector<24x384xf32>
    %152 = arith.addf %148, %151 : vector<24x384xf32>
    %c0_165 = arith.constant 0 : index
    %c0_166 = arith.constant 0 : index
    %c127_167 = arith.constant 127 : index
    %153 = vector.load %arg2[%c0_165, %c0_166, %c127_167] : memref<1x8x640xbf16, #tpu.memory_space<vmem>>, vector<1x8x384xbf16>
    %154 = vector.shape_cast %153 : vector<1x8x384xbf16> to vector<8x384xbf16>
    %cst_168 = arith.constant dense<0.000000e+00> : vector<24x384xf32>
    %155 = tpu.matmul %25, %154, %cst_168 {dimension_numbers = #tpu.dot_dimension_numbers<[1], [0], [0], [1], [0, 0, 1, 1], [], []>} : vector<24x8xbf16>, vector<8x384xbf16>, vector<24x384xf32> -> vector<24x384xf32>
    %156 = arith.addf %152, %155 : vector<24x384xf32>
    %c0_169 = arith.constant 0 : index
    %c0_170 = arith.constant 0 : index
    %c128_171 = arith.constant 128 : index
    %157 = vector.load %arg2[%c0_169, %c0_170, %c128_171] : memref<1x8x640xbf16, #tpu.memory_space<vmem>>, vector<1x8x384xbf16>
    %158 = vector.shape_cast %157 : vector<1x8x384xbf16> to vector<8x384xbf16>
    %cst_172 = arith.constant dense<0.000000e+00> : vector<24x384xf32>
    %159 = tpu.matmul %27, %158, %cst_172 {dimension_numbers = #tpu.dot_dimension_numbers<[1], [0], [0], [1], [0, 0, 1, 1], [], []>} : vector<24x8xbf16>, vector<8x384xbf16>, vector<24x384xf32> -> vector<24x384xf32>
    %160 = arith.addf %156, %159 : vector<24x384xf32>
    %c0_173 = arith.constant 0 : index
    %c0_174 = arith.constant 0 : index
    %c129_175 = arith.constant 129 : index
    %161 = vector.load %arg2[%c0_173, %c0_174, %c129_175] : memref<1x8x640xbf16, #tpu.memory_space<vmem>>, vector<1x8x384xbf16>
    %162 = vector.shape_cast %161 : vector<1x8x384xbf16> to vector<8x384xbf16>
    %cst_176 = arith.constant dense<0.000000e+00> : vector<24x384xf32>
    %163 = tpu.matmul %29, %162, %cst_176 {dimension_numbers = #tpu.dot_dimension_numbers<[1], [0], [0], [1], [0, 0, 1, 1], [], []>} : vector<24x8xbf16>, vector<8x384xbf16>, vector<24x384xf32> -> vector<24x384xf32>
    %164 = arith.addf %160, %163 : vector<24x384xf32>
    %c0_177 = arith.constant 0 : index
    %c0_178 = arith.constant 0 : index
    %c145_179 = arith.constant 145 : index
    %165 = vector.load %arg2[%c0_177, %c0_178, %c145_179] : memref<1x8x640xbf16, #tpu.memory_space<vmem>>, vector<1x8x384xbf16>
    %166 = vector.shape_cast %165 : vector<1x8x384xbf16> to vector<8x384xbf16>
    %cst_180 = arith.constant dense<0.000000e+00> : vector<24x384xf32>
    %167 = tpu.matmul %31, %166, %cst_180 {dimension_numbers = #tpu.dot_dimension_numbers<[1], [0], [0], [1], [0, 0, 1, 1], [], []>} : vector<24x8xbf16>, vector<8x384xbf16>, vector<24x384xf32> -> vector<24x384xf32>
    %168 = arith.addf %164, %167 : vector<24x384xf32>
    %c0_181 = arith.constant 0 : index
    %c0_182 = arith.constant 0 : index
    %c146_183 = arith.constant 146 : index
    %169 = vector.load %arg2[%c0_181, %c0_182, %c146_183] : memref<1x8x640xbf16, #tpu.memory_space<vmem>>, vector<1x8x384xbf16>
    %170 = vector.shape_cast %169 : vector<1x8x384xbf16> to vector<8x384xbf16>
    %cst_184 = arith.constant dense<0.000000e+00> : vector<24x384xf32>
    %171 = tpu.matmul %33, %170, %cst_184 {dimension_numbers = #tpu.dot_dimension_numbers<[1], [0], [0], [1], [0, 0, 1, 1], [], []>} : vector<24x8xbf16>, vector<8x384xbf16>, vector<24x384xf32> -> vector<24x384xf32>
    %172 = arith.addf %168, %171 : vector<24x384xf32>
    %c0_185 = arith.constant 0 : index
    %c0_186 = arith.constant 0 : index
    %c147_187 = arith.constant 147 : index
    %173 = vector.load %arg2[%c0_185, %c0_186, %c147_187] : memref<1x8x640xbf16, #tpu.memory_space<vmem>>, vector<1x8x384xbf16>
    %174 = vector.shape_cast %173 : vector<1x8x384xbf16> to vector<8x384xbf16>
    %cst_188 = arith.constant dense<0.000000e+00> : vector<24x384xf32>
    %175 = tpu.matmul %35, %174, %cst_188 {dimension_numbers = #tpu.dot_dimension_numbers<[1], [0], [0], [1], [0, 0, 1, 1], [], []>} : vector<24x8xbf16>, vector<8x384xbf16>, vector<24x384xf32> -> vector<24x384xf32>
    %176 = arith.addf %172, %175 : vector<24x384xf32>
    %177 = vector.broadcast %57 : vector<24x1xf32> to vector<24x384xf32>
    %178 = arith.addf %176, %177 : vector<24x384xf32>
    %179 = vector.extract_strided_slice %178 {offsets = [0, 0], sizes = [8, 384], strides = [1, 1]} : vector<24x384xf32> to vector<8x384xf32>
    %180 = vector.extract_strided_slice %178 {offsets = [8, 0], sizes = [8, 384], strides = [1, 1]} : vector<24x384xf32> to vector<8x384xf32>
    %181 = vector.extract_strided_slice %178 {offsets = [16, 0], sizes = [8, 384], strides = [1, 1]} : vector<24x384xf32> to vector<8x384xf32>
    %cst_189 = arith.constant 1.000000e+00 : f32
    %182 = vector.broadcast %cst_189 : f32 to vector<8x384xf32>
    %183 = arith.addf %180, %182 : vector<8x384xf32>
    %cst_190 = arith.constant 0.000000e+00 : f32
    %184 = vector.broadcast %cst_190 : f32 to vector<8x384xf32>
    %185 = arith.subf %184, %183 : vector<8x384xf32>
    %186 = math.exp %185 : vector<8x384xf32>
    %cst_191 = arith.constant 1.000000e+00 : f32
    %187 = vector.broadcast %cst_191 : f32 to vector<8x384xf32>
    %188 = arith.addf %187, %186 : vector<8x384xf32>
    %189 = tpu.reciprocal %188 {approx = true} : vector<8x384xf32> -> vector<8x384xf32>
    %cst_192 = arith.constant 1.000000e+00 : f32
    %190 = vector.broadcast %cst_192 : f32 to vector<8x384xf32>
    %191 = arith.addf %181, %190 : vector<8x384xf32>
    %cst_193 = arith.constant 0.000000e+00 : f32
    %192 = vector.broadcast %cst_193 : f32 to vector<8x384xf32>
    %193 = arith.subf %192, %191 : vector<8x384xf32>
    %194 = math.exp %193 : vector<8x384xf32>
    %cst_194 = arith.constant 1.000000e+00 : f32
    %195 = vector.broadcast %cst_194 : f32 to vector<8x384xf32>
    %196 = arith.addf %195, %194 : vector<8x384xf32>
    %197 = tpu.reciprocal %196 {approx = true} : vector<8x384xf32> -> vector<8x384xf32>
    %cst_195 = arith.constant 5.000000e-01 : f32
    %198 = vector.broadcast %cst_195 : f32 to vector<8x384xf32>
    %199 = arith.mulf %198, %189 : vector<8x384xf32>
    %200 = arith.mulf %199, %68 : vector<8x384xf32>
    %cst_196 = arith.constant 5.000000e-01 : f32
    %201 = vector.broadcast %cst_196 : f32 to vector<8x384xf32>
    %202 = arith.mulf %201, %189 : vector<8x384xf32>
    %203 = arith.mulf %202, %62 : vector<8x384xf32>
    %204 = arith.addf %200, %203 : vector<8x384xf32>
    %cst_197 = arith.constant 1.000000e+00 : f32
    %205 = vector.broadcast %cst_197 : f32 to vector<8x384xf32>
    %206 = arith.subf %205, %189 : vector<8x384xf32>
    %207 = arith.mulf %206, %179 : vector<8x384xf32>
    %208 = arith.addf %204, %207 : vector<8x384xf32>
    %209 = math.tanh %208 : vector<8x384xf32>
    %210 = arith.mulf %197, %209 : vector<8x384xf32>
    %cst_198 = arith.constant 1.000000e+00 : f32
    %211 = vector.broadcast %cst_198 : f32 to vector<8x384xf32>
    %212 = arith.subf %211, %197 : vector<8x384xf32>
    %213 = arith.mulf %212, %65 : vector<8x384xf32>
    %214 = arith.addf %210, %213 : vector<8x384xf32>
    %215 = arith.addf %141, %214 : vector<8x384xf32>
    %c0_199 = arith.constant 0 : index
    %c0_200 = arith.constant 0 : index
    %c109_201 = arith.constant 109 : index
    %216 = vector.load %arg3[%c0_199, %c0_200, %c109_201] : memref<1x8x640xbf16, #tpu.memory_space<vmem>>, vector<1x8x384xbf16>
    %217 = vector.shape_cast %216 : vector<1x8x384xbf16> to vector<8x384xbf16>
    %cst_202 = arith.constant dense<0.000000e+00> : vector<24x384xf32>
    %218 = tpu.matmul %37, %217, %cst_202 {dimension_numbers = #tpu.dot_dimension_numbers<[1], [0], [0], [1], [0, 0, 1, 1], [], []>} : vector<24x8xbf16>, vector<8x384xbf16>, vector<24x384xf32> -> vector<24x384xf32>
    %c0_203 = arith.constant 0 : index
    %c0_204 = arith.constant 0 : index
    %c110_205 = arith.constant 110 : index
    %219 = vector.load %arg3[%c0_203, %c0_204, %c110_205] : memref<1x8x640xbf16, #tpu.memory_space<vmem>>, vector<1x8x384xbf16>
    %220 = vector.shape_cast %219 : vector<1x8x384xbf16> to vector<8x384xbf16>
    %cst_206 = arith.constant dense<0.000000e+00> : vector<24x384xf32>
    %221 = tpu.matmul %39, %220, %cst_206 {dimension_numbers = #tpu.dot_dimension_numbers<[1], [0], [0], [1], [0, 0, 1, 1], [], []>} : vector<24x8xbf16>, vector<8x384xbf16>, vector<24x384xf32> -> vector<24x384xf32>
    %222 = arith.addf %218, %221 : vector<24x384xf32>
    %c0_207 = arith.constant 0 : index
    %c0_208 = arith.constant 0 : index
    %c111_209 = arith.constant 111 : index
    %223 = vector.load %arg3[%c0_207, %c0_208, %c111_209] : memref<1x8x640xbf16, #tpu.memory_space<vmem>>, vector<1x8x384xbf16>
    %224 = vector.shape_cast %223 : vector<1x8x384xbf16> to vector<8x384xbf16>
    %cst_210 = arith.constant dense<0.000000e+00> : vector<24x384xf32>
    %225 = tpu.matmul %41, %224, %cst_210 {dimension_numbers = #tpu.dot_dimension_numbers<[1], [0], [0], [1], [0, 0, 1, 1], [], []>} : vector<24x8xbf16>, vector<8x384xbf16>, vector<24x384xf32> -> vector<24x384xf32>
    %226 = arith.addf %222, %225 : vector<24x384xf32>
    %c0_211 = arith.constant 0 : index
    %c0_212 = arith.constant 0 : index
    %c127_213 = arith.constant 127 : index
    %227 = vector.load %arg3[%c0_211, %c0_212, %c127_213] : memref<1x8x640xbf16, #tpu.memory_space<vmem>>, vector<1x8x384xbf16>
    %228 = vector.shape_cast %227 : vector<1x8x384xbf16> to vector<8x384xbf16>
    %cst_214 = arith.constant dense<0.000000e+00> : vector<24x384xf32>
    %229 = tpu.matmul %43, %228, %cst_214 {dimension_numbers = #tpu.dot_dimension_numbers<[1], [0], [0], [1], [0, 0, 1, 1], [], []>} : vector<24x8xbf16>, vector<8x384xbf16>, vector<24x384xf32> -> vector<24x384xf32>
    %230 = arith.addf %226, %229 : vector<24x384xf32>
    %c0_215 = arith.constant 0 : index
    %c0_216 = arith.constant 0 : index
    %c128_217 = arith.constant 128 : index
    %231 = vector.load %arg3[%c0_215, %c0_216, %c128_217] : memref<1x8x640xbf16, #tpu.memory_space<vmem>>, vector<1x8x384xbf16>
    %232 = vector.shape_cast %231 : vector<1x8x384xbf16> to vector<8x384xbf16>
    %cst_218 = arith.constant dense<0.000000e+00> : vector<24x384xf32>
    %233 = tpu.matmul %45, %232, %cst_218 {dimension_numbers = #tpu.dot_dimension_numbers<[1], [0], [0], [1], [0, 0, 1, 1], [], []>} : vector<24x8xbf16>, vector<8x384xbf16>, vector<24x384xf32> -> vector<24x384xf32>
    %234 = arith.addf %230, %233 : vector<24x384xf32>
    %c0_219 = arith.constant 0 : index
    %c0_220 = arith.constant 0 : index
    %c129_221 = arith.constant 129 : index
    %235 = vector.load %arg3[%c0_219, %c0_220, %c129_221] : memref<1x8x640xbf16, #tpu.memory_space<vmem>>, vector<1x8x384xbf16>
    %236 = vector.shape_cast %235 : vector<1x8x384xbf16> to vector<8x384xbf16>
    %cst_222 = arith.constant dense<0.000000e+00> : vector<24x384xf32>
    %237 = tpu.matmul %47, %236, %cst_222 {dimension_numbers = #tpu.dot_dimension_numbers<[1], [0], [0], [1], [0, 0, 1, 1], [], []>} : vector<24x8xbf16>, vector<8x384xbf16>, vector<24x384xf32> -> vector<24x384xf32>
    %238 = arith.addf %234, %237 : vector<24x384xf32>
    %c0_223 = arith.constant 0 : index
    %c0_224 = arith.constant 0 : index
    %c145_225 = arith.constant 145 : index
    %239 = vector.load %arg3[%c0_223, %c0_224, %c145_225] : memref<1x8x640xbf16, #tpu.memory_space<vmem>>, vector<1x8x384xbf16>
    %240 = vector.shape_cast %239 : vector<1x8x384xbf16> to vector<8x384xbf16>
    %cst_226 = arith.constant dense<0.000000e+00> : vector<24x384xf32>
    %241 = tpu.matmul %49, %240, %cst_226 {dimension_numbers = #tpu.dot_dimension_numbers<[1], [0], [0], [1], [0, 0, 1, 1], [], []>} : vector<24x8xbf16>, vector<8x384xbf16>, vector<24x384xf32> -> vector<24x384xf32>
    %242 = arith.addf %238, %241 : vector<24x384xf32>
    %c0_227 = arith.constant 0 : index
    %c0_228 = arith.constant 0 : index
    %c146_229 = arith.constant 146 : index
    %243 = vector.load %arg3[%c0_227, %c0_228, %c146_229] : memref<1x8x640xbf16, #tpu.memory_space<vmem>>, vector<1x8x384xbf16>
    %244 = vector.shape_cast %243 : vector<1x8x384xbf16> to vector<8x384xbf16>
    %cst_230 = arith.constant dense<0.000000e+00> : vector<24x384xf32>
    %245 = tpu.matmul %51, %244, %cst_230 {dimension_numbers = #tpu.dot_dimension_numbers<[1], [0], [0], [1], [0, 0, 1, 1], [], []>} : vector<24x8xbf16>, vector<8x384xbf16>, vector<24x384xf32> -> vector<24x384xf32>
    %246 = arith.addf %242, %245 : vector<24x384xf32>
    %c0_231 = arith.constant 0 : index
    %c0_232 = arith.constant 0 : index
    %c147_233 = arith.constant 147 : index
    %247 = vector.load %arg3[%c0_231, %c0_232, %c147_233] : memref<1x8x640xbf16, #tpu.memory_space<vmem>>, vector<1x8x384xbf16>
    %248 = vector.shape_cast %247 : vector<1x8x384xbf16> to vector<8x384xbf16>
    %cst_234 = arith.constant dense<0.000000e+00> : vector<24x384xf32>
    %249 = tpu.matmul %53, %248, %cst_234 {dimension_numbers = #tpu.dot_dimension_numbers<[1], [0], [0], [1], [0, 0, 1, 1], [], []>} : vector<24x8xbf16>, vector<8x384xbf16>, vector<24x384xf32> -> vector<24x384xf32>
    %250 = arith.addf %246, %249 : vector<24x384xf32>
    %251 = vector.broadcast %59 : vector<24x1xf32> to vector<24x384xf32>
    %252 = arith.addf %250, %251 : vector<24x384xf32>
    %253 = vector.extract_strided_slice %252 {offsets = [0, 0], sizes = [8, 384], strides = [1, 1]} : vector<24x384xf32> to vector<8x384xf32>
    %254 = vector.extract_strided_slice %252 {offsets = [8, 0], sizes = [8, 384], strides = [1, 1]} : vector<24x384xf32> to vector<8x384xf32>
    %255 = vector.extract_strided_slice %252 {offsets = [16, 0], sizes = [8, 384], strides = [1, 1]} : vector<24x384xf32> to vector<8x384xf32>
    %cst_235 = arith.constant 1.000000e+00 : f32
    %256 = vector.broadcast %cst_235 : f32 to vector<8x384xf32>
    %257 = arith.addf %254, %256 : vector<8x384xf32>
    %cst_236 = arith.constant 0.000000e+00 : f32
    %258 = vector.broadcast %cst_236 : f32 to vector<8x384xf32>
    %259 = arith.subf %258, %257 : vector<8x384xf32>
    %260 = math.exp %259 : vector<8x384xf32>
    %cst_237 = arith.constant 1.000000e+00 : f32
    %261 = vector.broadcast %cst_237 : f32 to vector<8x384xf32>
    %262 = arith.addf %261, %260 : vector<8x384xf32>
    %263 = tpu.reciprocal %262 {approx = true} : vector<8x384xf32> -> vector<8x384xf32>
    %cst_238 = arith.constant 1.000000e+00 : f32
    %264 = vector.broadcast %cst_238 : f32 to vector<8x384xf32>
    %265 = arith.addf %255, %264 : vector<8x384xf32>
    %cst_239 = arith.constant 0.000000e+00 : f32
    %266 = vector.broadcast %cst_239 : f32 to vector<8x384xf32>
    %267 = arith.subf %266, %265 : vector<8x384xf32>
    %268 = math.exp %267 : vector<8x384xf32>
    %cst_240 = arith.constant 1.000000e+00 : f32
    %269 = vector.broadcast %cst_240 : f32 to vector<8x384xf32>
    %270 = arith.addf %269, %268 : vector<8x384xf32>
    %271 = tpu.reciprocal %270 {approx = true} : vector<8x384xf32> -> vector<8x384xf32>
    %cst_241 = arith.constant 5.000000e-01 : f32
    %272 = vector.broadcast %cst_241 : f32 to vector<8x384xf32>
    %273 = arith.mulf %272, %263 : vector<8x384xf32>
    %274 = arith.mulf %273, %62 : vector<8x384xf32>
    %cst_242 = arith.constant 5.000000e-01 : f32
    %275 = vector.broadcast %cst_242 : f32 to vector<8x384xf32>
    %276 = arith.mulf %275, %263 : vector<8x384xf32>
    %277 = arith.mulf %276, %65 : vector<8x384xf32>
    %278 = arith.addf %274, %277 : vector<8x384xf32>
    %cst_243 = arith.constant 1.000000e+00 : f32
    %279 = vector.broadcast %cst_243 : f32 to vector<8x384xf32>
    %280 = arith.subf %279, %263 : vector<8x384xf32>
    %281 = arith.mulf %280, %253 : vector<8x384xf32>
    %282 = arith.addf %278, %281 : vector<8x384xf32>
    %283 = math.tanh %282 : vector<8x384xf32>
    %284 = arith.mulf %271, %283 : vector<8x384xf32>
    %cst_244 = arith.constant 1.000000e+00 : f32
    %285 = vector.broadcast %cst_244 : f32 to vector<8x384xf32>
    %286 = arith.subf %285, %271 : vector<8x384xf32>
    %287 = arith.mulf %286, %68 : vector<8x384xf32>
    %288 = arith.addf %284, %287 : vector<8x384xf32>
    %289 = arith.addf %215, %288 : vector<8x384xf32>
    %c0_245 = arith.constant 0 : index
    %c0_246 = arith.constant 0 : index
    %c0_247 = arith.constant 0 : index
    %290 = vector.load %arg6[%c0_245, %c0_246, %c0_247] : memref<1x8x384xf32, #tpu.memory_space<vmem>>, vector<1x8x384xf32>
    %291 = vector.shape_cast %290 : vector<1x8x384xf32> to vector<8x384xf32>
    %292 = vector.shape_cast %289 : vector<8x384xf32> to vector<1x8x384xf32>
    tpu.vector_store %arg6[%c0_245, %c0_246, %c0_247], %292 {strides = array<i32>} : memref<1x8x384xf32, #tpu.memory_space<vmem>>, vector<1x8x384xf32>,
    return
  }
  func.func @transform_0(%arg0: i32) -> (i32, i32, i32) {
    %c0_i32 = arith.constant 0 : i32
    %c0_i32_0 = arith.constant 0 : i32
    %c0_i32_1 = arith.constant 0 : i32
    return %arg0, %c0_i32, %c0_i32_0 : i32, i32, i32
  }
  func.func @transform_1(%arg0: i32) -> (i32, i32, i32) {
    %c0_i32 = arith.constant 0 : i32
    %c0_i32_0 = arith.constant 0 : i32
    %c0_i32_1 = arith.constant 0 : i32
    return %arg0, %c0_i32, %c0_i32_0 : i32, i32, i32
  }
  func.func @transform_2(%arg0: i32) -> (i32, i32, i32) {
    %c0_i32 = arith.constant 0 : i32
    %c0_i32_0 = arith.constant 0 : i32
    %c0_i32_1 = arith.constant 0 : i32
    return %arg0, %c0_i32, %c0_i32_0 : i32, i32, i32
  }
  func.func @transform_3(%arg0: i32) -> (i32, i32, i32, i32) {
    %c0_i32 = arith.constant 0 : i32
    %c0_i32_0 = arith.constant 0 : i32
    %c0_i32_1 = arith.constant 0 : i32
    %c0_i32_2 = arith.constant 0 : i32
    %c0_i32_3 = arith.constant 0 : i32
    return %c0_i32, %c0_i32_0, %c0_i32_1, %c0_i32_2 : i32, i32, i32, i32
  }
  func.func @transform_4(%arg0: i32) -> (i32, i32, i32) {
    %c0_i32 = arith.constant 0 : i32
    %c0_i32_0 = arith.constant 0 : i32
    %c0_i32_1 = arith.constant 0 : i32
    %c0_i32_2 = arith.constant 0 : i32
    return %c0_i32, %c0_i32_0, %c0_i32_1 : i32, i32, i32
  }
  func.func @transform_5(%arg0: i32) -> (i32, i32, i32) {
    %c0_i32 = arith.constant 0 : i32
    %c0_i32_0 = arith.constant 0 : i32
    %c0_i32_1 = arith.constant 0 : i32
    return %arg0, %c0_i32, %c0_i32_0 : i32, i32, i32
  }
}

</mosaic_0001>

<bundles_post_ra>
// kernel: mgate_forward.1
= control target key start
LH: loop header
LB: loop body
LE: loop exit
PB: predicated region body
PF: predicated region fallthrough
CT: control target
= control target key end

     0   :  { %s5459_s18 = smov 0   ;;  %s6495_s0 = inlined_call_operand.vmem [shape: bf16[2,8,640], index: 0, kind: input, shape index: {}]   ;;  %s6496_s1 = inlined_call_operand.vmem [shape: bf16[2,8,640], index: 1, kind: input, shape index: {}]   ;;  %s6497_s2 = inlined_call_operand.vmem [shape: bf16[2,8,640], index: 2, kind: input, shape index: {}]   ;;  %s6498_s3 = inlined_call_operand.vmem [shape: bf16[3,9,24,8], index: 3, kind: input, shape index: {}]   ;;  %s6499_s4 = inlined_call_operand.vmem [shape: f32[3,24,1], index: 4, kind: input, shape index: {}]   ;;  %s6500_s5 = inlined_call_operand.vmem [shape: f32[2,8,384], index: 5, kind: output, shape index: {}]  }
   0x1 LB: > { %s4628_s19 = sadd.s32 4294967295, %s5418_s18   ;;  %p4632_p0 = scmp.ge.s32.totalorder %s5418_s18, 1  ;;  %s5418_s18 = sphi %s5459_s18, %s15_s18  }
   0x2   : > { %p207_p1 = scmp.lt.s32.totalorder %s5418_s18, 3 }
   0x4   : > { %p208_p2 = pnand %p4632_p0, %p207_p1 }
   0x6   : > { %211 = sbr.rel (%p208_p2) target bundleno = 725 (0x2d5), region = 40 }
   0xb   : > { %p245_p3 = scmp.lt.s32.totalorder %s4628_s19, 1  ;;  %v5472_v0 = vld [vmem:[%s6498_s3 + $0xc] sm:$0xff]   ;;  %vm431_vm0 = vcmask 64512   ;;  %v5420_v1 = vmov 0   ;;  %s5421_s26 = smov 18   ;;  %vm427_vm1 = vcmask 146432  }
   0xc   : > { %480 = vmatprep.mubr.bf16.mxu0 %v5420_v1  ;;  %5028 = vmatprep.mubr.msk.bf16.mxu1 %vm431_vm0, %v5472_v0  ;;  %s5422_s27 = smov 19   ;;  %s5423_s28 = smov 17   ;;  %vm438_vm2 = vcmask 1043456   ;;  %v5249_v35 = vld [vmem:[%s6498_s3 + $0x14] ss:$0 sps:$4 sm:$0xff]   ;;  %vm563_vm3 = vcmask 154624  }
   0xd   : > { %s6504_s19 = smov (!%p245_p3, %s4628_s19), 1  ;;  %5235 = vset.pattern.permute.xlu1 %v5420_v1  ;;  %5234 = vset.pattern.permute.xlu0 %v5420_v1  ;;  %s5424_s29 = smov 1   ;;  %v5250_v49 = vld [vmem:[%s6498_s3] sm:$0xff]   ;;  %vm697_vm4 = vcmask 138240   ;;  %v5251_v60 = vld [vmem:[%s6498_s3 + $0x8] ss:$0 sps:$4 sm:$0xff]  }
   0xe   : > { %s5475_s22 = smul.u32 20, %s6504_s19  ;;  %s5425_s30 = smov 127   ;;  %vm840_vm5 = vcmask 7168   ;;  %vm1134_vm6 = vcmask 1039360   ;;  %vm1277_vm7 = vcmask 908288   ;;  %vm1420_vm8 = vcmask 900096  }
   0xf   : > { %s5426_s6 = smov 111   ;;  %s5427_s7 = smov 110   ;;  %vm1563_vm9 = vcmask 891904  }
  0x10   : > { %s5484_s25 = scalar_lea.vmem %s6495_s0, %s5475_s22  ;;  %s5534_s10 = scalar_lea.vmem %s6496_s1, %s5475_s22 }
  0x11   : > { %v400_v2 = vld [vmem:[%s5484_s25 + $0x8] sm:$0xff]  ;;  %v399_v3 = vld [vmem:[%s5484_s25] sm:$0xff]  ;;  %s5428_s11 = smov 109   ;;  %s5598_s16 = scalar_lea.vmem %s6497_s2, %s5475_s22 }
  0x12   : > { %v4725_v4 = vcombine.low %v400_v2, %v400_v2  ;;  %v4723_v5 = vcombine.low %v399_v3, %v399_v3  ;;  %v4726_v6 = vcombine.high %v400_v2, %v400_v2  ;;  %v4724_v7 = vcombine.high %v399_v3, %v399_v3  ;;  %v1106_v8 = vld [vmem:[%s5484_s25 + $0x4] sm:$0xff]  ;;  %v1107_v11 = vld [vmem:[%s5484_s25 + $0xc] sm:$0xff] }
  0x13   : > { %v5507_v9 = vcombine.low %v1106_v8, %v1106_v8  ;;  %v5509_v10 = vcombine.high %v1106_v8, %v1106_v8  ;;  %v4767_v12 = vcombine.low %v1107_v11, %v1107_v11  ;;  %v4768_v13 = vcombine.high %v1107_v11, %v1107_v11  ;;  %v1786_v14 = vld [vmem:[%s5534_s10] sm:$0xff]  ;;  %v1787_v17 = vld [vmem:[%s5534_s10 + $0x8] sm:$0xff] }
  0x14   : > { %423 = vrot.lane.b32.xlu1 %v4725_v4, %s5421_s26  ;;  %419 = vrot.lane.b32.xlu0 %v4723_v5, %s5421_s26  ;;  %v4797_v15 = vcombine.low %v1786_v14, %v1786_v14  ;;  %v4798_v16 = vcombine.high %v1786_v14, %v1786_v14  ;;  %v4799_v18 = vcombine.low %v1787_v17, %v1787_v17  ;;  %v2487_v20 = vld [vmem:[%s5534_s10 + $0x4] sm:$0xff]  ;;  %v2488_v23 = vld [vmem:[%s5534_s10 + $0xc] sm:$0xff] }
  0x15   : > { %v4800_v19 = vcombine.high %v1787_v17, %v1787_v17  ;;  %v5561_v21 = vcombine.low %v2487_v20, %v2487_v20  ;;  %v5563_v22 = vcombine.high %v2487_v20, %v2487_v20  ;;  %v4841_v24 = vcombine.low %v2488_v23, %v2488_v23  ;;  %v3166_v38 = vld [vmem:[%s5598_s16] sm:$0xff]  ;;  %v3167_v46 = vld [vmem:[%s5598_s16 + $0x8] sm:$0xff] }
  0x16   : > { %v4842_v25 = vcombine.high %v2488_v23, %v2488_v23  ;;  %v5613_v42 = vcombine.low %v3166_v38, %v3166_v38  ;;  %v5615_v43 = vcombine.high %v3166_v38, %v3166_v38  ;;  %v5631_v52 = vcombine.low %v3167_v46, %v3167_v46  ;;  %v385_v8 = vld [vmem:[%s5484_s25 + $0xc] sm:$0xf] }
  0x17   : > { %v5633_v53 = vcombine.high %v3167_v46, %v3167_v46  ;;  %v4757_v14 = vcombine.low %v385_v8, %v385_v8  ;;  %v5260_v23 = vld [vmem:[%s6498_s3 + $0x2c] ss:$0 sps:$4 sm:$0xff]  }
  0x18   : > { %425 = vrot.lane.b32.xlu1 %v4726_v6, %s5421_s26  ;;  %421 = vrot.lane.b32.xlu0 %v4724_v7, %s5421_s26 }
  0x1c   : > { %557 = vrot.lane.b32.xlu1 %v4724_v7, %s5422_s27  ;;  %555 = vrot.lane.b32.xlu0 %v4723_v5, %s5422_s27 }
  0x20   : > { %561 = vrot.lane.b32.xlu1 %v4726_v6, %s5422_s27  ;;  %559 = vrot.lane.b32.xlu0 %v4725_v4, %s5422_s27 }
  0x24   : > { %691 = vrot.lane.b32.xlu1 %v4724_v7, %s5423_s28  ;;  %689 = vrot.lane.b32.xlu0 %v4723_v5, %s5423_s28 }
  0x28   : > { %695 = vrot.lane.b32.xlu1 %v4726_v6, %s5423_s28  ;;  %693 = vrot.lane.b32.xlu0 %v4725_v4, %s5423_s28 }
  0x2c   : > { %832 = vrot.lane.b32.xlu0 %v4723_v5, %s5424_s29  ;;  %834 = vrot.lane.b32.xlu1 %v4724_v7, %s5424_s29  ;;  %v5253_v7 = vld [vmem:[%s6498_s3 + $0x20] ss:$0 sps:$4 sm:$0xff]  }
  0x30   : > { %836 = vrot.lane.b32.xlu0 %v4725_v4, %s5424_s29  ;;  %838 = vrot.lane.b32.xlu1 %v4726_v6, %s5424_s29 }
  0x34   : > { %1126 = vrot.lane.b32.xlu0 %v5507_v9, %s5425_s30  ;;  %1128 = vrot.lane.b32.xlu1 %v5509_v10, %s5425_s30 }
  0x38   : > { %1130 = vrot.lane.b32.xlu0 %v4767_v12, %s5425_s30  ;;  %1132 = vrot.lane.b32.xlu1 %v4768_v13, %s5425_s30 }
  0x3c   : > { %1269 = vrot.lane.b32.xlu0 %v5507_v9, %s5426_s6  ;;  %1271 = vrot.lane.b32.xlu1 %v5509_v10, %s5426_s6 }
  0x40   : > { %1273 = vrot.lane.b32.xlu0 %v4767_v12, %s5426_s6  ;;  %1275 = vrot.lane.b32.xlu1 %v4768_v13, %s5426_s6 }
  0x44   : > { %1412 = vrot.lane.b32.xlu0 %v5507_v9, %s5427_s7  ;;  %1414 = vrot.lane.b32.xlu1 %v5509_v10, %s5427_s7 }
  0x48   : > { %1416 = vrot.lane.b32.xlu0 %v4767_v12, %s5427_s7  ;;  %1418 = vrot.lane.b32.xlu1 %v4768_v13, %s5427_s7 }
  0x4c   : > { %1555 = vrot.lane.b32.xlu0 %v5507_v9, %s5428_s11  ;;  %1557 = vrot.lane.b32.xlu1 %v5509_v10, %s5428_s11 }
  0x50   : > { %1559 = vrot.lane.b32.xlu0 %v4767_v12, %s5428_s11  ;;  %1561 = vrot.lane.b32.xlu1 %v4768_v13, %s5428_s11 }
  0x54   : > { %1806 = vrot.lane.b32.xlu0 %v4797_v15, %s5421_s26  ;;  %1808 = vrot.lane.b32.xlu1 %v4798_v16, %s5421_s26 }
  0x58   : > { %1810 = vrot.lane.b32.xlu0 %v4799_v18, %s5421_s26  ;;  %1812 = vrot.lane.b32.xlu1 %v4800_v19, %s5421_s26 }
  0x5c   : > { %1939 = vrot.lane.b32.xlu0 %v4797_v15, %s5422_s27  ;;  %1941 = vrot.lane.b32.xlu1 %v4798_v16, %s5422_s27 }
  0x60   : > { %1943 = vrot.lane.b32.xlu0 %v4799_v18, %s5422_s27  ;;  %1945 = vrot.lane.b32.xlu1 %v4800_v19, %s5422_s27 }
  0x64   : > { %2072 = vrot.lane.b32.xlu0 %v4797_v15, %s5423_s28  ;;  %2074 = vrot.lane.b32.xlu1 %v4798_v16, %s5423_s28 }
  0x68   : > { %2076 = vrot.lane.b32.xlu0 %v4799_v18, %s5423_s28  ;;  %2078 = vrot.lane.b32.xlu1 %v4800_v19, %s5423_s28 }
  0x6c   : > { %2214 = vrot.lane.b32.xlu0 %v4797_v15, %s5424_s29  ;;  %2216 = vrot.lane.b32.xlu1 %v4798_v16, %s5424_s29  ;;  %v5255_v15 = vld [vmem:[%s6498_s3 + $0x24] sm:$0xff]  }
  0x70   : > { %2218 = vrot.lane.b32.xlu0 %v4799_v18, %s5424_s29  ;;  %2220 = vrot.lane.b32.xlu1 %v4800_v19, %s5424_s29  ;;  %v996_v18 = vsel %vm438_vm2, %v4757_v14, 0 }
  0x74   : > { %2507 = vrot.lane.b32.xlu0 %v5561_v21, %s5425_s30  ;;  %2509 = vrot.lane.b32.xlu1 %v5563_v22, %s5425_s30 }
  0x78   : > { %2511 = vrot.lane.b32.xlu0 %v4841_v24, %s5425_s30  ;;  %2513 = vrot.lane.b32.xlu1 %v4842_v25, %s5425_s30 }
  0x7c   : > { %2649 = vrot.lane.b32.xlu0 %v5561_v21, %s5426_s6  ;;  %2651 = vrot.lane.b32.xlu1 %v5563_v22, %s5426_s6 }
  0x80   : > { %2653 = vrot.lane.b32.xlu0 %v4841_v24, %s5426_s6  ;;  %2655 = vrot.lane.b32.xlu1 %v4842_v25, %s5426_s6 }
  0x84   : > { %2791 = vrot.lane.b32.xlu0 %v5561_v21, %s5427_s7  ;;  %2793 = vrot.lane.b32.xlu1 %v5563_v22, %s5427_s7 }
  0x86   : > { %v424_v26 = vpop.permute.xlu1 %423  ;;  %v420_v27 = vpop.permute.xlu0 %419 }
  0x88   : > { %2795 = vrot.lane.b32.xlu0 %v4841_v24, %s5427_s7  ;;  %2797 = vrot.lane.b32.xlu1 %v4842_v25, %s5427_s7 }
  0x8a   : > { %v426_v28 = vpop.permute.xlu1 %425  ;;  %v422_v29 = vpop.permute.xlu0 %421 }
  0x8b   : > { %v429_v30 = vsel %vm427_vm1, %v422_v29, %v424_v26  ;;  %v430_v31 = vsel %vm427_vm1, %v424_v26, %v426_v28  ;;  %v428_v32 = vsel %vm427_vm1, %v420_v27, %v422_v29  ;;  %v5261_v26 = vld [vmem:[%s6498_s3 + $0x30] sm:$0xff]  }
  0x8c   : > { %4727 = vmatprep.subr.msk.bf16.mxu0 %vm438_vm2, %v429_v30  ;;  %5188 = vmatprep.subr.msk.bf16.mxu1 %vm438_vm2, %v430_v31  ;;  %v440_v33 = vsel %vm438_vm2, %v428_v32, 0  ;;  %v446_v34 = vsel %vm438_vm2, %v430_v31, 0  ;;  %v3868_v31 = vld [vmem:[%s5598_s16 + $0xc] sm:$0xff] }
  0x8d   : > { %463 = vmatpush1.bf16.msra.mxu0 %v440_v33  ;;  %5027 = vmatpush3.bf16.msra.mxu1 %v446_v34  ;;  %v5735_v33 = vcombine.high %v3868_v31, %v3868_v31  ;;  %v5739_v34 = vcombine.low %v3868_v31, %v3868_v31 }
  0x8e   : > { %v558_v36 = vpop.permute.xlu1 %557  ;;  %v556_v37 = vpop.permute.xlu0 %555  ;;  %2933 = vrot.lane.b32.xlu0 %v5561_v21, %s5428_s11  ;;  %2935 = vrot.lane.b32.xlu1 %v5563_v22, %s5428_s11 }
  0x8f   : > { %v564_v39 = vsel %vm563_vm3, %v556_v37, %v558_v36 }
  0x90   : > { %5029 = vmatmul.mubr.msk.bf16.vlgmr.msra.gmra.mxu1 %vm431_vm0, %v5249_v35  ;;  %4728 = vmatmul.mubr.msk.bf16.vlgmr.msra.gmra.mxu0 %vm431_vm0, %v5472_v0  ;;  %v574_v47 = vsel %vm438_vm2, %v564_v39, 0  ;;  %v5252_v0 = vld [vmem:[%s6498_s3 + $0x18] sm:$0xff]  }
  0x91   : > { %490 = vmatprep.mubr.bf16.mxu0 %v5420_v1  ;;  %614 = vmatprep.mubr.bf16.mxu1 %v5420_v1 }
  0x92   : > { %v562_v40 = vpop.permute.xlu1 %561  ;;  %v560_v41 = vpop.permute.xlu0 %559  ;;  %2937 = vrot.lane.b32.xlu0 %v4841_v24, %s5428_s11  ;;  %2939 = vrot.lane.b32.xlu1 %v4842_v25, %s5428_s11  ;;  %v3867_v24 = vld [vmem:[%s5598_s16 + $0x4] sm:$0xff]  ;;  %v990_v25 = vsel %vm438_vm2, %v5507_v9, 0 }
  0x93   : > { %v565_v44 = vsel %vm563_vm3, %v558_v36, %v560_v41  ;;  %v566_v45 = vsel %vm563_vm3, %v560_v41, %v562_v40  ;;  %v5720_v29 = vcombine.high %v3867_v24, %v3867_v24  ;;  %v5724_v30 = vcombine.low %v3867_v24, %v3867_v24  ;;  %v5274_v24 = vld [vmem:[%s6498_s3 + $0x68] ss:$0 sps:$4 sm:$0xff]  }
  0x94   : > { %v580_v48 = vsel %vm438_vm2, %v566_v45, 0  ;;  %4734 = vmatprep.subr.msk.bf16.mxu1 %vm438_vm2, %v565_v44  ;;  %5189 = vmatprep.subr.msk.bf16.mxu0 %vm438_vm2, %v566_v45 }
  0x95   : > { %597 = vmatpush1.bf16.msra.mxu1 %v574_v47  ;;  %5033 = vmatpush3.bf16.msra.mxu0 %v580_v48 }
  0x96   : > { %v692_v50 = vpop.permute.xlu1 %691  ;;  %v690_v51 = vpop.permute.xlu0 %689  ;;  %3186 = vrot.lane.b32.xlu0 %v5613_v42, %s5421_s26  ;;  %3188 = vrot.lane.b32.xlu1 %v5615_v43, %s5421_s26 }
  0x97   : > { %v698_v56 = vsel %vm697_vm4, %v690_v51, %v692_v50 }
  0x98   : > { %4729 = vmatmul.mubr.msk.bf16.gmra.mxu0 %vm431_vm0, %v5249_v35  ;;  %4735 = vmatmul.mubr.msk.bf16.vlgmr.msra.gmra.mxu1 %vm431_vm0, %v5250_v49  ;;  %v708_v61 = vsel %vm438_vm2, %v698_v56, 0  ;;  %v5262_v35 = vld [vmem:[%s6498_s3 + $0x38] ss:$0 sps:$4 sm:$0xff]  }
  0x99   : > { %624 = vmatprep.mubr.bf16.mxu1 %v5420_v1  ;;  %5034 = vmatprep.mubr.msk.bf16.mxu0 %vm431_vm0, %v5250_v49 }
  0x9a   : > { %v696_v54 = vpop.permute.xlu1 %695  ;;  %v694_v55 = vpop.permute.xlu0 %693  ;;  %3190 = vrot.lane.b32.xlu0 %v5631_v52, %s5421_s26  ;;  %3192 = vrot.lane.b32.xlu1 %v5633_v53, %s5421_s26 }
  0x9b   : > { %v699_v57 = vsel %vm697_vm4, %v692_v50, %v694_v55  ;;  %v700_v58 = vsel %vm697_vm4, %v694_v55, %v696_v54  ;;  %v5264_v50 = vld [vmem:[%s6498_s3 + $0x44] ss:$0 sps:$4 sm:$0xff]  }
  0x9c   : > { %v714_v59 = vsel %vm438_vm2, %v700_v58, 0  ;;  %4741 = vmatprep.subr.msk.bf16.mxu0 %vm438_vm2, %v699_v57  ;;  %5190 = vmatprep.subr.msk.bf16.mxu1 %vm438_vm2, %v700_v58  ;;  %v5266_v57 = vld [vmem:[%s6498_s3 + $0x50] ss:$0 sps:$4 sm:$0xff]  }
  0x9d   : > { %5039 = vmatpush3.bf16.msra.mxu1 %v714_v59 }
  0x9e   : > { %v833_v62 = vpop.permute.xlu0 %832  ;;  %v835_v63 = vpop.permute.xlu1 %834  ;;  %3319 = vrot.lane.b32.xlu0 %v5613_v42, %s5422_s27  ;;  %3321 = vrot.lane.b32.xlu1 %v5615_v43, %s5422_s27 }
  0x9f   : > { %v841_v4 = vsel %vm840_vm5, %v833_v62, %v835_v63 }
  0xa0   : > { %4736 = vmatmul.mubr.msk.bf16.gmra.mxu1 %vm431_vm0, %v5251_v60  ;;  %5035 = vmatmul.mubr.msk.bf16.vlgmr.msra.gmra.mxu0 %vm431_vm0, %v5251_v60  ;;  %v851_v11 = vsel %vm438_vm2, %v841_v4, 0 }
  0xa1   : > { %731 = vmatpush1.bf16.msra.mxu0 %v708_v61  ;;  %748 = vmatprep.mubr.bf16.mxu0 %v5420_v1 }
  0xa2   : > { %v837_v2 = vpop.permute.xlu0 %836  ;;  %5040 = vmatprep.mubr.msk.bf16.mxu1 %vm431_vm0, %v5252_v0  ;;  %v839_v3 = vpop.permute.xlu1 %838  ;;  %3323 = vrot.lane.b32.xlu0 %v5631_v52, %s5422_s27 }
  0xa3   : > { %v842_v5 = vsel %vm840_vm5, %v835_v63, %v837_v2  ;;  %v843_v6 = vsel %vm840_vm5, %v837_v2, %v839_v3  ;;  %3325 = vrot.lane.b32.xlu1 %v5633_v53, %s5422_s27 }
  0xa4   : > { %4748 = vmatprep.subr.msk.bf16.mxu1 %vm438_vm2, %v842_v5  ;;  %5191 = vmatprep.subr.msk.bf16.mxu0 %vm438_vm2, %v843_v6  ;;  %v857_v12 = vsel %vm438_vm2, %v843_v6, 0  ;;  %v4716_v6 = vld [vmem:[%s6499_s4 + $0x20] sm:$0xff] }
  0xa6   : > { %v1127_v13 = vpop.permute.xlu0 %1126  ;;  %3452 = vrot.lane.b32.xlu0 %v5613_v42, %s5423_s28  ;;  %v1129_v16 = vpop.permute.xlu1 %1128 }
  0xa7   : > { %3454 = vrot.lane.b32.xlu1 %v5615_v43, %s5423_s28  ;;  %v1135_v32 = vsel %vm1134_vm6, %v1127_v13, %v1129_v16  ;;  %v5272_v13 = vld [vmem:[%s6498_s3 + $0x5c] ss:$0 sps:$4 sm:$0xff]  }
  0xa8   : > { %4742 = vmatmul.mubr.msk.bf16.vlgmr.msra.gmra.mxu0 %vm431_vm0, %v5252_v0  ;;  %5041 = vmatmul.mubr.msk.bf16.vlgmr.msra.gmra.mxu1 %vm431_vm0, %v5253_v7  ;;  %v1145_v37 = vsel %vm438_vm2, %v1135_v32, 0  ;;  %v5268_v0 = vld [vmem:[%s6498_s3 + $0x54] sm:$0xff]  }
  0xa9   : > { %874 = vmatpush1.bf16.msra.mxu1 %v851_v11  ;;  %5045 = vmatpush3.bf16.msra.mxu0 %v857_v12 }
  0xaa   : > { %758 = vmatprep.mubr.bf16.mxu0 %v5420_v1  ;;  %891 = vmatprep.mubr.bf16.mxu1 %v5420_v1  ;;  %v1131_v17 = vpop.permute.xlu0 %1130  ;;  %v1133_v20 = vpop.permute.xlu1 %1132 }
  0xab   : > { %5192 = vmatprep.subr.msk.bf16.mxu1 %vm438_vm2, %v4757_v14  ;;  %4758 = vmatprep.subr.msk.bf16.mxu0 %vm438_vm2, %v5509_v10  ;;  %v1136_v19 = vsel %vm1134_vm6, %v1129_v16, %v1131_v17  ;;  %v1137_v27 = vsel %vm1134_vm6, %v1131_v17, %v1133_v20  ;;  %v4719_v14 = vld [vmem:[%s6499_s4 + $0x38] sm:$0xff]  ;;  %v5273_v17 = vld [vmem:[%s6498_s3 + $0x60] sm:$0xff]   ;;  %v4717_v20 = vld [vmem:[%s6499_s4 + $0x28] sm:$0xff] }
  0xac   : > { %3456 = vrot.lane.b32.xlu0 %v5631_v52, %s5423_s28  ;;  %3458 = vrot.lane.b32.xlu1 %v5633_v53, %s5423_s28  ;;  %v1151_v38 = vsel %vm438_vm2, %v1137_v27, 0 }
  0xae   : > { %v1270_v10 = vpop.permute.xlu0 %1269  ;;  %v1272_v28 = vpop.permute.xlu1 %1271 }
  0xaf   : > { %v1278_v48 = vsel %vm1277_vm7, %v1270_v10, %v1272_v28 }
  0xb0   : > { %4743 = vmatmul.mubr.msk.bf16.gmra.mxu0 %vm431_vm0, %v5253_v7  ;;  %4749 = vmatmul.mubr.msk.bf16.vlgmr.msra.gmra.mxu1 %vm431_vm0, %v5255_v15  ;;  %v1288_v51 = vsel %vm438_vm2, %v1278_v48, 0  ;;  %v374_v7 = vld [vmem:[%s6499_s4 + $0x8] sm:$0xff] }
  0xb1   : > { %5051 = vmatpush3.bf16.msra.mxu1 %v996_v18  ;;  %901 = vmatprep.mubr.bf16.mxu1 %v5420_v1 }
  0xb2   : > { %5046 = vmatprep.mubr.msk.bf16.mxu0 %vm431_vm0, %v5255_v15  ;;  %4769 = vmatprep.subr.msk.bf16.mxu1 %vm438_vm2, %v1136_v19  ;;  %v1274_v9 = vpop.permute.xlu0 %1273  ;;  %v1276_v36 = vpop.permute.xlu1 %1275  ;;  %v375_v15 = vld [vmem:[%s6499_s4 + $0x10] sm:$0xff] }
  0xb3   : > { %3596 = vrot.lane.b32.xlu1 %v5615_v43, %s5424_s29  ;;  %3594 = vrot.lane.b32.xlu0 %v5613_v42, %s5424_s29  ;;  %v1279_v40 = vsel %vm1277_vm7, %v1272_v28, %v1274_v9  ;;  %v1280_v41 = vsel %vm1277_vm7, %v1274_v9, %v1276_v36  ;;  %v5263_v42 = vld [vmem:[%s6498_s3 + $0x3c] sm:$0xff]  }
  0xb4   : > { %v1294_v45 = vsel %vm438_vm2, %v1280_v41, 0 }
  0xb6   : > { %v1413_v39 = vpop.permute.xlu0 %1412  ;;  %v1415_v43 = vpop.permute.xlu1 %1414 }
  0xb7   : > { %3600 = vrot.lane.b32.xlu1 %v5633_v53, %s5424_s29  ;;  %3598 = vrot.lane.b32.xlu0 %v5631_v52, %s5424_s29  ;;  %v5265_v52 = vld [vmem:[%s6498_s3 + $0x48] sm:$0xff]   ;;  %v1421_v56 = vsel %vm1420_vm8, %v1413_v39, %v1415_v43 }
  0xb8   : > { %4750 = vmatmul.mubr.msk.bf16.gmra.mxu1 %vm431_vm0, %v5260_v23  ;;  %5047 = vmatmul.mubr.msk.bf16.vlgmr.msra.gmra.mxu0 %vm431_vm0, %v5260_v23  ;;  %v1431_v59 = vsel %vm438_vm2, %v1421_v56, 0 }
  0xb9   : > { %1013 = vmatpush1.bf16.msra.mxu0 %v990_v25  ;;  %1030 = vmatprep.mubr.bf16.mxu0 %v5420_v1  ;;  %v373_v25 = vld [vmem:[%s6499_s4] sm:$0xff] }
  0xba   : > { %5052 = vmatprep.mubr.msk.bf16.mxu1 %vm431_vm0, %v5261_v26  ;;  %5193 = vmatprep.subr.msk.bf16.mxu0 %vm438_vm2, %v1137_v27  ;;  %v1417_v44 = vpop.permute.xlu0 %1416  ;;  %v1419_v49 = vpop.permute.xlu1 %1418 }
  0xbb   : > { %3889 = vrot.lane.b32.xlu1 %v5720_v29, %s5425_s30  ;;  %3887 = vrot.lane.b32.xlu0 %v5724_v30, %s5425_s30  ;;  %v1422_v46 = vsel %vm1420_vm8, %v1415_v43, %v1417_v44  ;;  %v1423_v53 = vsel %vm1420_vm8, %v1417_v44, %v1419_v49 }
  0xbc   : > { %v1437_v60 = vsel %vm438_vm2, %v1423_v53, 0 }
  0xbe   : > { %v1556_v47 = vpop.permute.xlu0 %1555  ;;  %v1558_v54 = vpop.permute.xlu1 %1557 }
  0xbf   : > { %3893 = vrot.lane.b32.xlu1 %v5735_v33, %s5425_s30  ;;  %3891 = vrot.lane.b32.xlu0 %v5739_v34, %s5425_s30  ;;  %v1564_v11 = vsel %vm1563_vm9, %v1556_v47, %v1558_v54  ;;  %v5278_v47 = vld [vmem:[%s6498_s3 + $0x74] ss:$0 sps:$4 sm:$0xff]  }
  0xc0   : > { %4759 = vmatmul.mubr.msk.bf16.vlgmr.msra.gmra.mxu0 %vm431_vm0, %v5261_v26  ;;  %5053 = vmatmul.mubr.msk.bf16.vlgmr.msra.gmra.mxu1 %vm431_vm0, %v5262_v35  ;;  %v1574_v16 = vsel %vm438_vm2, %v1564_v11, 0 }
  0xc1   : > { %1168 = vmatpush1.bf16.msra.mxu1 %v1145_v37  ;;  %5057 = vmatpush3.bf16.msra.mxu0 %v1151_v38 }
  0xc2   : > { %1040 = vmatprep.mubr.bf16.mxu0 %v5420_v1  ;;  %1185 = vmatprep.mubr.bf16.mxu1 %v5420_v1  ;;  %v1560_v55 = vpop.permute.xlu0 %1559  ;;  %v1562_v58 = vpop.permute.xlu1 %1561 }
  0xc3   : > { %4776 = vmatprep.subr.msk.bf16.mxu0 %vm438_vm2, %v1279_v40  ;;  %5194 = vmatprep.subr.msk.bf16.mxu1 %vm438_vm2, %v1280_v41  ;;  %v1565_v62 = vsel %vm1563_vm9, %v1558_v54, %v1560_v55  ;;  %v1566_v63 = vsel %vm1563_vm9, %v1560_v55, %v1562_v58  ;;  %v5276_v40 = vld [vmem:[%s6498_s3 + $0x80] ss:$0 sps:$4 sm:$0xff]   ;;  %v5281_v54 = vld [vmem:[%s6498_s3 + $0x84] sm:$0xff]   ;;  %v390_v58 = vld [vmem:[%s5534_s10 + $0xc] sm:$0xf] }
  0xc4   : > { %4031 = vrot.lane.b32.xlu1 %v5720_v29, %s5426_s6  ;;  %4029 = vrot.lane.b32.xlu0 %v5724_v30, %s5426_s6  ;;  %v1580_v4 = vsel %vm438_vm2, %v1566_v63, 0 }
  0xc6   : > { %v1807_v61 = vpop.permute.xlu0 %1806  ;;  %v1809_v2 = vpop.permute.xlu1 %1808 }
  0xc7   : > { %v1814_v23 = vsel %vm427_vm1, %v1807_v61, %v1809_v2  ;;  %v5285_v61 = vld [vmem:[%s6498_s3 + $0x90] sm:$0xff]  }
  0xc8   : > { %4760 = vmatmul.mubr.msk.bf16.gmra.mxu0 %vm431_vm0, %v5262_v35  ;;  %4770 = vmatmul.mubr.msk.bf16.vlgmr.msra.gmra.mxu1 %vm431_vm0, %v5263_v42  ;;  %v1824_v27 = vsel %vm438_vm2, %v1814_v23, 0 }
  0xc9   : > { %5063 = vmatpush3.bf16.msra.mxu1 %v1294_v45  ;;  %1195 = vmatprep.mubr.bf16.mxu1 %v5420_v1 }
  0xca   : > { %5058 = vmatprep.mubr.msk.bf16.mxu0 %vm431_vm0, %v5263_v42  ;;  %4783 = vmatprep.subr.msk.bf16.mxu1 %vm438_vm2, %v1422_v46  ;;  %v1811_v3 = vpop.permute.xlu0 %1810  ;;  %v1813_v12 = vpop.permute.xlu1 %1812  ;;  %v5277_v42 = vld [vmem:[%s6498_s3 + $0x6c] sm:$0xff]  }
  0xcb   : > { %4035 = vrot.lane.b32.xlu1 %v5735_v33, %s5426_s6  ;;  %4033 = vrot.lane.b32.xlu0 %v5739_v34, %s5426_s6  ;;  %v1815_v5 = vsel %vm427_vm1, %v1809_v2, %v1811_v3  ;;  %v1816_v18 = vsel %vm427_vm1, %v1811_v3, %v1813_v12  ;;  %v5286_v2 = vld [vmem:[%s6498_s3 + $0x98] ss:$0 sps:$4 sm:$0xff]  }
  0xcc   : > { %v1830_v28 = vsel %vm438_vm2, %v1816_v18, 0 }
  0xce   : > { %v1940_v8 = vpop.permute.xlu0 %1939  ;;  %v1942_v19 = vpop.permute.xlu1 %1941 }
  0xcf   : > { %4173 = vrot.lane.b32.xlu1 %v5720_v29, %s5427_s7  ;;  %4171 = vrot.lane.b32.xlu0 %v5724_v30, %s5427_s7  ;;  %v1947_v38 = vsel %vm563_vm3, %v1940_v8, %v1942_v19 }
  0xd0   : > { %4771 = vmatmul.mubr.msk.bf16.gmra.mxu1 %vm431_vm0, %v5264_v50  ;;  %5059 = vmatmul.mubr.msk.bf16.vlgmr.msra.gmra.mxu0 %vm431_vm0, %v5264_v50  ;;  %v1957_v41 = vsel %vm438_vm2, %v1947_v38, 0 }
  0xd1   : > { %1311 = vmatpush1.bf16.msra.mxu0 %v1288_v51  ;;  %1328 = vmatprep.mubr.bf16.mxu0 %v5420_v1 }
  0xd2   : > { %5064 = vmatprep.mubr.msk.bf16.mxu1 %vm431_vm0, %v5265_v52  ;;  %5195 = vmatprep.subr.msk.bf16.mxu0 %vm438_vm2, %v1423_v53  ;;  %v1944_v10 = vpop.permute.xlu0 %1943  ;;  %v1946_v26 = vpop.permute.xlu1 %1945 }
  0xd3   : > { %4177 = vrot.lane.b32.xlu1 %v5735_v33, %s5427_s7  ;;  %4175 = vrot.lane.b32.xlu0 %v5739_v34, %s5427_s7  ;;  %v1948_v31 = vsel %vm563_vm3, %v1942_v19, %v1944_v10  ;;  %v1949_v32 = vsel %vm563_vm3, %v1944_v10, %v1946_v26  ;;  %v5289_v19 = vld [vmem:[%s6498_s3 + $0xa4] ss:$0 sps:$4 sm:$0xff]  }
  0xd4   : > { %v1963_v36 = vsel %vm438_vm2, %v1949_v32, 0 }
  0xd6   : > { %v2073_v9 = vpop.permute.xlu0 %2072 }
  0xd7   : > { %4315 = vrot.lane.b32.xlu1 %v5720_v29, %s5428_s11  ;;  %4313 = vrot.lane.b32.xlu0 %v5724_v30, %s5428_s11 }
  0xd8   : > { %4777 = vmatmul.mubr.msk.bf16.vlgmr.msra.gmra.mxu0 %vm431_vm0, %v5265_v52  ;;  %5065 = vmatmul.mubr.msk.bf16.vlgmr.msra.gmra.mxu1 %vm431_vm0, %v5266_v57 }
  0xd9   : > { %1454 = vmatpush1.bf16.msra.mxu1 %v1431_v59  ;;  %5069 = vmatpush3.bf16.msra.mxu0 %v1437_v60  ;;  %v5284_v59 = vld [vmem:[%s6498_s3 + $0x8c] ss:$0 sps:$4 sm:$0xff]  }
  0xda   : > { %1338 = vmatprep.mubr.bf16.mxu0 %v5420_v1  ;;  %1471 = vmatprep.mubr.bf16.mxu1 %v5420_v1  ;;  %v2077_v35 = vpop.permute.xlu0 %2076 }
  0xdb   : > { %4790 = vmatprep.subr.msk.bf16.mxu0 %vm438_vm2, %v1565_v62  ;;  %5196 = vmatprep.subr.msk.bf16.mxu1 %vm438_vm2, %v1566_v63  ;;  %v4831_v62 = vcombine.low %v390_v58, %v390_v58 }
  0xdc   : > { %4319 = vrot.lane.b32.xlu1 %v5735_v33, %s5428_s11  ;;  %4317 = vrot.lane.b32.xlu0 %v5739_v34, %s5428_s11  ;;  %v5275_v33 = vld [vmem:[%s6498_s3 + $0x78] sm:$0xff]   ;;  %v2075_v34 = vpop.permute.xlu1 %2074 }
  0xdd   : > { %v2081_v37 = vsel %vm697_vm4, %v2075_v34, %v2077_v35  ;;  %v2080_v46 = vsel %vm697_vm4, %v2073_v9, %v2075_v34 }
  0xde   : > { %v2215_v44 = vpop.permute.xlu0 %2214  ;;  %v2090_v50 = vsel %vm438_vm2, %v2080_v46, 0 }
  0xe0   : > { %4778 = vmatmul.mubr.msk.bf16.gmra.mxu0 %vm431_vm0, %v5266_v57  ;;  %4784 = vmatmul.mubr.msk.bf16.vlgmr.msra.gmra.mxu1 %vm431_vm0, %v5268_v0  ;;  %v2079_v39 = vpop.permute.xlu1 %2078 }
  0xe1   : > { %5075 = vmatpush3.bf16.msra.mxu1 %v1580_v4  ;;  %1481 = vmatprep.mubr.bf16.mxu1 %v5420_v1  ;;  %v2082_v43 = vsel %vm697_vm4, %v2077_v35, %v2079_v39  ;;  %v2371_v4 = vsel %vm438_vm2, %v5561_v21, 0  ;;  %v5288_v21 = vld [vmem:[%s6498_s3 + $0x9c] sm:$0xff]   ;;  %v5292_v35 = vld [vmem:[%s6498_s3 + $0xb4] sm:$0xff]  }
  0xe2   : > { %5070 = vmatprep.mubr.msk.bf16.mxu0 %vm431_vm0, %v5268_v0  ;;  %4801 = vmatprep.subr.msk.bf16.mxu1 %vm438_vm2, %v1815_v5  ;;  %v2219_v48 = vpop.permute.xlu0 %2218  ;;  %v2096_v51 = vsel %vm438_vm2, %v2082_v43, 0  ;;  %v4720_v0 = vld [vmem:[%s6499_s4 + $0x40] sm:$0xff]  ;;  %v2377_v5 = vsel %vm438_vm2, %v4831_v62, 0 }
  0xe3   : > { %3074 = vperm.xlu1 %5235, %v4716_v6   ;;  %1697 = vperm.xlu0 %5234, %v374_v7   ;;  %v4715_v7 = vld [vmem:[%s6499_s4 + $0x18] sm:$0xff] }
  0xe4   : > { %v2217_v45 = vpop.permute.xlu1 %2216 }
  0xe5   : > { %v2223_v52 = vsel %vm840_vm5, %v2217_v45, %v2219_v48  ;;  %v2222_v57 = vsel %vm840_vm5, %v2215_v44, %v2217_v45  ;;  %v5294_v45 = vld [vmem:[%s6498_s3 + $0xc0] sm:$0xff]  }
  0xe6   : > { %v2508_v56 = vpop.permute.xlu0 %2507  ;;  %v2232_v60 = vsel %vm438_vm2, %v2222_v57, 0 }
  0xe7   : > { %4454 = vperm.xlu1 %5235, %v4719_v14   ;;  %1702 = vperm.xlu0 %5234, %v375_v15  }
  0xe8   : > { %4785 = vmatmul.mubr.msk.bf16.gmra.mxu1 %vm431_vm0, %v5272_v13  ;;  %5071 = vmatmul.mubr.msk.bf16.vlgmr.msra.gmra.mxu0 %vm431_vm0, %v5272_v13  ;;  %v2221_v49 = vpop.permute.xlu1 %2220 }
  0xe9   : > { %1597 = vmatpush1.bf16.msra.mxu0 %v1574_v16  ;;  %1614 = vmatprep.mubr.bf16.mxu0 %v5420_v1  ;;  %v2224_v53 = vsel %vm840_vm5, %v2219_v48, %v2221_v49 }
  0xea   : > { %5076 = vmatprep.mubr.msk.bf16.mxu1 %vm431_vm0, %v5273_v17  ;;  %5197 = vmatprep.subr.msk.bf16.mxu0 %vm438_vm2, %v1816_v18  ;;  %v2238_v55 = vsel %vm438_vm2, %v2224_v53, 0 }
  0xeb   : > { %3079 = vperm.xlu1 %5235, %v4717_v20   ;;  %4459 = vperm.xlu0 %5234, %v4720_v0   ;;  %v5290_v20 = vld [vmem:[%s6498_s3 + $0xa8] sm:$0xff]  }
  0xec   : > { %v2510_v63 = vpop.permute.xlu1 %2509  ;;  %v5296_v0 = vld [vmem:[%s6498_s3 + $0xcc] sm:$0xff]  }
  0xef   : > { %1692 = vperm.xlu1 %5235, %v373_v25   ;;  %3069 = vperm.xlu0 %5234, %v4715_v7  }
  0xf0   : > { %4791 = vmatmul.mubr.msk.bf16.vlgmr.msra.gmra.mxu0 %vm431_vm0, %v5273_v17  ;;  %5077 = vmatmul.mubr.msk.bf16.vlgmr.msra.gmra.mxu1 %vm431_vm0, %v5274_v24  ;;  %v2514_v3 = vpop.permute.xlu1 %2513  ;;  %v2515_v17 = vsel %vm1134_vm6, %v2508_v56, %v2510_v63 }
  0xf1   : > { %1847 = vmatpush1.bf16.msra.mxu1 %v1824_v27  ;;  %5081 = vmatpush3.bf16.msra.mxu0 %v1830_v28  ;;  %v2525_v10 = vsel %vm438_vm2, %v2515_v17, 0  ;;  %v5291_v27 = vld [vmem:[%s6498_s3 + $0xb0] ss:$0 sps:$4 sm:$0xff]  }
  0xf2   : > { %1624 = vmatprep.mubr.bf16.mxu0 %v5420_v1  ;;  %1864 = vmatprep.mubr.bf16.mxu1 %v5420_v1 }
  0xf3   : > { %4808 = vmatprep.subr.msk.bf16.mxu0 %vm438_vm2, %v1948_v31  ;;  %5198 = vmatprep.subr.msk.bf16.mxu1 %vm438_vm2, %v1949_v32 }
  0xf4   : > { %v2652_v12 = vpop.permute.xlu1 %2651 }
  0xf8   : > { %4792 = vmatmul.mubr.msk.bf16.gmra.mxu0 %vm431_vm0, %v5274_v24  ;;  %4802 = vmatmul.mubr.msk.bf16.vlgmr.msra.gmra.mxu1 %vm431_vm0, %v5275_v33  ;;  %v2656_v18 = vpop.permute.xlu1 %2655 }
  0xf9   : > { %5087 = vmatpush3.bf16.msra.mxu1 %v1963_v36  ;;  %1874 = vmatprep.mubr.bf16.mxu1 %v5420_v1 }
  0xfa   : > { %5082 = vmatprep.mubr.msk.bf16.mxu0 %vm431_vm0, %v5275_v33  ;;  %4815 = vmatprep.subr.msk.bf16.mxu1 %vm438_vm2, %v2081_v37 }
  0xfc   : > { %v2794_v24 = vpop.permute.xlu1 %2793 }
 0x100   : > { %4803 = vmatmul.mubr.msk.bf16.gmra.mxu1 %vm431_vm0, %v5276_v40  ;;  %5083 = vmatmul.mubr.msk.bf16.vlgmr.msra.gmra.mxu0 %vm431_vm0, %v5276_v40  ;;  %v2798_v28 = vpop.permute.xlu1 %2797 }
 0x101   : > { %1980 = vmatpush1.bf16.msra.mxu0 %v1957_v41  ;;  %1997 = vmatprep.mubr.bf16.mxu0 %v5420_v1 }
 0x102   : > { %5088 = vmatprep.mubr.msk.bf16.mxu1 %vm431_vm0, %v5277_v42  ;;  %5199 = vmatprep.subr.msk.bf16.mxu0 %vm438_vm2, %v2082_v43  ;;  %v5293_v43 = vld [vmem:[%s6498_s3 + $0xbc] ss:$0 sps:$4 sm:$0xff]  }
 0x104   : > { %v2936_v36 = vpop.permute.xlu1 %2935 }
 0x108   : > { %4809 = vmatmul.mubr.msk.bf16.vlgmr.msra.gmra.mxu0 %vm431_vm0, %v5277_v42  ;;  %5089 = vmatmul.mubr.msk.bf16.vlgmr.msra.gmra.mxu1 %vm431_vm0, %v5278_v47  ;;  %v2940_v42 = vpop.permute.xlu1 %2939 }
 0x109   : > { %2113 = vmatpush1.bf16.msra.mxu1 %v2090_v50  ;;  %5093 = vmatpush3.bf16.msra.mxu0 %v2096_v51  ;;  %v5295_v50 = vld [vmem:[%s6498_s3 + $0xc8] ss:$0 sps:$4 sm:$0xff]  }
 0x10a   : > { %2007 = vmatprep.mubr.bf16.mxu0 %v5420_v1  ;;  %2130 = vmatprep.mubr.bf16.mxu1 %v5420_v1 }
 0x10b   : > { %4822 = vmatprep.subr.msk.bf16.mxu0 %vm438_vm2, %v2223_v52  ;;  %5200 = vmatprep.subr.msk.bf16.mxu1 %vm438_vm2, %v2224_v53 }
 0x110   : > { %4810 = vmatmul.mubr.msk.bf16.gmra.mxu0 %vm431_vm0, %v5278_v47  ;;  %4816 = vmatmul.mubr.msk.bf16.vlgmr.msra.gmra.mxu1 %vm431_vm0, %v5281_v54  ;;  %v3189_v47 = vpop.permute.xlu1 %3188 }
 0x111   : > { %5099 = vmatpush3.bf16.msra.mxu1 %v2238_v55  ;;  %2140 = vmatprep.mubr.bf16.mxu1 %v5420_v1 }
 0x112   : > { %5094 = vmatprep.mubr.msk.bf16.mxu0 %vm431_vm0, %v5281_v54  ;;  %4832 = vmatprep.subr.msk.bf16.mxu1 %vm438_vm2, %v5563_v22  ;;  %v2512_v22 = vpop.permute.xlu0 %2511 }
 0x113   : > { %v2516_v8 = vsel %vm1134_vm6, %v2510_v63, %v2512_v22  ;;  %v2517_v11 = vsel %vm1134_vm6, %v2512_v22, %v2514_v3 }
 0x114   : > { %v2531_v14 = vsel %vm438_vm2, %v2517_v11, 0  ;;  %v3193_v51 = vpop.permute.xlu1 %3192 }
 0x116   : > { %v2650_v6 = vpop.permute.xlu0 %2649 }
 0x117   : > { %v2657_v26 = vsel %vm1277_vm7, %v2650_v6, %v2652_v12 }
 0x118   : > { %4817 = vmatmul.mubr.msk.bf16.gmra.mxu1 %vm431_vm0, %v5284_v59  ;;  %5095 = vmatmul.mubr.msk.bf16.vlgmr.msra.gmra.mxu0 %vm431_vm0, %v5284_v59  ;;  %v2667_v9 = vsel %vm438_vm2, %v2657_v26, 0 }
 0x119   : > { %2255 = vmatpush1.bf16.msra.mxu0 %v2232_v60  ;;  %2272 = vmatprep.mubr.bf16.mxu0 %v5420_v1 }
 0x11a   : > { %5100 = vmatprep.mubr.msk.bf16.mxu1 %vm431_vm0, %v5285_v61  ;;  %5201 = vmatprep.subr.msk.bf16.mxu0 %vm438_vm2, %v4831_v62  ;;  %v2654_v13 = vpop.permute.xlu0 %2653 }
 0x11b   : > { %v2658_v15 = vsel %vm1277_vm7, %v2652_v12, %v2654_v13  ;;  %v2659_v23 = vsel %vm1277_vm7, %v2654_v13, %v2656_v18  ;;  %v5297_v18 = vld [vmem:[%s6498_s3 + $0xd4] ss:$0 sps:$4 sm:$0xff]  }
 0x11c   : > { %v2673_v31 = vsel %vm438_vm2, %v2659_v23, 0 }
 0x11e   : > { %v2792_v16 = vpop.permute.xlu0 %2791 }
 0x11f   : > { %v2799_v41 = vsel %vm1420_vm8, %v2792_v16, %v2794_v24 }
 0x120   : > { %4823 = vmatmul.mubr.msk.bf16.vlgmr.msra.gmra.mxu0 %vm431_vm0, %v5285_v61  ;;  %5101 = vmatmul.mubr.msk.bf16.vlgmr.msra.gmra.mxu1 %vm431_vm0, %v5286_v2  ;;  %v2809_v44 = vsel %vm438_vm2, %v2799_v41, 0  ;;  %v3322_v61 = vpop.permute.xlu1 %3321  ;;  %v5299_v41 = vld [vmem:[%s6498_s3 + $0xec] ss:$0 sps:$4 sm:$0xff]  }
 0x121   : > { %2394 = vmatpush1.bf16.msra.mxu1 %v2371_v4  ;;  %5105 = vmatpush3.bf16.msra.mxu0 %v2377_v5 }
 0x122   : > { %2282 = vmatprep.mubr.bf16.mxu0 %v5420_v1  ;;  %2411 = vmatprep.mubr.bf16.mxu1 %v5420_v1  ;;  %v2796_v25 = vpop.permute.xlu0 %2795 }
 0x123   : > { %4843 = vmatprep.subr.msk.bf16.mxu0 %vm438_vm2, %v2516_v8  ;;  %5202 = vmatprep.subr.msk.bf16.mxu1 %vm438_vm2, %v2517_v11  ;;  %v2800_v33 = vsel %vm1420_vm8, %v2794_v24, %v2796_v25  ;;  %v2801_v34 = vsel %vm1420_vm8, %v2796_v25, %v2798_v28  ;;  %v5298_v24 = vld [vmem:[%s6498_s3 + $0xe4] sm:$0xff]  }
 0x124   : > { %v2815_v38 = vsel %vm438_vm2, %v2801_v34, 0 }
 0x126   : > { %v2934_v32 = vpop.permute.xlu0 %2933 }
 0x127   : > { %v2941_v49 = vsel %vm1563_vm9, %v2934_v32, %v2936_v36 }
 0x128   : > { %4824 = vmatmul.mubr.msk.bf16.gmra.mxu0 %vm431_vm0, %v5286_v2  ;;  %4833 = vmatmul.mubr.msk.bf16.vlgmr.msra.gmra.mxu1 %vm431_vm0, %v5288_v21  ;;  %v2951_v53 = vsel %vm438_vm2, %v2941_v49, 0 }
 0x129   : > { %5111 = vmatpush3.bf16.msra.mxu1 %v2531_v14  ;;  %2421 = vmatprep.mubr.bf16.mxu1 %v5420_v1 }
 0x12a   : > { %5106 = vmatprep.mubr.msk.bf16.mxu0 %vm431_vm0, %v5288_v21  ;;  %4850 = vmatprep.subr.msk.bf16.mxu1 %vm438_vm2, %v2658_v15  ;;  %v2938_v37 = vpop.permute.xlu0 %2937  ;;  %v3326_v15 = vpop.permute.xlu1 %3325 }
 0x12b   : > { %v2942_v39 = vsel %vm1563_vm9, %v2936_v36, %v2938_v37  ;;  %v2943_v46 = vsel %vm1563_vm9, %v2938_v37, %v2940_v42 }
 0x12c   : > { %v2957_v54 = vsel %vm438_vm2, %v2943_v46, 0 }
 0x12e   : > { %v3187_v40 = vpop.permute.xlu0 %3186 }
 0x12f   : > { %v3194_v13 = vsel %vm427_vm1, %v3187_v40, %v3189_v47 }
 0x130   : > { %4834 = vmatmul.mubr.msk.bf16.gmra.mxu1 %vm431_vm0, %v5289_v19  ;;  %5107 = vmatmul.mubr.msk.bf16.vlgmr.msra.gmra.mxu0 %vm431_vm0, %v5289_v19 }
 0x131   : > { %2548 = vmatpush1.bf16.msra.mxu0 %v2525_v10  ;;  %2565 = vmatprep.mubr.bf16.mxu0 %v5420_v1  ;;  %v3204_v10 = vsel %vm438_vm2, %v3194_v13, 0 }
 0x132   : > { %5112 = vmatprep.mubr.msk.bf16.mxu1 %vm431_vm0, %v5290_v20  ;;  %5203 = vmatprep.subr.msk.bf16.mxu0 %vm438_vm2, %v2659_v23  ;;  %v3191_v48 = vpop.permute.xlu0 %3190 }
 0x133   : > { %v3195_v57 = vsel %vm427_vm1, %v3189_v47, %v3191_v48  ;;  %v3196_v58 = vsel %vm427_vm1, %v3191_v48, %v3193_v51 }
 0x134   : > { %v3210_v4 = vsel %vm438_vm2, %v3196_v58, 0 }
 0x136   : > { %v6024_v52 = vpop.permute.xlu0 %3319 }
 0x138   : > { %4844 = vmatmul.mubr.msk.bf16.vlgmr.msra.gmra.mxu0 %vm431_vm0, %v5290_v20  ;;  %5113 = vmatmul.mubr.msk.bf16.vlgmr.msra.gmra.mxu1 %vm431_vm0, %v5291_v27 }
 0x139   : > { %2690 = vmatpush1.bf16.msra.mxu1 %v2667_v9  ;;  %5117 = vmatpush3.bf16.msra.mxu0 %v2673_v31 }
 0x13a   : > { %2575 = vmatprep.mubr.bf16.mxu0 %v5420_v1  ;;  %2707 = vmatprep.mubr.bf16.mxu1 %v5420_v1  ;;  %v3324_v62 = vpop.permute.xlu0 %3323 }
 0x13b   : > { %4857 = vmatprep.subr.msk.bf16.mxu0 %vm438_vm2, %v2800_v33  ;;  %5204 = vmatprep.subr.msk.bf16.mxu1 %vm438_vm2, %v2801_v34  ;;  %v3328_v5 = vsel %vm563_vm3, %v3322_v61, %v3324_v62  ;;  %v3329_v26 = vsel %vm563_vm3, %v3324_v62, %v3326_v15 }
 0x13c   : > { %v3343_v47 = vsel %vm438_vm2, %v3329_v26, 0 }
 0x13e   : > { %v6044_v11 = vpop.permute.xlu0 %3452 }
 0x140   : > { %4845 = vmatmul.mubr.msk.bf16.gmra.mxu0 %vm431_vm0, %v5291_v27  ;;  %4851 = vmatmul.mubr.msk.bf16.vlgmr.msra.gmra.mxu1 %vm431_vm0, %v5292_v35  ;;  %v6057_v27 = vpop.permute.xlu1 %3454 }
 0x141   : > { %5123 = vmatpush3.bf16.msra.mxu1 %v2815_v38  ;;  %2717 = vmatprep.mubr.bf16.mxu1 %v5420_v1  ;;  %v3327_v38 = vsel %vm563_vm3, %v6024_v52, %v3322_v61  ;;  %v3460_v15 = vsel %vm697_vm4, %v6044_v11, %v6057_v27 }
 0x142   : > { %5118 = vmatprep.mubr.msk.bf16.mxu0 %vm431_vm0, %v5292_v35  ;;  %4864 = vmatprep.subr.msk.bf16.mxu1 %vm438_vm2, %v2942_v39  ;;  %v3457_v28 = vpop.permute.xlu0 %3456 }
 0x143   : > { %v3461_v51 = vsel %vm697_vm4, %v6057_v27, %v3457_v28 }
 0x144   : > { %v3459_v42 = vpop.permute.xlu1 %3458 }
 0x145   : > { %v3462_v52 = vsel %vm697_vm4, %v3457_v28, %v3459_v42  ;;  %v5302_v28 = vld [vmem:[%s6498_s3 + $0xf0] sm:$0xff]   ;;  %v5303_v42 = vld [vmem:[%s6498_s3 + $0xf8] ss:$0 sps:$4 sm:$0xff]  }
 0x148   : > { %4852 = vmatmul.mubr.msk.bf16.gmra.mxu1 %vm431_vm0, %v5293_v43  ;;  %5119 = vmatmul.mubr.msk.bf16.vlgmr.msra.gmra.mxu0 %vm431_vm0, %v5293_v43  ;;  %v6069_v43 = vpop.permute.xlu0 %3594 }
 0x149   : > { %2832 = vmatpush1.bf16.msra.mxu0 %v2809_v44  ;;  %2849 = vmatprep.mubr.bf16.mxu0 %v5420_v1  ;;  %v3337_v44 = vsel %vm438_vm2, %v3327_v38, 0 }
 0x14a   : > { %5124 = vmatprep.mubr.msk.bf16.mxu1 %vm431_vm0, %v5294_v45  ;;  %5205 = vmatprep.subr.msk.bf16.mxu0 %vm438_vm2, %v2943_v46 }
 0x150   : > { %v482_v55 = vpop.f32.mrf.mxu0  ;;  %v5030_v56 = vpop.f32.mrf.mxu1  ;;  %4858 = vmatmul.mubr.msk.bf16.vlgmr.msra.gmra.mxu0 %vm431_vm0, %v5294_v45  ;;  %5125 = vmatmul.mubr.msk.bf16.vlgmr.msra.gmra.mxu1 %vm431_vm0, %v5295_v50 }
 0x151   : > { %2974 = vmatpush1.bf16.msra.mxu1 %v2951_v53  ;;  %5129 = vmatpush3.bf16.msra.mxu0 %v2957_v54 }
 0x152   : > { %v533_v59 = vpop.f32.mrf.mxu1  ;;  %v484_v60 = vpop.f32.mrf.mxu0  ;;  %2859 = vmatprep.mubr.bf16.mxu0 %v5420_v1  ;;  %2991 = vmatprep.mubr.bf16.mxu1 %v5420_v1 }
 0x153   : > { %4875 = vmatprep.subr.msk.bf16.mxu0 %vm438_vm2, %v3195_v57  ;;  %5206 = vmatprep.subr.msk.bf16.mxu1 %vm438_vm2, %v3196_v58 }
 0x154   : > { %v486_v63 = vpop.f32.mrf.mxu0  ;;  %v5031_v22 = vpop.f32.mrf.mxu1 }
 0x156   : > { %v536_v2 = vpop.f32.mrf.mxu1  ;;  %v488_v3 = vpop.f32.mrf.mxu0 }
 0x158   : > { %v492_v6 = vpop.f32.mrf.mxu0  ;;  %v616_v7 = vpop.f32.mrf.mxu1  ;;  %4859 = vmatmul.mubr.msk.bf16.gmra.mxu0 %vm431_vm0, %v5295_v50  ;;  %4865 = vmatmul.mubr.msk.bf16.vlgmr.msra.gmra.mxu1 %vm431_vm0, %v5296_v0 }
 0x159   : > { %v617_v8 = vadd.f32 %v616_v7, %v482_v55  ;;  %5135 = vmatpush3.bf16.msra.mxu1 %v3210_v4  ;;  %3001 = vmatprep.mubr.bf16.mxu1 %v5420_v1 }
 0x15a   : > { %v494_v21 = vpop.f32.mrf.mxu0  ;;  %v618_v12 = vpop.f32.mrf.mxu1  ;;  %5130 = vmatprep.mubr.msk.bf16.mxu0 %vm431_vm0, %v5296_v0  ;;  %4882 = vmatprep.subr.msk.bf16.mxu1 %vm438_vm2, %v3328_v5 }
 0x15b   : > { %v619_v14 = vadd.f32 %v618_v12, %v484_v60  ;;  %v3599_v60 = vpop.permute.xlu0 %3598 }
 0x15c   : > { %v496_v16 = vpop.f32.mrf.mxu0  ;;  %v620_v17 = vpop.f32.mrf.mxu1 }
 0x15d   : > { %v621_v19 = vadd.f32 %v620_v17, %v486_v63  ;;  %v5300_v63 = vld [vmem:[%s6498_s3 + $0xd8] sm:$0xff]  }
 0x15e   : > { %v497_v20 = vpop.f32.mrf.mxu0  ;;  %v622_v23 = vpop.f32.mrf.mxu1 }
 0x15f   : > { %v623_v25 = vadd.f32 %v622_v23, %v488_v3  ;;  %v3476_v3 = vsel %vm438_vm2, %v3462_v52, 0  ;;  %v5301_v20 = vld [vmem:[%s6498_s3 + $0xe0] ss:$0 sps:$4 sm:$0xff]  }
 0x160   : > { %v626_v9 = vpop.f32.mrf.mxu1  ;;  %v5036_v31 = vpop.f32.mrf.mxu0  ;;  %4866 = vmatmul.mubr.msk.bf16.gmra.mxu1 %vm431_vm0, %v5297_v18  ;;  %5131 = vmatmul.mubr.msk.bf16.vlgmr.msra.gmra.mxu0 %vm431_vm0, %v5297_v18 }
 0x161   : > { %v627_v32 = vadd.f32 %v626_v9, %v492_v6  ;;  %v676_v33 = vadd.f32 %v5036_v31, %v5030_v56  ;;  %3227 = vmatpush1.bf16.msra.mxu0 %v3204_v10  ;;  %3244 = vmatprep.mubr.bf16.mxu0 %v5420_v1 }
 0x162   : > { %v628_v34 = vpop.f32.mrf.mxu1  ;;  %v667_v35 = vpop.f32.mrf.mxu0  ;;  %5136 = vmatprep.mubr.msk.bf16.mxu1 %vm431_vm0, %v5298_v24  ;;  %5207 = vmatprep.subr.msk.bf16.mxu0 %vm438_vm2, %v3329_v26 }
 0x163   : > { %v629_v36 = vadd.f32 %v628_v34, %v494_v21  ;;  %v668_v37 = vadd.f32 %v667_v35, %v533_v59  ;;  %v3597_v59 = vpop.permute.xlu1 %3596  ;;  %v6106_v34 = vpop.permute.xlu0 %3887 }
 0x164   : > { %v630_v39 = vpop.f32.mrf.mxu1  ;;  %v5037_v40 = vpop.f32.mrf.mxu0  ;;  %v3603_v6 = vsel %vm840_vm5, %v3597_v59, %v3599_v60 }
 0x165   : > { %v3602_v39 = vsel %vm840_vm5, %v6069_v43, %v3597_v59 }
 0x166   : > { %v631_v45 = vpop.f32.mrf.mxu1  ;;  %v670_v46 = vpop.f32.mrf.mxu0 }
 0x167   : > { %v671_v48 = vadd.f32 %v670_v46, %v536_v2  ;;  %v3601_v18 = vpop.permute.xlu1 %3600  ;;  %v3612_v45 = vsel %vm438_vm2, %v3602_v39, 0 }
 0x168   : > { %v750_v49 = vpop.f32.mrf.mxu0  ;;  %v5042_v50 = vpop.f32.mrf.mxu1  ;;  %4876 = vmatmul.mubr.msk.bf16.vlgmr.msra.gmra.mxu0 %vm431_vm0, %v5298_v24  ;;  %5137 = vmatmul.mubr.msk.bf16.vlgmr.msra.gmra.mxu1 %vm431_vm0, %v5299_v41  ;;  %v3470_v24 = vsel %vm438_vm2, %v3460_v15, 0  ;;  %v3604_v11 = vsel %vm840_vm5, %v3599_v60, %v3601_v18 }
 0x169   : > { %v815_v53 = vadd.f32 %v750_v49, %v617_v8  ;;  %v823_v54 = vadd.f32 %v5042_v50, %v676_v33  ;;  %3360 = vmatpush1.bf16.msra.mxu1 %v3337_v44  ;;  %5141 = vmatpush3.bf16.msra.mxu0 %v3343_v47  ;;  %v6116_v44 = vld [vmem:[%s5598_s16 + $0xc] sm:$0xf] }
 0x16a   : > { %v752_v55 = vpop.f32.mrf.mxu0  ;;  %v801_v56 = vpop.f32.mrf.mxu1  ;;  %3254 = vmatprep.mubr.bf16.mxu0 %v5420_v1  ;;  %3377 = vmatprep.mubr.bf16.mxu1 %v5420_v1  ;;  %v4905_v50 = vcombine.low %v6116_v44, %v6116_v44 }
 0x16b   : > { %v816_v57 = vadd.f32 %v752_v55, %v619_v14  ;;  %v817_v58 = vadd.f32 %v801_v56, %v668_v37  ;;  %4889 = vmatprep.subr.msk.bf16.mxu0 %vm438_vm2, %v3461_v51  ;;  %5208 = vmatprep.subr.msk.bf16.mxu1 %vm438_vm2, %v3462_v52  ;;  %v3892_v51 = vpop.permute.xlu0 %3891 }
 0x16c   : > { %v754_v61 = vpop.f32.mrf.mxu0  ;;  %v5043_v62 = vpop.f32.mrf.mxu1 }
 0x16d   : > { %v818_v22 = vadd.f32 %v754_v61, %v621_v19  ;;  %v5304_v61 = vld [vmem:[%s6498_s3 + $0xfc] sm:$0xff]  }
 0x16e   : > { %v756_v0 = vpop.f32.mrf.mxu0  ;;  %v804_v2 = vpop.f32.mrf.mxu1 }
 0x16f   : > { %v819_v4 = vadd.f32 %v756_v0, %v623_v25  ;;  %v820_v5 = vadd.f32 %v804_v2, %v671_v48  ;;  %v3618_v48 = vsel %vm438_vm2, %v3604_v11, 0 }
 0x170   : > { %v760_v7 = vpop.f32.mrf.mxu0  ;;  %v893_v8 = vpop.f32.mrf.mxu1  ;;  %4877 = vmatmul.mubr.msk.bf16.gmra.mxu0 %vm431_vm0, %v5299_v41  ;;  %4883 = vmatmul.mubr.msk.bf16.vlgmr.msra.gmra.mxu1 %vm431_vm0, %v5300_v63 }
 0x171   : > { %v821_v21 = vadd.f32 %v760_v7, %v627_v32  ;;  %v958_v12 = vadd.f32 %v893_v8, %v815_v53  ;;  %5147 = vmatpush3.bf16.msra.mxu1 %v3476_v3  ;;  %3387 = vmatprep.mubr.bf16.mxu1 %v5420_v1  ;;  %v3757_v3 = vsel %vm438_vm2, %v4905_v50, 0 }
 0x172   : > { %v762_v13 = vpop.f32.mrf.mxu0  ;;  %v895_v14 = vpop.f32.mrf.mxu1  ;;  %5142 = vmatprep.mubr.msk.bf16.mxu0 %vm431_vm0, %v5300_v63  ;;  %4896 = vmatprep.subr.msk.bf16.mxu1 %vm438_vm2, %v3603_v6 }
 0x173   : > { %v822_v16 = vadd.f32 %v762_v13, %v629_v36  ;;  %v959_v17 = vadd.f32 %v895_v14, %v816_v57  ;;  %v3890_v63 = vpop.permute.xlu1 %3889 }
 0x174   : > { %v764_v19 = vpop.f32.mrf.mxu0  ;;  %v897_v10 = vpop.f32.mrf.mxu1  ;;  %v3896_v6 = vsel %vm1134_vm6, %v3890_v63, %v3892_v51 }
 0x175   : > { %v961_v23 = vadd.f32 %v897_v10, %v818_v22  ;;  %v6132_v22 = vpop.permute.xlu0 %4029  ;;  %v5306_v10 = vld [vmem:[%s6498_s3 + $0x104] ss:$0 sps:$4 sm:$0xff]  }
 0x176   : > { %v765_v25 = vpop.f32.mrf.mxu0  ;;  %v899_v26 = vpop.f32.mrf.mxu1 }
 0x177   : > { %v962_v9 = vadd.f32 %v899_v26, %v819_v4  ;;  %v3894_v14 = vpop.permute.xlu1 %3893  ;;  %v3751_v25 = vsel %vm438_vm2, %v5724_v30, 0  ;;  %v5307_v26 = vld [vmem:[%s6498_s3 + $0x108] sm:$0xff]  }
 0x178   : > { %v903_v27 = vpop.f32.mrf.mxu1  ;;  %v5048_v31 = vpop.f32.mrf.mxu0  ;;  %4884 = vmatmul.mubr.msk.bf16.gmra.mxu1 %vm431_vm0, %v5301_v20  ;;  %5143 = vmatmul.mubr.msk.bf16.vlgmr.msra.gmra.mxu0 %vm431_vm0, %v5301_v20 }
 0x179   : > { %v964_v32 = vadd.f32 %v903_v27, %v821_v21  ;;  %v966_v33 = vadd.f32 %v5048_v31, %v823_v54  ;;  %3493 = vmatpush1.bf16.msra.mxu0 %v3470_v24  ;;  %3510 = vmatprep.mubr.bf16.mxu0 %v5420_v1  ;;  %v4718_v31 = vld [vmem:[%s6499_s4 + $0x30] sm:$0xff] }
 0x17a   : > { %v905_v35 = vpop.f32.mrf.mxu1  ;;  %v944_v36 = vpop.f32.mrf.mxu0  ;;  %5148 = vmatprep.mubr.msk.bf16.mxu1 %vm431_vm0, %v5302_v28  ;;  %5209 = vmatprep.subr.msk.bf16.mxu0 %vm438_vm2, %v3604_v11 }
 0x17b   : > { %v965_v37 = vadd.f32 %v905_v35, %v822_v16  ;;  %v960_v38 = vadd.f32 %v944_v36, %v817_v58  ;;  %4449 = vperm.xlu1 %5235, %v4718_v31  }
 0x17c   : > { %v907_v40 = vpop.f32.mrf.mxu1  ;;  %v5049_v41 = vpop.f32.mrf.mxu0 }
 0x17e   : > { %v908_v46 = vpop.f32.mrf.mxu1  ;;  %v947_v47 = vpop.f32.mrf.mxu0 }
 0x17f   : > { %v963_v49 = vadd.f32 %v947_v47, %v820_v5 }
 0x180   : > { %v1032_v43 = vpop.f32.mrf.mxu0  ;;  %v5054_v52 = vpop.f32.mrf.mxu1  ;;  %4890 = vmatmul.mubr.msk.bf16.vlgmr.msra.gmra.mxu0 %vm431_vm0, %v5302_v28  ;;  %5149 = vmatmul.mubr.msk.bf16.vlgmr.msra.gmra.mxu1 %vm431_vm0, %v5303_v42 }
 0x181   : > { %v1097_v53 = vadd.f32 %v1032_v43, %v958_v12  ;;  %v1105_v54 = vadd.f32 %v5054_v52, %v966_v33  ;;  %3635 = vmatpush1.bf16.msra.mxu1 %v3612_v45  ;;  %5153 = vmatpush3.bf16.msra.mxu0 %v3618_v48  ;;  %v5308_v45 = vld [vmem:[%s6498_s3 + $0x110] ss:$0 sps:$4 sm:$0xff]  }
 0x182   : > { %v1034_v55 = vpop.f32.mrf.mxu0  ;;  %v1083_v56 = vpop.f32.mrf.mxu1  ;;  %3520 = vmatprep.mubr.bf16.mxu0 %v5420_v1  ;;  %3652 = vmatprep.mubr.bf16.mxu1 %v5420_v1 }
 0x183   : > { %v1098_v57 = vadd.f32 %v1034_v55, %v959_v17  ;;  %v1099_v58 = vadd.f32 %v1083_v56, %v960_v38  ;;  %5210 = vmatprep.subr.msk.bf16.mxu1 %vm438_vm2, %v4905_v50  ;;  %4906 = vmatprep.subr.msk.bf16.mxu0 %vm438_vm2, %v5720_v29  ;;  %v4034_v17 = vpop.permute.xlu0 %4033  ;;  %v3895_v38 = vsel %vm1134_vm6, %v6106_v34, %v3890_v63  ;;  %v5309_v63 = vld [vmem:[%s6498_s3 + $0x114] sm:$0xff]  }
 0x184   : > { %v1036_v59 = vpop.f32.mrf.mxu0  ;;  %v5055_v60 = vpop.f32.mrf.mxu1  ;;  %v3905_v46 = vsel %vm438_vm2, %v3895_v38, 0 }
 0x185   : > { %v1100_v62 = vadd.f32 %v1036_v59, %v961_v23 }
 0x186   : > { %v1038_v0 = vpop.f32.mrf.mxu0  ;;  %v1086_v2 = vpop.f32.mrf.mxu1 }
 0x187   : > { %v1101_v4 = vadd.f32 %v1038_v0, %v962_v9  ;;  %v1102_v5 = vadd.f32 %v1086_v2, %v963_v49  ;;  %v3897_v9 = vsel %vm1134_vm6, %v3892_v51, %v3894_v14  ;;  %v6158_v35 = vpop.permute.xlu0 %4171 }
 0x188   : > { %v1042_v7 = vpop.f32.mrf.mxu0  ;;  %v1187_v29 = vpop.f32.mrf.mxu1  ;;  %4891 = vmatmul.mubr.msk.bf16.gmra.mxu0 %vm431_vm0, %v5303_v42  ;;  %4897 = vmatmul.mubr.msk.bf16.vlgmr.msra.gmra.mxu1 %vm431_vm0, %v5304_v61  ;;  %v3911_v47 = vsel %vm438_vm2, %v3897_v9, 0 }
 0x189   : > { %v1103_v8 = vadd.f32 %v1042_v7, %v964_v32  ;;  %v1252_v21 = vadd.f32 %v1187_v29, %v1097_v53  ;;  %5159 = vmatpush3.bf16.msra.mxu1 %v3757_v3  ;;  %3662 = vmatprep.mubr.bf16.mxu1 %v5420_v1  ;;  %v6155_v32 = vpop.permute.xlu1 %4031 }
 0x18a   : > { %v1044_v12 = vpop.f32.mrf.mxu0  ;;  %v1189_v13 = vpop.f32.mrf.mxu1  ;;  %5154 = vmatprep.mubr.msk.bf16.mxu0 %vm431_vm0, %v5304_v61  ;;  %4917 = vmatprep.subr.msk.bf16.mxu1 %vm438_vm2, %v3896_v6  ;;  %v4038_v53 = vsel %vm1277_vm7, %v6155_v32, %v4034_v17 }
 0x18b   : > { %v1104_v15 = vadd.f32 %v1044_v12, %v965_v37  ;;  %v1253_v16 = vadd.f32 %v1189_v13, %v1098_v57  ;;  %v4176_v43 = vpop.permute.xlu0 %4175 }
 0x18c   : > { %v1046_v18 = vpop.f32.mrf.mxu0  ;;  %v1191_v19 = vpop.f32.mrf.mxu1 }
 0x18d   : > { %v1255_v20 = vadd.f32 %v1191_v19, %v1100_v62  ;;  %v4036_v50 = vpop.permute.xlu1 %4035 }
 0x18e   : > { %v1047_v23 = vpop.f32.mrf.mxu0  ;;  %v1193_v24 = vpop.f32.mrf.mxu1 }
 0x18f   : > { %v1256_v28 = vadd.f32 %v1193_v24, %v1101_v4  ;;  %v6181_v3 = vpop.permute.xlu0 %4313 }
 0x190   : > { %v1197_v11 = vpop.f32.mrf.mxu1  ;;  %v5060_v27 = vpop.f32.mrf.mxu0  ;;  %4898 = vmatmul.mubr.msk.bf16.gmra.mxu1 %vm431_vm0, %v5306_v10  ;;  %5155 = vmatmul.mubr.msk.bf16.vlgmr.msra.gmra.mxu0 %vm431_vm0, %v5306_v10 }
 0x191   : > { %v1258_v30 = vadd.f32 %v1197_v11, %v1103_v8  ;;  %v1260_v33 = vadd.f32 %v5060_v27, %v1105_v54  ;;  %3774 = vmatpush1.bf16.msra.mxu0 %v3751_v25  ;;  %3791 = vmatprep.mubr.bf16.mxu0 %v5420_v1  ;;  %v4039_v54 = vsel %vm1277_vm7, %v4034_v17, %v4036_v50  ;;  %v4174_v0 = vpop.permute.xlu1 %4173  ;;  %v5310_v25 = vld [vmem:[%s6498_s3 + $0x11c] ss:$0 sps:$4 sm:$0xff]   ;;  %v5311_v27 = vld [vmem:[%s6498_s3 + $0x120] sm:$0xff]  }
 0x192   : > { %v1199_v36 = vpop.f32.mrf.mxu1  ;;  %v1238_v37 = vpop.f32.mrf.mxu0  ;;  %5160 = vmatprep.mubr.msk.bf16.mxu1 %vm431_vm0, %v5307_v26  ;;  %5211 = vmatprep.subr.msk.bf16.mxu0 %vm438_vm2, %v3897_v9  ;;  %v4053_v4 = vsel %vm438_vm2, %v4039_v54, 0  ;;  %v4180_v8 = vsel %vm1420_vm8, %v4174_v0, %v4176_v43  ;;  %v4037_v17 = vsel %vm1277_vm7, %v6132_v22, %v6155_v32 }
 0x193   : > { %v1259_v39 = vadd.f32 %v1199_v36, %v1104_v15  ;;  %v1254_v40 = vadd.f32 %v1238_v37, %v1099_v58 }
 0x194   : > { %v1201_v41 = vpop.f32.mrf.mxu1  ;;  %v5061_v42 = vpop.f32.mrf.mxu0 }
 0x195   : > { %v4178_v18 = vpop.permute.xlu1 %4177  ;;  %v4179_v41 = vsel %vm1420_vm8, %v6158_v35, %v4174_v0 }
 0x196   : > { %v1202_v48 = vpop.f32.mrf.mxu1  ;;  %v1241_v49 = vpop.f32.mrf.mxu0  ;;  %v4181_v22 = vsel %vm1420_vm8, %v4176_v43, %v4178_v18 }
 0x197   : > { %v1257_v51 = vadd.f32 %v1241_v49, %v1102_v5  ;;  %v5312_v48 = vld [vmem:[%s6498_s3 + $0x128] ss:$0 sps:$4 sm:$0xff]   ;;  %v4189_v49 = vsel %vm438_vm2, %v4179_v41, 0  ;;  %v4195_v50 = vsel %vm438_vm2, %v4181_v22, 0  ;;  %v5315_v41 = vld [vmem:[%s6498_s3 + $0x138] sm:$0xff]  }
 0x198   : > { %v1330_v52 = vpop.f32.mrf.mxu0  ;;  %v5066_v34 = vpop.f32.mrf.mxu1  ;;  %4907 = vmatmul.mubr.msk.bf16.vlgmr.msra.gmra.mxu0 %vm431_vm0, %v5307_v26  ;;  %5161 = vmatmul.mubr.msk.bf16.vlgmr.msra.gmra.mxu1 %vm431_vm0, %v5308_v45 }
 0x199   : > { %v1395_v55 = vadd.f32 %v1330_v52, %v1252_v21  ;;  %v1403_v56 = vadd.f32 %v5066_v34, %v1260_v33  ;;  %3928 = vmatpush1.bf16.msra.mxu1 %v3905_v46  ;;  %5165 = vmatpush3.bf16.msra.mxu0 %v3911_v47  ;;  %v6203_v33 = vpop.permute.xlu1 %4315 }
 0x19a   : > { %v1332_v57 = vpop.f32.mrf.mxu0  ;;  %v1381_v58 = vpop.f32.mrf.mxu1  ;;  %3801 = vmatprep.mubr.bf16.mxu0 %v5420_v1  ;;  %3945 = vmatprep.mubr.bf16.mxu1 %v5420_v1 }
 0x19b   : > { %v1396_v59 = vadd.f32 %v1332_v57, %v1253_v16  ;;  %v1397_v60 = vadd.f32 %v1381_v58, %v1254_v40  ;;  %4924 = vmatprep.subr.msk.bf16.mxu0 %vm438_vm2, %v4038_v53  ;;  %5212 = vmatprep.subr.msk.bf16.mxu1 %vm438_vm2, %v4039_v54 }
 0x19c   : > { %v1334_v61 = vpop.f32.mrf.mxu0  ;;  %v5067_v62 = vpop.f32.mrf.mxu1 }
 0x19d   : > { %v1398_v2 = vadd.f32 %v1334_v61, %v1255_v20  ;;  %v4318_v20 = vpop.permute.xlu0 %4317  ;;  %v4320_v52 = vpop.permute.xlu1 %4319 }
 0x19e   : > { %v1336_v5 = vpop.f32.mrf.mxu0  ;;  %v1384_v6 = vpop.f32.mrf.mxu1  ;;  %v4322_v35 = vsel %vm1563_vm9, %v6203_v33, %v4318_v20 }
 0x19f   : > { %v1399_v7 = vadd.f32 %v1336_v5, %v1256_v28  ;;  %v1400_v29 = vadd.f32 %v1384_v6, %v1257_v51  ;;  %v4047_v28 = vsel %vm438_vm2, %v4037_v17, 0 }
 0x1a0   : > { %v1340_v21 = vpop.f32.mrf.mxu0  ;;  %v1473_v12 = vpop.f32.mrf.mxu1  ;;  %4908 = vmatmul.mubr.msk.bf16.gmra.mxu0 %vm431_vm0, %v5308_v45  ;;  %4918 = vmatmul.mubr.msk.bf16.vlgmr.msra.gmra.mxu1 %vm431_vm0, %v5309_v63 }
 0x1a1   : > { %v1401_v13 = vadd.f32 %v1340_v21, %v1258_v30  ;;  %v1538_v14 = vadd.f32 %v1473_v12, %v1395_v55  ;;  %5171 = vmatpush3.bf16.msra.mxu1 %v4053_v4  ;;  %3955 = vmatprep.mubr.bf16.mxu1 %v5420_v1  ;;  %v1698_v38 = vpop.permute.xlu0 %1697  ;;  %v5313_v4 = vld [vmem:[%s6498_s3 + $0x12c] sm:$0xff]  }
 0x1a2   : > { %v1342_v15 = vpop.f32.mrf.mxu0  ;;  %v1475_v16 = vpop.f32.mrf.mxu1  ;;  %5166 = vmatprep.mubr.msk.bf16.mxu0 %vm431_vm0, %v5309_v63  ;;  %4931 = vmatprep.subr.msk.bf16.mxu1 %vm438_vm2, %v4180_v8 }
 0x1a3   : > { %v1402_v19 = vadd.f32 %v1342_v15, %v1259_v39  ;;  %v1539_v10 = vadd.f32 %v1475_v16, %v1396_v59 }
 0x1a4   : > { %v1344_v23 = vpop.f32.mrf.mxu0  ;;  %v1477_v24 = vpop.f32.mrf.mxu1 }
 0x1a5   : > { %v1541_v26 = vadd.f32 %v1477_v24, %v1398_v2  ;;  %v1703_v53 = vpop.permute.xlu0 %1702 }
 0x1a6   : > { %v1345_v9 = vpop.f32.mrf.mxu0  ;;  %v1479_v11 = vpop.f32.mrf.mxu1 }
 0x1a7   : > { %v1542_v31 = vadd.f32 %v1479_v11, %v1399_v7 }
 0x1a8   : > { %v1483_v32 = vpop.f32.mrf.mxu1  ;;  %v5072_v30 = vpop.f32.mrf.mxu0  ;;  %4919 = vmatmul.mubr.msk.bf16.gmra.mxu1 %vm431_vm0, %v5310_v25  ;;  %5167 = vmatmul.mubr.msk.bf16.vlgmr.msra.gmra.mxu0 %vm431_vm0, %v5310_v25 }
 0x1a9   : > { %v6205_v36 = vadd.f32 %v1483_v32, %v1401_v13  ;;  %v1546_v37 = vadd.f32 %v5072_v30, %v1403_v56  ;;  %4070 = vmatpush1.bf16.msra.mxu0 %v4047_v28  ;;  %4087 = vmatprep.mubr.bf16.mxu0 %v5420_v1  ;;  %v4323_v56 = vsel %vm1563_vm9, %v4318_v20, %v4320_v52  ;;  %v5314_v32 = vld [vmem:[%s6498_s3 + $0x134] ss:$0 sps:$4 sm:$0xff]  }
 0x1aa   : > { %v1485_v39 = vpop.f32.mrf.mxu1  ;;  %v1524_v40 = vpop.f32.mrf.mxu0  ;;  %5172 = vmatprep.mubr.msk.bf16.mxu1 %vm431_vm0, %v5311_v27  ;;  %5213 = vmatprep.subr.msk.bf16.mxu0 %vm438_vm2, %v4181_v22  ;;  %v4337_v7 = vsel %vm438_vm2, %v4323_v56, 0  ;;  %v4321_v20 = vsel %vm1563_vm9, %v6181_v3, %v6203_v33 }
 0x1ab   : > { %v6212_v42 = vadd.f32 %v1485_v39, %v1402_v19  ;;  %v1540_v45 = vadd.f32 %v1524_v40, %v1397_v60 }
 0x1ac   : > { %v1487_v46 = vpop.f32.mrf.mxu1  ;;  %v5073_v47 = vpop.f32.mrf.mxu0 }
 0x1ae   : > { %v1488_v51 = vpop.f32.mrf.mxu1  ;;  %v1527_v43 = vpop.f32.mrf.mxu0 }
 0x1af   : > { %v1543_v34 = vadd.f32 %v1527_v43, %v1400_v29 }
 0x1b0   : > { %v1616_v54 = vpop.f32.mrf.mxu0  ;;  %v5078_v55 = vpop.f32.mrf.mxu1  ;;  %4925 = vmatmul.mubr.msk.bf16.vlgmr.msra.gmra.mxu0 %vm431_vm0, %v5311_v27  ;;  %5173 = vmatmul.mubr.msk.bf16.vlgmr.msra.gmra.mxu1 %vm431_vm0, %v5312_v48 }
 0x1b1   : > { %v6224_v57 = vadd.f32 %v1616_v54, %v1538_v14  ;;  %v1689_v58 = vadd.f32 %v5078_v55, %v1546_v37  ;;  %4212 = vmatpush1.bf16.msra.mxu1 %v4189_v49  ;;  %5177 = vmatpush3.bf16.msra.mxu0 %v4195_v50  ;;  %v5316_v54 = vld [vmem:[%s6498_s3 + $0x140] ss:$0 sps:$4 sm:$0xff]  }
 0x1b2   : > { %v1618_v59 = vpop.f32.mrf.mxu0  ;;  %v1667_v60 = vpop.f32.mrf.mxu1  ;;  %4097 = vmatprep.mubr.bf16.mxu0 %v5420_v1  ;;  %4229 = vmatprep.mubr.bf16.mxu1 %v5420_v1 }
 0x1b3   : > { %v1713_v61 = vadd.f32 %v1703_v53, %v1689_v58  ;;  %v6228_v62 = vadd.f32 %v1618_v59, %v1539_v10  ;;  %v6230_v63 = vadd.f32 %v1667_v60, %v1540_v45  ;;  %4938 = vmatprep.subr.msk.bf16.mxu0 %vm438_vm2, %v4322_v35  ;;  %5214 = vmatprep.subr.msk.bf16.mxu1 %vm438_vm2, %v4323_v56  ;;  %v6263_v58 = vpop.permute.xlu1 %3074 }
 0x1b4   : > { %v1620_v0 = vpop.f32.mrf.mxu0  ;;  %v5079_v2 = vpop.f32.mrf.mxu1 }
 0x1b5   : > { %v1734_v5 = vadd.f32 1.0, %v1713_v61  ;;  %v1684_v6 = vadd.f32 %v1620_v0, %v1541_v26 }
 0x1b6   : > { %v1622_v29 = vpop.f32.mrf.mxu0  ;;  %v1670_v8 = vpop.f32.mrf.mxu1 }
 0x1b7   : > { %v1737_v21 = vsub.f32 0.0, %v1734_v5  ;;  %v1708_v12 = vadd.f32 %v1698_v38, %v1684_v6  ;;  %v1685_v13 = vadd.f32 %v1622_v29, %v1542_v31  ;;  %v1686_v14 = vadd.f32 %v1670_v8, %v1543_v34 }
 0x1b8   : > { %v1626_v15 = vpop.f32.mrf.mxu0  ;;  %v6238_v16 = vpop.f32.mrf.mxu1  ;;  %4926 = vmatmul.mubr.msk.bf16.gmra.mxu0 %vm431_vm0, %v5312_v48  ;;  %4932 = vmatmul.mubr.msk.bf16.vlgmr.msra.gmra.mxu1 %vm431_vm0, %v5313_v4 }
 0x1b9   : > { %v1742_v17 = vmul.f32 1.442695, %v1737_v21  ;;  %v1714_v18 = vadd.f32 1.0, %v1708_v12  ;;  %v1709_v19 = vadd.f32 %v1698_v38, %v1685_v13  ;;  %v1710_v10 = vadd.f32 %v1698_v38, %v1686_v14  ;;  %5183 = vmatpush3.bf16.msra.mxu1 %v4337_v7  ;;  %4239 = vmatprep.mubr.bf16.mxu1 %v5420_v1  ;;  %v6269_v13 = vpop.permute.xlu1 %4454 }
 0x1ba   : > { %v1687_v23 = vadd.f32 %v1626_v15, %v6205_v36  ;;  %v1628_v24 = vpop.f32.mrf.mxu0  ;;  %v1868_v25 = vpop.f32.mrf.mxu1  ;;  %5178 = vmatprep.mubr.msk.bf16.mxu0 %vm431_vm0, %v5313_v4  ;;  %v4331_v36 = vsel %vm438_vm2, %v4321_v20, 0 }
 0x1bb   : > { %5317 = vpow2.f32 %v1742_v17  ;;  %v1717_v26 = vsub.f32 0.0, %v1714_v18  ;;  %v1715_v28 = vadd.f32 1.0, %v1709_v19  ;;  %v1716_v9 = vadd.f32 1.0, %v1710_v10 }
 0x1bc   : > { %v1711_v11 = vadd.f32 %v1703_v53, %v1687_v23  ;;  %v1688_v27 = vadd.f32 %v1628_v24, %v6212_v42  ;;  %v1630_v22 = vpop.f32.mrf.mxu0  ;;  %v1870_v31 = vpop.f32.mrf.mxu1 }
 0x1bd   : > { %v1720_v3 = vmul.f32 1.442695, %v1717_v26  ;;  %v1718_v30 = vsub.f32 0.0, %v1715_v28  ;;  %v1719_v33 = vsub.f32 0.0, %v1716_v9 }
 0x1be   : > { %v1732_v37 = vadd.f32 1.0, %v1711_v11  ;;  %v1712_v38 = vadd.f32 %v1703_v53, %v1688_v27  ;;  %v1631_v39 = vpop.f32.mrf.mxu0  ;;  %v1872_v40 = vpop.f32.mrf.mxu1 }
 0x1bf   : > { %5319 = vpow2.f32 %v1720_v3  ;;  %v1722_v42 = vmul.f32 1.442695, %v1718_v30  ;;  %v1724_v45 = vmul.f32 1.442695, %v1719_v33 }
 0x1c0   : > { %v1735_v46 = vsub.f32 0.0, %v1732_v37  ;;  %v1733_v47 = vadd.f32 1.0, %v1712_v38  ;;  %v1876_v48 = vpop.f32.mrf.mxu1  ;;  %v5084_v49 = vpop.f32.mrf.mxu0  ;;  %4933 = vmatmul.mubr.msk.bf16.gmra.mxu1 %vm431_vm0, %v5314_v32  ;;  %5179 = vmatmul.mubr.msk.bf16.vlgmr.msra.gmra.mxu0 %vm431_vm0, %v5314_v32 }
 0x1c1   : > { %5321 = vpow2.f32 %v1722_v42  ;;  %4354 = vmatpush1.bf16.msra.mxu0 %v4331_v36  ;;  %4371 = vmatprep.mubr.bf16.mxu0 %v5420_v1  ;;  %v6276_v32 = vpop.permute.xlu1 %3079 }
 0x1c2   : > { %5323 = vpow2.f32 %v1724_v45  ;;  %v1738_v50 = vmul.f32 1.442695, %v1735_v46  ;;  %v1736_v51 = vsub.f32 0.0, %v1733_v47  ;;  %v1878_v43 = vpop.f32.mrf.mxu1  ;;  %v1917_v52 = vpop.f32.mrf.mxu0  ;;  %5184 = vmatprep.mubr.msk.bf16.mxu1 %vm431_vm0, %v5315_v41 }
 0x1c4   : > { %5325 = vpow2.f32 %v1738_v50  ;;  %v1740_v34 = vmul.f32 1.442695, %v1736_v51  ;;  %v1880_v53 = vpop.f32.mrf.mxu1  ;;  %v5085_v35 = vpop.f32.mrf.mxu0 }
 0x1c6   : > { %5327 = vpow2.f32 %v1740_v34  ;;  %v1881_v55 = vpop.f32.mrf.mxu1  ;;  %v1920_v56 = vpop.f32.mrf.mxu0 }
 0x1c8   : > { %v5318_v59 = vpop.eup %5317  ;;  %v1999_v60 = vpop.f32.mrf.mxu0  ;;  %4939 = vmatmul.mubr.msk.bf16.vlgmr.msra.gmra.mxu0 %vm431_vm0, %v5315_v41  ;;  %5185 = vmatmul.mubr.msk.bf16.vlgmr.msra.gmra.mxu1 %vm431_vm0, %v5316_v54  ;;  %v5407_v41 = vld [vmem:[%s5484_s25 + $0xc] sm:$0xf] }
 0x1c9   : > { %v5090_v61 = vpop.f32.mrf.mxu1  ;;  %v1746_v0 = vadd.f32 1.0, %v5318_v59  ;;  %v2000_v2 = vadd.f32 %v1999_v60, %v6238_v16  ;;  %4381 = vmatprep.mubr.bf16.mxu0 %v5420_v1  ;;  %v6283_v42 = vunpack.c.l.bf16 %v5407_v41 }
 0x1ca   : > { %v2059_v4 = vadd.f32 %v5090_v61, %v5084_v49  ;;  %v2001_v5 = vpop.f32.mrf.mxu0  ;;  %v1693_v49 = vpop.permute.xlu1 %1692 }
 0x1cb   : > { %v2050_v6 = vpop.f32.mrf.mxu1  ;;  %5329 = vrcp.f32 %v1746_v0  ;;  %v2002_v7 = vadd.f32 %v2001_v5, %v1868_v25  ;;  %v5410_v0 = vld [vmem:[%s5484_s25 + $0x4] sm:$0xff]  ;;  %s5216_s25 = smul.u32 24, %s6504_s19 }
 0x1cc   : > { %v2051_v29 = vadd.f32 %v2050_v6, %v1917_v52  ;;  %v5320_v8 = vpop.eup %5319  ;;  %v2003_v21 = vpop.f32.mrf.mxu0  ;;  %v5408_v52 = vld [vmem:[%s5534_s10 + $0x4] sm:$0xff] }
 0x1cd   : > { %v5091_v12 = vpop.f32.mrf.mxu1  ;;  %v1726_v14 = vadd.f32 1.0, %v5320_v8  ;;  %v2004_v15 = vadd.f32 %v2003_v21, %v1870_v31  ;;  %v6293_v34 = vunpack.c.l.bf16 %v5408_v52  ;;  %v6308_v5 = vunpack.c.h.bf16 %v5408_v52  ;;  %s264_s6 = scalar_lea.vmem %s6500_s5, %s5216_s25 }
 0x1ce   : > { %v5322_v17 = vpop.eup %5321  ;;  %v2005_v18 = vpop.f32.mrf.mxu0  ;;  %v1705_v21 = vadd.f32 %v1693_v49, %v6224_v57 }
 0x1cf   : > { %v2053_v19 = vpop.f32.mrf.mxu1  ;;  %v5324_v10 = vpop.eup %5323  ;;  %5331 = vrcp.f32 %v1726_v14  ;;  %v1727_v16 = vadd.f32 1.0, %v5322_v17  ;;  %v2006_v20 = vadd.f32 %v2005_v18, %v1872_v40  ;;  %v5411_v17 = vld [vmem:[%s5534_s10 + $0xc] sm:$0xf] }
 0x1d0   : > { %v6271_v1 = vadd.f32 %v2053_v19, %v1920_v56  ;;  %v1728_v23 = vadd.f32 1.0, %v5324_v10  ;;  %v2009_v24 = vpop.f32.mrf.mxu0  ;;  %4940 = vmatmul.mubr.msk.bf16.gmra.mxu0 %vm431_vm0, %v5316_v54  ;;  %v5409_v54 = vld [vmem:[%s5598_s16 + $0x4] sm:$0xff]  ;;  %v6314_v18 = vunpack.c.l.bf16 %v5411_v17  ;;  %v1706_v19 = vadd.f32 %v1693_v49, %v6228_v62 }
 0x1d1   : > { %v2132_v25 = vpop.f32.mrf.mxu1  ;;  %v5326_v26 = vpop.eup %5325  ;;  %5333 = vrcp.f32 %v1727_v16  ;;  %v2010_v28 = vadd.f32 %v2009_v24, %v1876_v48  ;;  %v6296_v55 = vunpack.c.l.bf16 %v5409_v54  ;;  %v6310_v8 = vunpack.c.h.bf16 %v5409_v54 }
 0x1d2   : > { %v6274_v9 = vadd.f32 %v2132_v25, %v2000_v2  ;;  %5335 = vrcp.f32 %v1728_v23  ;;  %v1744_v11 = vadd.f32 1.0, %v5326_v26  ;;  %v2011_v27 = vpop.f32.mrf.mxu0  ;;  %v6304_v2 = vunpack.c.l.bf16 %v5410_v0 }
 0x1d3   : > { %v2134_v22 = vpop.f32.mrf.mxu1  ;;  %v5328_v31 = vpop.eup %5327  ;;  %v2012_v3 = vadd.f32 %v2011_v27, %v1878_v43  ;;  %v1707_v10 = vadd.f32 %v1693_v49, %v6230_v63 }
 0x1d4   : > { %v6278_v30 = vadd.f32 %v2134_v22, %v2002_v7  ;;  %5337 = vrcp.f32 %v1744_v11  ;;  %v1745_v33 = vadd.f32 1.0, %v5328_v31  ;;  %v2013_v36 = vpop.f32.mrf.mxu0 }
 0x1d5   : > { %v2136_v37 = vpop.f32.mrf.mxu1 }
 0x1d6   : > { %v6280_v38 = vadd.f32 %v2136_v37, %v2004_v15  ;;  %5339 = vrcp.f32 %v1745_v33  ;;  %v2014_v39 = vpop.f32.mrf.mxu0 }
 0x1d7   : > { %v2138_v40 = vpop.f32.mrf.mxu1 }
 0x1d8   : > { %v6285_v45 = vadd.f32 %v2138_v40, %v2006_v20  ;;  %v6287_v46 = vpop.eup %5329  ;;  %v5096_v48 = vpop.f32.mrf.mxu0 }
 0x1d9   : > { %v2142_v47 = vpop.f32.mrf.mxu1  ;;  %v1779_v50 = vsub.f32 1.0, %v6287_v46  ;;  %v2205_v43 = vadd.f32 %v5096_v48, %v2059_v4  ;;  %v6306_v4 = vunpack.c.h.bf16 %v5410_v0 }
 0x1da   : > { %v6290_v51 = vadd.f32 %v2142_v47, %v2010_v28  ;;  %v2183_v35 = vpop.f32.mrf.mxu0 }
 0x1db   : > { %v2144_v53 = vpop.f32.mrf.mxu1  ;;  %v6299_v56 = vmul.f32 %v1779_v50, %v6283_v42  ;;  %v2199_v60 = vadd.f32 %v2183_v35, %v2051_v29  ;;  %v6317_v29 = vunpack.c.l.bf16 %v6116_v44 }
 0x1dc   : > { %v6301_v59 = vadd.f32 %v2144_v53, %v2012_v3  ;;  %v5332_v61 = vpop.eup %5331  ;;  %v5097_v7 = vpop.f32.mrf.mxu0 }
 0x1dd   : > { %v2146_v6 = vpop.f32.mrf.mxu1  ;;  %v1750_v12 = vmul.f32 0.5, %v5332_v61  ;;  %v1762_v14 = vsub.f32 1.0, %v5332_v61 }
 0x1de   : > { %v5334_v15 = vpop.eup %5333  ;;  %v2186_v20 = vpop.f32.mrf.mxu0 }
 0x1df   : > { %v2147_v16 = vpop.f32.mrf.mxu1  ;;  %v5336_v23 = vpop.eup %5335  ;;  %v1753_v24 = vmul.f32 %v1750_v12, %v6293_v34  ;;  %v1756_v57 = vmul.f32 %v1750_v12, %v6296_v55  ;;  %v1765_v25 = vmul.f32 %v1762_v14, %v1705_v21  ;;  %v1751_v26 = vmul.f32 0.5, %v5334_v15 }
 0x1e0   : > { %v1763_v28 = vsub.f32 1.0, %v5334_v15  ;;  %v1752_v11 = vmul.f32 0.5, %v5336_v23  ;;  %v1764_v27 = vsub.f32 1.0, %v5336_v23  ;;  %v2202_v22 = vadd.f32 %v2186_v20, %v6271_v1  ;;  %v2274_v44 = vpop.f32.mrf.mxu0 }
 0x1e1   : > { %v5102_v31 = vpop.f32.mrf.mxu1  ;;  %v5338_v3 = vpop.eup %5337  ;;  %v1759_v62 = vadd.f32 %v1756_v57, %v1753_v24  ;;  %v1754_v63 = vmul.f32 %v1751_v26, %v6308_v5  ;;  %v1757_v33 = vmul.f32 %v1751_v26, %v6310_v8  ;;  %v2339_v36 = vadd.f32 %v2274_v44, %v6274_v9 }
 0x1e2   : > { %v1766_v37 = vmul.f32 %v1763_v28, %v1706_v19  ;;  %v1755_v39 = vmul.f32 %v1752_v11, %v6314_v18  ;;  %v1758_v40 = vmul.f32 %v1752_v11, %v6317_v29  ;;  %v1767_v41 = vmul.f32 %v1764_v27, %v1707_v10  ;;  %v2276_v47 = vpop.f32.mrf.mxu0 }
 0x1e3   : > { %v2325_v48 = vpop.f32.mrf.mxu1  ;;  %v5340_v49 = vpop.eup %5339  ;;  %v1768_v1 = vadd.f32 %v1765_v25, %v1759_v62  ;;  %v1760_v50 = vadd.f32 %v1757_v33, %v1754_v63  ;;  %v1777_v52 = vsub.f32 1.0, %v5338_v3  ;;  %v2347_v53 = vadd.f32 %v5102_v31, %v2205_v43 }
 0x1e4   : > { %v1761_v35 = vadd.f32 %v1758_v40, %v1755_v39  ;;  %v1778_v54 = vsub.f32 1.0, %v5340_v49  ;;  %v2340_v61 = vadd.f32 %v2276_v47, %v6278_v30  ;;  %v2341_v0 = vadd.f32 %v2325_v48, %v2199_v60  ;;  %v2278_v6 = vpop.f32.mrf.mxu0 }
 0x1e5   : > { %v5103_v9 = vpop.f32.mrf.mxu1  ;;  %5341 = vtanh.f32 %v1768_v1  ;;  %v1769_v7 = vadd.f32 %v1766_v37, %v1760_v50  ;;  %v1780_v21 = vmul.f32 %v1777_v52, %v6304_v2  ;;  %v2342_v12 = vadd.f32 %v2278_v6, %v6280_v38 }
 0x1e6   : > { %v1770_v14 = vadd.f32 %v1767_v41, %v1761_v35  ;;  %v1781_v15 = vmul.f32 %v1778_v54, %v6306_v4  ;;  %v2280_v17 = vpop.f32.mrf.mxu0 }
 0x1e7   : > { %v2328_v19 = vpop.f32.mrf.mxu1  ;;  %5343 = vtanh.f32 %v1769_v7  ;;  %v2343_v43 = vadd.f32 %v2280_v17, %v6285_v45 }
 0x1e8   : > { %v2344_v10 = vadd.f32 %v2328_v19, %v2202_v22  ;;  %5345 = vtanh.f32 %v1770_v14  ;;  %v2284_v30 = vpop.f32.mrf.mxu0 }
 0x1e9   : > { %v2413_v60 = vpop.f32.mrf.mxu1  ;;  %v2345_v16 = vadd.f32 %v2284_v30, %v6290_v51 }
 0x1ea   : > { %v2478_v20 = vadd.f32 %v2413_v60, %v2339_v36  ;;  %v2286_v23 = vpop.f32.mrf.mxu0 }
 0x1eb   : > { %v2415_v24 = vpop.f32.mrf.mxu1  ;;  %v2346_v57 = vadd.f32 %v2286_v23, %v6301_v59 }
 0x1ec   : > { %v2479_v38 = vadd.f32 %v2415_v24, %v2340_v61  ;;  %v2288_v25 = vpop.f32.mrf.mxu0 }
 0x1ed   : > { %v2417_v26 = vpop.f32.mrf.mxu1 }
 0x1ee   : > { %v2481_v28 = vadd.f32 %v2417_v26, %v2342_v12  ;;  %v2289_v11 = vpop.f32.mrf.mxu0 }
 0x1ef   : > { %v2419_v27 = vpop.f32.mrf.mxu1 }
 0x1f0   : > { %v2482_v44 = vadd.f32 %v2419_v27, %v2343_v43  ;;  %v5108_v45 = vpop.f32.mrf.mxu0 }
 0x1f1   : > { %v2423_v31 = vpop.f32.mrf.mxu1  ;;  %v2486_v62 = vadd.f32 %v5108_v45, %v2347_v53 }
 0x1f2   : > { %v2484_v22 = vadd.f32 %v2423_v31, %v2345_v16  ;;  %v5342_v63 = vpop.eup %5341  ;;  %v2464_v37 = vpop.f32.mrf.mxu0 }
 0x1f3   : > { %v2425_v33 = vpop.f32.mrf.mxu1  ;;  %v1774_v51 = vmul.f32 %v5342_v63, %v5338_v3  ;;  %v2480_v39 = vadd.f32 %v2464_v37, %v2341_v0 }
 0x1f4   : > { %v2485_v36 = vadd.f32 %v2425_v33, %v2346_v57  ;;  %v5344_v40 = vpop.eup %5343  ;;  %v5109_v59 = vpop.f32.mrf.mxu0 }
 0x1f5   : > { %v2427_v41 = vpop.f32.mrf.mxu1  ;;  %v5346_v47 = vpop.eup %5345  ;;  %v6336_v48 = vadd.f32 %v1780_v21, %v1774_v51  ;;  %v1775_v1 = vmul.f32 %v5344_v40, %v5340_v49 }
 0x1f6   : > { %v1776_v50 = vmul.f32 %v5346_v47, %v6287_v46  ;;  %v2467_v35 = vpop.f32.mrf.mxu0 }
 0x1f7   : > { %v2428_v52 = vpop.f32.mrf.mxu1  ;;  %v6339_v54 = vadd.f32 %v1781_v15, %v1775_v1  ;;  %v2483_v53 = vadd.f32 %v2467_v35, %v2344_v10 }
 0x1f8   : > { %v6342_v61 = vadd.f32 %v6299_v56, %v1776_v50  ;;  %v2567_v3 = vpop.f32.mrf.mxu0 }
 0x1f9   : > { %v5114_v6 = vpop.f32.mrf.mxu1  ;;  %v2632_v0 = vadd.f32 %v2567_v3, %v2478_v20 }
 0x1fa   : > { %v2640_v9 = vadd.f32 %v5114_v6, %v2486_v62  ;;  %v2569_v7 = vpop.f32.mrf.mxu0 }
 0x1fb   : > { %v2618_v12 = vpop.f32.mrf.mxu1  ;;  %v2633_v14 = vadd.f32 %v2569_v7, %v2479_v38 }
 0x1fc   : > { %v2634_v21 = vadd.f32 %v2618_v12, %v2480_v39  ;;  %v2571_v17 = vpop.f32.mrf.mxu0 }
 0x1fd   : > { %v5115_v49 = vpop.f32.mrf.mxu1  ;;  %v2635_v19 = vadd.f32 %v2571_v17, %v2481_v28 }
 0x1fe   : > { %v2573_v46 = vpop.f32.mrf.mxu0 }
 0x1ff   : > { %v2621_v43 = vpop.f32.mrf.mxu1  ;;  %v2636_v30 = vadd.f32 %v2573_v46, %v2482_v44 }
 0x200   : > { %v2637_v15 = vadd.f32 %v2621_v43, %v2483_v53  ;;  %v2577_v60 = vpop.f32.mrf.mxu0 }
 0x201   : > { %v2709_v10 = vpop.f32.mrf.mxu1  ;;  %v2638_v16 = vadd.f32 %v2577_v60, %v2484_v22 }
 0x202   : > { %v2774_v56 = vadd.f32 %v2709_v10, %v2632_v0  ;;  %v2579_v23 = vpop.f32.mrf.mxu0 }
 0x203   : > { %v2711_v24 = vpop.f32.mrf.mxu1  ;;  %v2639_v57 = vadd.f32 %v2579_v23, %v2485_v36 }
 0x204   : > { %v2775_v20 = vadd.f32 %v2711_v24, %v2633_v14  ;;  %v2581_v25 = vpop.f32.mrf.mxu0 }
 0x205   : > { %v2713_v26 = vpop.f32.mrf.mxu1 }
 0x206   : > { %v2777_v11 = vadd.f32 %v2713_v26, %v2635_v19  ;;  %v2582_v38 = vpop.f32.mrf.mxu0 }
 0x207   : > { %v2715_v27 = vpop.f32.mrf.mxu1 }
 0x208   : > { %v2778_v31 = vadd.f32 %v2715_v27, %v2636_v30  ;;  %v5120_v28 = vpop.f32.mrf.mxu0 }
 0x209   : > { %v2719_v45 = vpop.f32.mrf.mxu1  ;;  %v2782_v63 = vadd.f32 %v5120_v28, %v2640_v9 }
 0x20a   : > { %v2780_v62 = vadd.f32 %v2719_v45, %v2638_v16  ;;  %v2760_v33 = vpop.f32.mrf.mxu0 }
 0x20b   : > { %v2721_v44 = vpop.f32.mrf.mxu1  ;;  %v2776_v51 = vadd.f32 %v2760_v33, %v2634_v21 }
 0x20c   : > { %v2781_v37 = vadd.f32 %v2721_v44, %v2639_v57  ;;  %v5121_v39 = vpop.f32.mrf.mxu0 }
 0x20d   : > { %v2723_v22 = vpop.f32.mrf.mxu1 }
 0x20e   : > { %v2763_v41 = vpop.f32.mrf.mxu0 }
 0x20f   : > { %v2724_v40 = vpop.f32.mrf.mxu1  ;;  %v2779_v36 = vadd.f32 %v2763_v41, %v2637_v15 }
 0x210   : > { %v2851_v59 = vpop.f32.mrf.mxu0 }
 0x211   : > { %v5126_v47 = vpop.f32.mrf.mxu1  ;;  %v2916_v1 = vadd.f32 %v2851_v59, %v2774_v56 }
 0x212   : > { %v2924_v50 = vadd.f32 %v5126_v47, %v2782_v63  ;;  %v2853_v52 = vpop.f32.mrf.mxu0 }
 0x213   : > { %v2902_v35 = vpop.f32.mrf.mxu1  ;;  %v2917_v53 = vadd.f32 %v2853_v52, %v2775_v20 }
 0x214   : > { %v2918_v3 = vadd.f32 %v2902_v35, %v2776_v51  ;;  %v2855_v6 = vpop.f32.mrf.mxu0 }
 0x215   : > { %v5127_v0 = vpop.f32.mrf.mxu1  ;;  %v2919_v9 = vadd.f32 %v2855_v6, %v2777_v11 }
 0x216   : > { %v2857_v7 = vpop.f32.mrf.mxu0 }
 0x217   : > { %v2905_v12 = vpop.f32.mrf.mxu1  ;;  %v2920_v14 = vadd.f32 %v2857_v7, %v2778_v31 }
 0x218   : > { %v2921_v21 = vadd.f32 %v2905_v12, %v2779_v36  ;;  %v2861_v17 = vpop.f32.mrf.mxu0 }
 0x219   : > { %v2993_v49 = vpop.f32.mrf.mxu1  ;;  %v2922_v19 = vadd.f32 %v2861_v17, %v2780_v62 }
 0x21a   : > { %v6344_v46 = vadd.f32 %v2993_v49, %v2916_v1  ;;  %v2863_v43 = vpop.f32.mrf.mxu0 }
 0x21b   : > { %v2995_v30 = vpop.f32.mrf.mxu1  ;;  %v2923_v15 = vadd.f32 %v2863_v43, %v2781_v37 }
 0x21c   : > { %v6346_v60 = vadd.f32 %v2995_v30, %v2917_v53  ;;  %v2865_v10 = vpop.f32.mrf.mxu0 }
 0x21d   : > { %v2997_v16 = vpop.f32.mrf.mxu1 }
 0x21e   : > { %v3061_v56 = vadd.f32 %v2997_v16, %v2919_v9  ;;  %v2866_v23 = vpop.f32.mrf.mxu0 }
 0x21f   : > { %v2999_v24 = vpop.f32.mrf.mxu1 }
 0x220   : > { %v3085_v57 = vadd.f32 %v6263_v58, %v3061_v56  ;;  %v3062_v20 = vadd.f32 %v2999_v24, %v2920_v14  ;;  %v5132_v26 = vpop.f32.mrf.mxu0 }
 0x221   : > { %v3003_v25 = vpop.f32.mrf.mxu1  ;;  %v3066_v31 = vadd.f32 %v5132_v26, %v2924_v50 }
 0x222   : > { %v3091_v11 = vadd.f32 1.0, %v3085_v57  ;;  %v3086_v38 = vadd.f32 %v6263_v58, %v3062_v20  ;;  %v3064_v27 = vadd.f32 %v3003_v25, %v2922_v19  ;;  %v3044_v28 = vpop.f32.mrf.mxu0 }
 0x223   : > { %v3005_v45 = vpop.f32.mrf.mxu1  ;;  %v3090_v33 = vadd.f32 %v6276_v32, %v3066_v31  ;;  %v6352_v51 = vadd.f32 %v3044_v28, %v2918_v3 }
 0x224   : > { %v3094_v62 = vsub.f32 0.0, %v3091_v11  ;;  %v3092_v63 = vadd.f32 1.0, %v3086_v38  ;;  %v3088_v44 = vadd.f32 %v6276_v32, %v3064_v27  ;;  %v3065_v37 = vadd.f32 %v3005_v45, %v2923_v15  ;;  %v5133_v39 = vpop.f32.mrf.mxu0 }
 0x225   : > { %v3007_v22 = vpop.f32.mrf.mxu1  ;;  %v3111_v59 = vadd.f32 1.0, %v3090_v33 }
 0x226   : > { %v3097_v40 = vmul.f32 1.442695, %v3094_v62  ;;  %v3095_v41 = vsub.f32 0.0, %v3092_v63  ;;  %v3109_v36 = vadd.f32 1.0, %v3088_v44  ;;  %v3089_v47 = vadd.f32 %v6276_v32, %v3065_v37  ;;  %v3047_v50 = vpop.f32.mrf.mxu0 }
 0x227   : > { %v3008_v1 = vpop.f32.mrf.mxu1  ;;  %v3114_v35 = vsub.f32 0.0, %v3111_v59  ;;  %v3063_v53 = vadd.f32 %v3047_v50, %v2921_v21 }
 0x228   : > { %5347 = vpow2.f32 %v3097_v40  ;;  %v3099_v52 = vmul.f32 1.442695, %v3095_v41  ;;  %v3246_v6 = vpop.f32.mrf.mxu0  ;;  %v3112_v9 = vsub.f32 0.0, %v3109_v36  ;;  %v3110_v7 = vadd.f32 1.0, %v3089_v47  ;;  %v6360_v47 = vpop.permute.xlu0 %4459 }
 0x229   : > { %v5138_v0 = vpop.f32.mrf.mxu1  ;;  %v3119_v3 = vmul.f32 1.442695, %v3114_v35  ;;  %v3087_v12 = vadd.f32 %v6263_v58, %v3063_v53 }
 0x22a   : > { %5349 = vpow2.f32 %v3099_v52  ;;  %v3248_v14 = vpop.f32.mrf.mxu0  ;;  %v3115_v43 = vmul.f32 1.442695, %v3112_v9  ;;  %v3113_v30 = vsub.f32 0.0, %v3110_v7 }
 0x22b   : > { %v3297_v17 = vpop.f32.mrf.mxu1  ;;  %5351 = vpow2.f32 %v3119_v3  ;;  %v3093_v49 = vadd.f32 1.0, %v3087_v12 }
 0x22c   : > { %v3250_v19 = vpop.f32.mrf.mxu0  ;;  %5353 = vpow2.f32 %v3115_v43  ;;  %v3117_v24 = vmul.f32 1.442695, %v3113_v30 }
 0x22d   : > { %v5139_v32 = vpop.f32.mrf.mxu1  ;;  %v3096_v15 = vsub.f32 0.0, %v3093_v49 }
 0x22e   : > { %v3252_v10 = vpop.f32.mrf.mxu0 }
 0x22f   : > { %v3300_v16 = vpop.f32.mrf.mxu1  ;;  %v3101_v21 = vmul.f32 1.442695, %v3096_v15 }
 0x230   : > { %v3256_v56 = vpop.f32.mrf.mxu0 }
 0x231   : > { %v3379_v23 = vpop.f32.mrf.mxu1  ;;  %5355 = vpow2.f32 %v3101_v21 }
 0x232   : > { %v3380_v57 = vadd.f32 %v3379_v23, %v3246_v6  ;;  %v3258_v20 = vpop.f32.mrf.mxu0  ;;  %5357 = vpow2.f32 %v3117_v24 }
 0x233   : > { %v3381_v58 = vpop.f32.mrf.mxu1 }
 0x234   : > { %v3382_v25 = vadd.f32 %v3381_v58, %v3248_v14  ;;  %v3260_v11 = vpop.f32.mrf.mxu0 }
 0x235   : > { %v5348_v26 = vpop.eup %5347  ;;  %v3383_v38 = vpop.f32.mrf.mxu1 }
 0x236   : > { %v3103_v27 = vadd.f32 1.0, %v5348_v26  ;;  %v6356_v31 = vadd.f32 %v3383_v38, %v3250_v19  ;;  %v3261_v28 = vpop.f32.mrf.mxu0 }
 0x237   : > { %v5350_v45 = vpop.eup %5349  ;;  %v3385_v62 = vpop.f32.mrf.mxu1 }
 0x238   : > { %5359 = vrcp.f32 %v3103_v27  ;;  %v3104_v63 = vadd.f32 1.0, %v5350_v45  ;;  %v6358_v44 = vadd.f32 %v3385_v62, %v3252_v10  ;;  %v5144_v37 = vpop.f32.mrf.mxu0  ;;  %v5352_v22 = vpop.eup %5351 }
 0x239   : > { %v3389_v33 = vpop.f32.mrf.mxu1  ;;  %v3439_v40 = vadd.f32 %v5144_v37, %v5138_v0  ;;  %v3123_v41 = vadd.f32 1.0, %v5352_v22  ;;  %v5354_v53 = vpop.eup %5353 }
 0x23a   : > { %5361 = vrcp.f32 %v3104_v63  ;;  %v3390_v39 = vadd.f32 %v3389_v33, %v3256_v56  ;;  %v3430_v59 = vpop.f32.mrf.mxu0  ;;  %v3070_v0 = vpop.permute.xlu0 %3069  ;;  %v3121_v30 = vadd.f32 1.0, %v5354_v53 }
 0x23b   : > { %v3391_v36 = vpop.f32.mrf.mxu1  ;;  %v3431_v50 = vadd.f32 %v3430_v59, %v3297_v17  ;;  %5363 = vrcp.f32 %v3123_v41  ;;  %v3083_v62 = vadd.f32 %v3070_v0, %v6346_v60 }
 0x23c   : > { %v3392_v1 = vadd.f32 %v3391_v36, %v3258_v20  ;;  %v5145_v35 = vpop.f32.mrf.mxu0 }
 0x23d   : > { %v3393_v52 = vpop.f32.mrf.mxu1 }
 0x23e   : > { %v3433_v9 = vpop.f32.mrf.mxu0  ;;  %v5356_v3 = vpop.eup %5355 }
 0x23f   : > { %v3394_v6 = vpop.f32.mrf.mxu1  ;;  %v6362_v7 = vadd.f32 %v3433_v9, %v3300_v16  ;;  %v3105_v12 = vadd.f32 1.0, %v5356_v3  ;;  %v5358_v43 = vpop.eup %5357  ;;  %v3082_v16 = vadd.f32 %v3070_v0, %v6344_v46 }
 0x240   : > { %v3512_v14 = vpop.f32.mrf.mxu0  ;;  %v3122_v26 = vadd.f32 1.0, %v5358_v43 }
 0x241   : > { %v5150_v49 = vpop.f32.mrf.mxu1  ;;  %v3577_v19 = vadd.f32 %v3512_v14, %v3380_v57  ;;  %5365 = vrcp.f32 %v3105_v12 }
 0x242   : > { %v3585_v32 = vadd.f32 %v5150_v49, %v3439_v40  ;;  %v3514_v15 = vpop.f32.mrf.mxu0  ;;  %5367 = vrcp.f32 %v3121_v30 }
 0x243   : > { %v3563_v17 = vpop.f32.mrf.mxu1  ;;  %v3578_v10 = vadd.f32 %v3514_v15, %v3382_v25  ;;  %5369 = vrcp.f32 %v3122_v26 }
 0x244   : > { %v3579_v21 = vadd.f32 %v3563_v17, %v3431_v50  ;;  %v6364_v23 = vpop.f32.mrf.mxu0 }
 0x245   : > { %v5360_v56 = vpop.eup %5359  ;;  %v5151_v24 = vpop.f32.mrf.mxu1 }
 0x246   : > { %v3127_v20 = vmul.f32 0.5, %v5360_v56  ;;  %v3139_v58 = vsub.f32 1.0, %v5360_v56  ;;  %v6367_v57 = vpop.f32.mrf.mxu0 }
 0x247   : > { %v5362_v11 = vpop.eup %5361  ;;  %v6369_v38 = vpop.f32.mrf.mxu1 }
 0x248   : > { %v3130_v27 = vmul.f32 %v3127_v20, %v6296_v55  ;;  %v3133_v25 = vmul.f32 %v3127_v20, %v6304_v2  ;;  %v3142_v45 = vmul.f32 %v3139_v58, %v3082_v16  ;;  %v3128_v28 = vmul.f32 0.5, %v5362_v11  ;;  %v3522_v33 = vpop.f32.mrf.mxu0  ;;  %v6374_v37 = vpop.eup %5363 }
 0x249   : > { %v3140_v63 = vsub.f32 1.0, %v5362_v11  ;;  %v3654_v46 = vpop.f32.mrf.mxu1  ;;  %v3156_v59 = vsub.f32 1.0, %v6374_v37  ;;  %v3583_v50 = vadd.f32 %v3522_v33, %v3390_v39  ;;  %v3084_v39 = vadd.f32 %v3070_v0, %v6352_v51 }
 0x24a   : > { %v3136_v22 = vadd.f32 %v3133_v25, %v3130_v27  ;;  %v3131_v40 = vmul.f32 %v3128_v28, %v6310_v8  ;;  %v3134_v41 = vmul.f32 %v3128_v28, %v6306_v4  ;;  %v3719_v52 = vadd.f32 %v3654_v46, %v3577_v19  ;;  %v3524_v35 = vpop.f32.mrf.mxu0 }
 0x24b   : > { %v3143_v36 = vmul.f32 %v3140_v63, %v3083_v62  ;;  %v3656_v53 = vpop.f32.mrf.mxu1  ;;  %v3584_v9 = vadd.f32 %v3524_v35, %v3392_v1  ;;  %v6380_v3 = vmul.f32 %v3156_v59, %v6314_v18 }
 0x24c   : > { %v3145_v6 = vadd.f32 %v3142_v45, %v3136_v22  ;;  %v3137_v60 = vadd.f32 %v3134_v41, %v3131_v40  ;;  %v3720_v12 = vadd.f32 %v3656_v53, %v3578_v10  ;;  %v3526_v14 = vpop.f32.mrf.mxu0 }
 0x24d   : > { %v6382_v49 = vpop.f32.mrf.mxu1 }
 0x24e   : > { %5371 = vtanh.f32 %v3145_v6  ;;  %v3146_v43 = vadd.f32 %v3143_v36, %v3137_v60  ;;  %v3527_v30 = vpop.f32.mrf.mxu0  ;;  %v5366_v17 = vpop.eup %5365 }
 0x24f   : > { %v6384_v15 = vpop.f32.mrf.mxu1  ;;  %v3129_v19 = vmul.f32 0.5, %v5366_v17  ;;  %v3141_v56 = vsub.f32 1.0, %v5366_v17  ;;  %v5368_v25 = vpop.eup %5367 }
 0x250   : > { %5373 = vtanh.f32 %v3146_v43  ;;  %v5156_v1 = vpop.f32.mrf.mxu0  ;;  %v5370_v63 = vpop.eup %5369 }
 0x251   : > { %v3664_v24 = vpop.f32.mrf.mxu1  ;;  %v3727_v20 = vadd.f32 %v5156_v1, %v3585_v32  ;;  %v3132_v10 = vmul.f32 %v3129_v19, %v6317_v29  ;;  %v3135_v58 = vmul.f32 %v3129_v19, %v6283_v42  ;;  %v3144_v26 = vmul.f32 %v3141_v56, %v3084_v39 }
 0x252   : > { %v6387_v16 = vadd.f32 %v3664_v24, %v3583_v50  ;;  %v3705_v27 = vpop.f32.mrf.mxu0  ;;  %v3154_v32 = vsub.f32 1.0, %v5368_v25  ;;  %v3155_v36 = vsub.f32 1.0, %v5370_v63 }
 0x253   : > { %v3666_v11 = vpop.f32.mrf.mxu1  ;;  %v3721_v28 = vadd.f32 %v3705_v27, %v3579_v21  ;;  %v3138_v62 = vadd.f32 %v3135_v58, %v3132_v10 }
 0x254   : > { %v6391_v45 = vadd.f32 %v3666_v11, %v3584_v9  ;;  %v5157_v0 = vpop.f32.mrf.mxu0  ;;  %v3157_v60 = vmul.f32 %v3154_v32, %v6293_v34  ;;  %v3158_v56 = vmul.f32 %v3155_v36, %v6308_v5 }
 0x255   : > { %v3668_v51 = vpop.f32.mrf.mxu1  ;;  %v3147_v33 = vadd.f32 %v3144_v26, %v3138_v62 }
 0x256   : > { %v6393_v22 = vpop.f32.mrf.mxu0 }
 0x257   : > { %v3669_v46 = vpop.f32.mrf.mxu1  ;;  %5375 = vtanh.f32 %v3147_v33 }
 0x258   : > { %v3793_v40 = vpop.f32.mrf.mxu0 }
 0x259   : > { %v5162_v41 = vpop.f32.mrf.mxu1  ;;  %v3858_v59 = vadd.f32 %v3793_v40, %v3719_v52 }
 0x25a   : > { %v6395_v50 = vadd.f32 %v5162_v41, %v3727_v20  ;;  %v3795_v53 = vpop.f32.mrf.mxu0 }
 0x25b   : > { %v5372_v35 = vpop.eup %5371  ;;  %v3844_v6 = vpop.f32.mrf.mxu1  ;;  %v3859_v9 = vadd.f32 %v3795_v53, %v3720_v12 }
 0x25c   : > { %v3151_v21 = vmul.f32 %v5372_v35, %v5368_v25  ;;  %v3860_v14 = vadd.f32 %v3844_v6, %v3721_v28  ;;  %v6398_v30 = vpop.f32.mrf.mxu0 }
 0x25d   : > { %v5374_v43 = vpop.eup %5373  ;;  %v5163_v17 = vpop.f32.mrf.mxu1 }
 0x25e   : > { %v3160_v39 = vadd.f32 %v3157_v60, %v3151_v21  ;;  %v3152_v19 = vmul.f32 %v5374_v43, %v5370_v63  ;;  %v6401_v24 = vpop.f32.mrf.mxu0 }
 0x25f   : > { %v6403_v52 = vpop.f32.mrf.mxu1 }
 0x260   : > { %v6406_v1 = vadd.f32 %v3160_v39, %v6336_v48  ;;  %v3161_v20 = vadd.f32 %v3158_v56, %v3152_v19  ;;  %v6408_v10 = vpop.f32.mrf.mxu0 }
 0x261   : > { %v3947_v12 = vpop.f32.mrf.mxu1 }
 0x262   : > { %v6411_v58 = vadd.f32 %v3161_v20, %v6339_v54  ;;  %v4012_v26 = vadd.f32 %v3947_v12, %v3858_v59  ;;  %v6413_v11 = vpop.f32.mrf.mxu0 }
 0x263   : > { %v3949_v27 = vpop.f32.mrf.mxu1 }
 0x264   : > { %v4013_v25 = vadd.f32 %v3949_v27, %v3859_v9  ;;  %v3807_v28 = vpop.f32.mrf.mxu0  ;;  %v5376_v51 = vpop.eup %5375 }
 0x265   : > { %v3951_v62 = vpop.f32.mrf.mxu1  ;;  %v3153_v0 = vmul.f32 %v5376_v51, %v6374_v37 }
 0x266   : > { %v3808_v63 = vpop.f32.mrf.mxu0 }
 0x267   : > { %v3953_v48 = vpop.f32.mrf.mxu1  ;;  %v3162_v33 = vadd.f32 %v6380_v3, %v3153_v0 }
 0x268   : > { %v5168_v32 = vpop.f32.mrf.mxu0 }
 0x269   : > { %v6417_v46 = vpop.f32.mrf.mxu1  ;;  %v6420_v54 = vadd.f32 %v3162_v33, %v6342_v61 }
 0x26a   : > { %v3998_v41 = vpop.f32.mrf.mxu0 }
 0x26b   : > { %6501 = vst [vmem:[#allocation2_spill] sm:$0xff] %v6420_v54  ;;  %v6422_v40 = vpop.f32.mrf.mxu1  ;;  %v4014_v36 = vadd.f32 %v3998_v41, %v3860_v14 }
 0x26c   : > { %v5169_v35 = vpop.f32.mrf.mxu0 }
 0x26d   : > { %v3961_v59 = vpop.f32.mrf.mxu1  ;;  %v3582_v35 = vadd.f32 %v6369_v38, %v6362_v7 }
 0x26e   : > { %v4001_v6 = vpop.f32.mrf.mxu0  ;;  %v3581_v59 = vadd.f32 %v6367_v57, %v6358_v44 }
 0x26f   : > { %v3962_v53 = vpop.f32.mrf.mxu1 }
 0x270   : > { %v4089_v21 = vpop.f32.mrf.mxu0 }
 0x271   : > { %v5174_v37 = vpop.f32.mrf.mxu1  ;;  %v6424_v60 = vadd.f32 %v4089_v21, %v4012_v26  ;;  %v4020_v21 = vadd.f32 %v5168_v32, %v6395_v50 }
 0x272   : > { %v4091_v9 = vpop.f32.mrf.mxu0 }
 0x273   : > { %v4140_v3 = vpop.f32.mrf.mxu1  ;;  %v6426_v43 = vadd.f32 %v4091_v9, %v4013_v25  ;;  %v3580_v25 = vadd.f32 %v6364_v23, %v6356_v31  ;;  %v4162_v23 = vadd.f32 %v5174_v37, %v4020_v21 }
 0x274   : > { %v6428_v17 = vadd.f32 %v4140_v3, %v4014_v36  ;;  %v4093_v61 = vpop.f32.mrf.mxu0 }
 0x275   : > { %v5175_v39 = vpop.f32.mrf.mxu1  ;;  %v3722_v53 = vadd.f32 %v6382_v49, %v3580_v25 }
 0x276   : > { %v4095_v19 = vpop.f32.mrf.mxu0  ;;  %v3723_v39 = vadd.f32 %v6384_v15, %v3581_v59 }
 0x277   : > { %v4143_v56 = vpop.f32.mrf.mxu1  ;;  %v3861_v31 = vadd.f32 %v6398_v30, %v3722_v53 }
 0x278   : > { %v4099_v20 = vpop.f32.mrf.mxu0  ;;  %v3862_v44 = vadd.f32 %v6401_v24, %v3723_v39 }
 0x279   : > { %v6430_v14 = vpop.f32.mrf.mxu1  ;;  %v4015_v7 = vadd.f32 %v3951_v62, %v3861_v31  ;;  %v3865_v62 = vadd.f32 %v6413_v11, %v6391_v45 }
 0x27a   : > { %v4101_v12 = vpop.f32.mrf.mxu0  ;;  %v4016_v32 = vadd.f32 %v3953_v48, %v3862_v44 }
 0x27b   : > { %v6432_v27 = vpop.f32.mrf.mxu1 }
 0x27c   : > { %v4103_v28 = vpop.f32.mrf.mxu0  ;;  %v4158_v59 = vadd.f32 %v4095_v19, %v4016_v32 }
 0x27d   : > { %v4235_v51 = vpop.f32.mrf.mxu1  ;;  %v3724_v28 = vadd.f32 %v6393_v22, %v3582_v35  ;;  %v3864_v22 = vadd.f32 %v6408_v10, %v6387_v16  ;;  %v4019_v10 = vadd.f32 %v6422_v40, %v3865_v62 }
 0x27e   : > { %v4104_v26 = vpop.f32.mrf.mxu0 }
 0x27f   : > { %v4237_v0 = vpop.f32.mrf.mxu1  ;;  %v3863_v57 = vadd.f32 %v6403_v52, %v3724_v28  ;;  %v4018_v48 = vadd.f32 %v6417_v46, %v3864_v22 }
 0x280   : > { %v5180_v33 = vpop.f32.mrf.mxu0 }
 0x281   : > { %v4241_v63 = vpop.f32.mrf.mxu1  ;;  %v4304_v38 = vadd.f32 %v5180_v33, %v4162_v23  ;;  %v4017_v25 = vadd.f32 %v4001_v6, %v3863_v57  ;;  %v4300_v33 = vadd.f32 %v4237_v0, %v4158_v59  ;;  %v4161_v23 = vadd.f32 %v4101_v12, %v4019_v10 }
 0x282   : > { %v6436_v36 = vpop.f32.mrf.mxu0 }
 0x283   : > { %v4243_v41 = vpop.f32.mrf.mxu1  ;;  %v4159_v24 = vadd.f32 %v4143_v56, %v4017_v25 }
 0x284   : > { %v5181_v3 = vpop.f32.mrf.mxu0  ;;  %v4303_v44 = vadd.f32 %v4243_v41, %v4161_v23  ;;  %v4298_v23 = vadd.f32 %v6436_v36, %v6428_v17 }
 0x285   : > { %v4245_v9 = vpop.f32.mrf.mxu1  ;;  %v4160_v3 = vadd.f32 %v4099_v20, %v4018_v48 }
 0x286   : > { %v4285_v54 = vpop.f32.mrf.mxu0  ;;  %v4157_v9 = vadd.f32 %v4093_v61, %v4015_v7 }
 0x287   : > { %v4246_v26 = vpop.f32.mrf.mxu1  ;;  %v4301_v53 = vadd.f32 %v4285_v54, %v4159_v24  ;;  %v4302_v45 = vadd.f32 %v4241_v63, %v4160_v3 }
 0x288   : > { %v6449_v49 = vpop.f32.mrf.mxu0  ;;  %v4299_v35 = vadd.f32 %v4235_v51, %v4157_v9 }
 0x289   : > { %v5186_v50 = vpop.f32.mrf.mxu1 }
 0x28a   : > { %v4446_v15 = vadd.f32 %v5186_v50, %v4304_v38  ;;  %v6453_v30 = vpop.f32.mrf.mxu0 }
 0x28b   : > { %v6455_v37 = vpop.f32.mrf.mxu1 }
 0x28c   : > { %v4470_v52 = vadd.f32 %v6360_v47, %v4446_v15  ;;  %v4377_v6 = vpop.f32.mrf.mxu0 }
 0x28d   : > { %v5187_v61 = vpop.f32.mrf.mxu1  ;;  %v4441_v16 = vadd.f32 %v4377_v6, %v4299_v35 }
 0x28e   : > { %v4491_v21 = vadd.f32 1.0, %v4470_v52  ;;  %v4379_v39 = vpop.f32.mrf.mxu0 }
 0x28f   : > { %v4427_v19 = vpop.f32.mrf.mxu1  ;;  %v4465_v51 = vadd.f32 %v6269_v13, %v4441_v16  ;;  %v4442_v28 = vadd.f32 %v4379_v39, %v4300_v33  ;;  %v4296_v39 = vadd.f32 %v6430_v14, %v6424_v60  ;;  %v4440_v60 = vadd.f32 %v6455_v37, %v4298_v23 }
 0x290   : > { %v4494_v56 = vsub.f32 0.0, %v4491_v21  ;;  %v4443_v31 = vadd.f32 %v4427_v19, %v4301_v53  ;;  %v4383_v11 = vpop.f32.mrf.mxu0 }
 0x291   : > { %v4471_v26 = vadd.f32 1.0, %v4465_v51  ;;  %v4466_v0 = vadd.f32 %v6269_v13, %v4442_v28  ;;  %v4444_v57 = vadd.f32 %v4383_v11, %v4302_v45  ;;  %v4438_v51 = vadd.f32 %v6449_v49, %v4296_v39  ;;  %v4450_v45 = vpop.permute.xlu1 %4449 }
 0x292   : > { %v4499_v46 = vmul.f32 1.442695, %v4494_v56  ;;  %v4467_v54 = vadd.f32 %v6269_v13, %v4443_v31  ;;  %v4385_v40 = vpop.f32.mrf.mxu0  ;;  %v4297_v56 = vadd.f32 %v6432_v27, %v6426_v43 }
 0x293   : > { %v4474_v20 = vsub.f32 0.0, %v4471_v26  ;;  %v4472_v7 = vadd.f32 1.0, %v4466_v0  ;;  %v4468_v50 = vadd.f32 %v6360_v47, %v4444_v57  ;;  %v4445_v32 = vadd.f32 %v4385_v40, %v4303_v44 }
 0x294   : > { %5377 = vpow2.f32 %v4499_v46  ;;  %v4473_v38 = vadd.f32 1.0, %v4467_v54  ;;  %v4387_v25 = vpop.f32.mrf.mxu0  ;;  %v4439_v11 = vadd.f32 %v6453_v30, %v4297_v56  ;;  %v4462_v14 = vadd.f32 %v4450_v45, %v4438_v51 }
 0x295   : > { %v4477_v12 = vmul.f32 1.442695, %v4474_v20  ;;  %v4475_v63 = vsub.f32 0.0, %v4472_v7  ;;  %v4489_v15 = vadd.f32 1.0, %v4468_v50  ;;  %v4469_v22 = vadd.f32 %v6360_v47, %v4445_v32 }
 0x296   : > { %v4476_v9 = vsub.f32 0.0, %v4473_v38  ;;  %v4388_v59 = vpop.f32.mrf.mxu0  ;;  %v4463_v49 = vadd.f32 %v4450_v45, %v4439_v11  ;;  %v4464_v20 = vadd.f32 %v4450_v45, %v4440_v60 }
 0x297   : > { %5379 = vpow2.f32 %v4477_v12  ;;  %v4479_v13 = vmul.f32 1.442695, %v4475_v63  ;;  %v4490_v24 = vadd.f32 1.0, %v4469_v22  ;;  %v4492_v35 = vsub.f32 0.0, %v4489_v15 }
 0x298   : > { %v4481_v41 = vmul.f32 1.442695, %v4476_v9 }
 0x299   : > { %5381 = vpow2.f32 %v4479_v13  ;;  %v4493_v52 = vsub.f32 0.0, %v4490_v24  ;;  %v4495_v62 = vmul.f32 1.442695, %v4492_v35 }
 0x29a   : > { %5383 = vpow2.f32 %v4481_v41 }
 0x29b   : > { %v4497_v61 = vmul.f32 1.442695, %v4493_v52  ;;  %5385 = vpow2.f32 %v4495_v62 }
 0x2a1   : > { %v5378_v48 = vpop.eup %5377 }
 0x2a2   : > { %v4503_v6 = vadd.f32 1.0, %v5378_v48 }
 0x2a4   : > { %5387 = vrcp.f32 %v4503_v6  ;;  %v5380_v33 = vpop.eup %5379 }
 0x2a5   : > { %v4483_v53 = vadd.f32 1.0, %v5380_v33  ;;  %5389 = vpow2.f32 %v4497_v61 }
 0x2a6   : > { %v5382_v21 = vpop.eup %5381 }
 0x2a7   : > { %v5384_v47 = vpop.eup %5383  ;;  %5391 = vrcp.f32 %v4483_v53  ;;  %v4484_v16 = vadd.f32 1.0, %v5382_v21 }
 0x2a8   : > { %v4485_v10 = vadd.f32 1.0, %v5384_v47  ;;  %v5386_v3 = vpop.eup %5385 }
 0x2a9   : > { %5393 = vrcp.f32 %v4484_v16  ;;  %v4501_v46 = vadd.f32 1.0, %v5386_v3  ;;  %v6502_v16 = vld [vmem:[#allocation2_spill] sm:$0xff] }
 0x2aa   : > { %5395 = vrcp.f32 %v4485_v10 }
 0x2ab   : > { %5397 = vrcp.f32 %v4501_v46 }
 0x2b1   : > { %v5388_v19 = vpop.eup %5387 }
 0x2b2   : > { %v4536_v28 = vsub.f32 1.0, %v5388_v19  ;;  %v5390_v31 = vpop.eup %5389 }
 0x2b3   : > { %v4502_v43 = vadd.f32 1.0, %v5390_v31 }
 0x2b4   : > { %v4539_v26 = vmul.f32 %v4536_v28, %v6317_v29  ;;  %v5392_v0 = vpop.eup %5391 }
 0x2b5   : > { %v4507_v54 = vmul.f32 0.5, %v5392_v0  ;;  %v4519_v44 = vsub.f32 1.0, %v5392_v0  ;;  %5399 = vrcp.f32 %v4502_v43 }
 0x2b6   : > { %v5394_v27 = vpop.eup %5393 }
 0x2b7   : > { %v5396_v57 = vpop.eup %5395  ;;  %v4510_v40 = vmul.f32 %v4507_v54, %v6304_v2  ;;  %v4513_v17 = vmul.f32 %v4507_v54, %v6293_v34  ;;  %v4522_v36 = vmul.f32 %v4519_v44, %v4462_v14  ;;  %v4508_v30 = vmul.f32 0.5, %v5394_v27 }
 0x2b8   : > { %v4520_v7 = vsub.f32 1.0, %v5394_v27  ;;  %v4509_v29 = vmul.f32 0.5, %v5396_v57  ;;  %v4521_v38 = vsub.f32 1.0, %v5396_v57  ;;  %v5398_v13 = vpop.eup %5397 }
 0x2b9   : > { %v4516_v50 = vadd.f32 %v4513_v17, %v4510_v40  ;;  %v4511_v37 = vmul.f32 %v4508_v30, %v6306_v4  ;;  %v4514_v32 = vmul.f32 %v4508_v30, %v6308_v5  ;;  %v4534_v41 = vsub.f32 1.0, %v5398_v13 }
 0x2ba   : > { %v4523_v25 = vmul.f32 %v4520_v7, %v4463_v49  ;;  %v4512_v12 = vmul.f32 %v4509_v29, %v6283_v42  ;;  %v4515_v2 = vmul.f32 %v4509_v29, %v6314_v18  ;;  %v4524_v63 = vmul.f32 %v4521_v38, %v4464_v20 }
 0x2bb   : > { %v4525_v34 = vadd.f32 %v4522_v36, %v4516_v50  ;;  %v4517_v9 = vadd.f32 %v4514_v32, %v4511_v37  ;;  %v4537_v42 = vmul.f32 %v4534_v41, %v6296_v55 }
 0x2bc   : > { %v4518_v15 = vadd.f32 %v4515_v2, %v4512_v12 }
 0x2bd   : > { %5401 = vtanh.f32 %v4525_v34  ;;  %v4526_v22 = vadd.f32 %v4523_v25, %v4517_v9 }
 0x2be   : > { %v4527_v59 = vadd.f32 %v4524_v63, %v4518_v15 }
 0x2bf   : > { %5403 = vtanh.f32 %v4526_v22 }
 0x2c0   : > { %5405 = vtanh.f32 %v4527_v59 }
 0x2c2   : > { %v5400_v4 = vpop.eup %5399 }
 0x2c3   : > { %v4535_v5 = vsub.f32 1.0, %v5400_v4 }
 0x2c5   : > { %v4538_v6 = vmul.f32 %v4535_v5, %v6310_v8 }
 0x2ca   : > { %v5402_v24 = vpop.eup %5401 }
 0x2cb   : > { %v4531_v35 = vmul.f32 %v5402_v24, %v5398_v13 }
 0x2cc   : > { %v5404_v52 = vpop.eup %5403 }
 0x2cd   : > { %v5406_v18 = vpop.eup %5405  ;;  %v4540_v62 = vadd.f32 %v4537_v42, %v4531_v35  ;;  %v4532_v48 = vmul.f32 %v5404_v52, %v5400_v4 }
 0x2ce   : > { %v4533_v61 = vmul.f32 %v5406_v18, %v5388_v19 }
 0x2cf   : > { %v4543_v33 = vadd.f32 %v4540_v62, %v6406_v1  ;;  %v4541_v53 = vadd.f32 %v4538_v6, %v4532_v48 }
 0x2d0   : > { %v4542_v21 = vadd.f32 %v4539_v26, %v4533_v61 }
 0x2d1   : > { %4546 = vst [vmem:[%s264_s6] sm:$0xff] %v4543_v33  ;;  %v4544_v47 = vadd.f32 %v4541_v53, %v6411_v58 }
 0x2d2   : > { %v4545_v55 = vadd.f32 %v4542_v21, %v6502_v16 }
 0x2d3   : > { %4547 = vst [vmem:[%s264_s6 + $0x8] sm:$0xff] %v4544_v47 }
 0x2d4   : > { %4548 = vst [vmem:[%s264_s6 + $0x10] sm:$0xff] %v4545_v55 }
 0x2d5 PF: > { %s15_s18 = sadd.s32 1, %s5418_s18  }
 0x2d6   : > { %p12_p4 = scmp.ge.s32.totalorder %s15_s18, 4  }
 0x2d8   :  { %14 = sbr.rel (!%p12_p4) target bundleno = 1 (0x1), region = 104 }

</bundles_post_ra>
